<compile_context>
chip_gen: v7x
topology: tpu7x:2x2x1
jax: 0.10.0
libtpu: 0.0.40
codegen_flags: <defaults>
</compile_context>

<pallas_src>
import math

import jax
import jax.numpy as jnp
from jax.experimental import pallas as pl
from jax.experimental.pallas import tpu as pltpu

# ---- model hyper-parameters (small, TPU-tile friendly) ----
CONV_LAYERS = 2
HIDDEN = 128          # hidden_dim, divisible by n_heads=16, lane-aligned
N_HEADS = 16
HEAD_DIM = HIDDEN // N_HEADS
FF_DIM = 256          # feed_forward_dim (small stand-in for 2048)
SEQ = 16
BATCH = 2
LN_EPS = 1e-5

# rows of the packed (.., HIDDEN) bias/LN blob
IDX_CONVB = 0                      # rows [0, CONV_LAYERS)
IDX_BO = CONV_LAYERS
IDX_LN1G = CONV_LAYERS + 1
IDX_LN1B = CONV_LAYERS + 2
IDX_B2 = CONV_LAYERS + 3
IDX_LN2G = CONV_LAYERS + 4
IDX_LN2B = CONV_LAYERS + 5


def _layer_norm(x, g, b):
    mu = jnp.mean(x, axis=-1, keepdims=True)
    var = jnp.mean((x - mu) ** 2, axis=-1, keepdims=True)
    return (x - mu) * jax.lax.rsqrt(var + LN_EPS) * g + b


def encoder_kernel(x_ref, convw_ref, wqkv_ref, bqkv_ref, wo3_ref, blob_ref,
                   w1_ref, b1_ref, w2_ref, out_ref):
    nb, t, d = x_ref.shape
    nt = nb * t
    x = x_ref[...].astype(jnp.float32).reshape(nt, d)     # (NB*T, D)
    blob = blob_ref[...].astype(jnp.float32)              # (8, D) packed biases

    # ---- ConvEncoder: CONV_LAYERS x (Conv1d(k=3, pad=1) + ReLU), taps fused ----
    # Boundary masks hoisted out of the trace-unrolled layer loop; built from
    # the per-sequence position so the conv never leaks across batch rows.
    tpos = jax.lax.broadcasted_iota(jnp.int32, (nb, t, d), 1).reshape(nt, d)
    has_prev = tpos != 0
    has_next = tpos != t - 1
    for l in range(CONV_LAYERS):
        x_prev = jnp.where(has_prev, pltpu.roll(x, shift=1, axis=0), 0.0)
        x_next = jnp.where(has_next, pltpu.roll(x, shift=nt - 1, axis=0), 0.0)
        xs = jnp.concatenate([x_prev, x, x_next], axis=-1)          # (NT, 3D)
        y = (jnp.dot(xs, convw_ref[l], preferred_element_type=jnp.float32)
             + blob[IDX_CONVB + l:IDX_CONVB + l + 1, :])
        x = jnp.maximum(y, 0.0)

    # ---- MultiHeadAttention (16 heads, batched over heads) ----
    scale = 1.0 / math.sqrt(HEAD_DIM)
    wqkv = wqkv_ref[...]                                   # (D, 3D)
    bqkv = bqkv_ref[...]                                   # (1, 3D)
    wo3 = wo3_ref[...]                                     # (H, Hd, D)
    attn_rows = []
    for b in range(nb):                                    # tiny static unroll
        xb = x[b * t:(b + 1) * t, :]                       # (T, D)
        qkv = jnp.dot(xb, wqkv, preferred_element_type=jnp.float32) + bqkv
        # (T, 3D) -> transpose -> (3D, T); splitting 3D into (3H, Hd) is a
        # layout no-op (sublane split by 8); then swap minor dims -> (3H, T, Hd)
        qkvh = jnp.swapaxes(qkv.T.reshape(3 * N_HEADS, HEAD_DIM, t), 1, 2)
        qh = qkvh[:N_HEADS]                                # (H, T, Hd)
        kh = qkvh[N_HEADS:2 * N_HEADS]
        vh = qkvh[2 * N_HEADS:]
        s = jnp.einsum("htd,hsd->hts", qh, kh,
                       preferred_element_type=jnp.float32) * scale
        s = s - jnp.max(s, axis=-1, keepdims=True)
        p = jnp.exp(s)
        p = p * pl.reciprocal(jnp.sum(p, axis=-1, keepdims=True), approx=True)
        ctx = jnp.einsum("hts,hsd->htd", p, vh,
                         preferred_element_type=jnp.float32)         # (H, T, Hd)
        po = jnp.einsum("htd,hde->hte", ctx, wo3,
                        preferred_element_type=jnp.float32)          # (H, T, D)
        attn_rows.append(jnp.sum(po, axis=0))                        # (T, D)
    attn = attn_rows[0] if nb == 1 else jnp.concatenate(attn_rows, axis=0)
    attn = attn + blob[IDX_BO:IDX_BO + 1, :]
    x = _layer_norm(x + attn,
                    blob[IDX_LN1G:IDX_LN1G + 1, :],
                    blob[IDX_LN1B:IDX_LN1B + 1, :])

    # ---- PositionFeedforward: Linear -> ReLU -> Linear (+ residual + LN) ----
    h = jnp.maximum(
        jnp.dot(x, w1_ref[...], preferred_element_type=jnp.float32) + b1_ref[...],
        0.0)
    h = (jnp.dot(h, w2_ref[...], preferred_element_type=jnp.float32)
         + blob[IDX_B2:IDX_B2 + 1, :])
    x = _layer_norm(x + h,
                    blob[IDX_LN2G:IDX_LN2G + 1, :],
                    blob[IDX_LN2B:IDX_LN2B + 1, :])

    out_ref[...] = x.reshape(nb, t, d).astype(out_ref.dtype)


def build_params(key):
    ks = jax.random.split(key, 14)

    def w(k, shape, scale=0.05):
        return jax.random.normal(k, shape, jnp.float32) * scale

    return {
        # conv weight layout: (layer, tap, in_ch, out_ch); tap order (t-1, t, t+1)
        # == PyTorch Conv1d weight (out, in, k) permuted.
        "conv_w": w(ks[0], (CONV_LAYERS, 3, HIDDEN, HIDDEN)),
        "conv_b": w(ks[1], (CONV_LAYERS, HIDDEN)),
        "wq": w(ks[2], (HIDDEN, HIDDEN)), "bq": w(ks[3], (1, HIDDEN)),
        "wk": w(ks[4], (HIDDEN, HIDDEN)), "bk": w(ks[5], (1, HIDDEN)),
        "wv": w(ks[6], (HIDDEN, HIDDEN)), "bv": w(ks[7], (1, HIDDEN)),
        "wo": w(ks[8], (HIDDEN, HIDDEN)), "bo": w(ks[9], (1, HIDDEN)),
        "ln1g": jnp.ones((1, HIDDEN), jnp.float32),
        "ln1b": jnp.zeros((1, HIDDEN), jnp.float32),
        "w1": w(ks[10], (HIDDEN, FF_DIM)), "b1": w(ks[11], (1, FF_DIM)),
        "w2": w(ks[12], (FF_DIM, HIDDEN)), "b2": w(ks[13], (1, HIDDEN)),
        "ln2g": jnp.ones((1, HIDDEN), jnp.float32),
        "ln2b": jnp.zeros((1, HIDDEN), jnp.float32),
    }


PREPPED_ORDER = ["conv_w", "wqkv", "bqkv", "wo3", "blob", "w1", "b1", "w2"]


def prep_params(p):
    """Host-side packing (free): fuse conv taps / QKV weights, reshape wo per
    head, and pack all (1, HIDDEN) biases + LN params into one blob so the
    kernel has 9 inputs (DMA descriptors) instead of 19."""
    conv_w = p["conv_w"].reshape(CONV_LAYERS, 3 * HIDDEN, HIDDEN)     # (L, 3D, D)
    wqkv = jnp.concatenate([p["wq"], p["wk"], p["wv"]], axis=1)       # (D, 3D)
    bqkv = jnp.concatenate([p["bq"], p["bk"], p["bv"]], axis=1)       # (1, 3D)
    wo3 = p["wo"].reshape(N_HEADS, HEAD_DIM, HIDDEN)                  # (H, Hd, D)
    blob = jnp.concatenate(
        [p["conv_b"], p["bo"], p["ln1g"], p["ln1b"],
         p["b2"], p["ln2g"], p["ln2b"]], axis=0)                      # (L+6, D)
    pad = (-blob.shape[0]) % 8
    if pad:
        blob = jnp.concatenate(
            [blob, jnp.zeros((pad, HIDDEN), blob.dtype)], axis=0)
    return {"conv_w": conv_w, "wqkv": wqkv, "bqkv": bqkv, "wo3": wo3,
            "blob": blob, "w1": p["w1"], "b1": p["b1"], "w2": p["w2"]}


def _batch_block(batch):
    """Dual-TensorCore chips (v4 megacore, v5p, v7x): keep a parallel grid over
    batch so each core gets a batch element.  Single-TC chips (v5e/v6e):
    collapse the grid so matmuls see all B*T rows and per-step overhead is
    paid once."""
    try:
        kind = jax.devices()[0].device_kind.lower()
    except Exception:
        kind = ""
    dual_tc = any(tag in kind for tag in ("v7", "7x", "v4", "v5p"))
    if dual_tc and batch % 2 == 0:
        return 1
    return batch


def encoder_forward(x, params):
    B, T, D = x.shape
    nb = _batch_block(B)
    prepped = prep_params(params)
    args = [prepped[name] for name in PREPPED_ORDER]

    def full_spec(a):
        nd = a.ndim
        return pl.BlockSpec(a.shape, lambda i, _nd=nd: (0,) * _nd)

    in_specs = ([pl.BlockSpec((nb, T, D), lambda i: (i, 0, 0))]
                + [full_spec(a) for a in args])

    return pl.pallas_call(
        encoder_kernel,
        out_shape=jax.ShapeDtypeStruct((B, T, D), x.dtype),
        grid_spec=pltpu.PrefetchScalarGridSpec(
            num_scalar_prefetch=0,
            grid=(B // nb,),
            in_specs=in_specs,
            out_specs=pl.BlockSpec((nb, T, D), lambda i: (i, 0, 0)),
        ),
        compiler_params=pltpu.CompilerParams(
            dimension_semantics=("parallel",)),
    )(x, *args)


if __name__ == "__main__":
    key = jax.random.PRNGKey(0)
    k_x, k_p = jax.random.split(key)
    x = jax.random.normal(k_x, (BATCH, SEQ, HIDDEN), jnp.float32)
    params = build_params(k_p)

    out = encoder_forward(x, params)
    out = jax.block_until_ready(out)

    assert out.shape == (BATCH, SEQ, HIDDEN), out.shape
    assert out.dtype == jnp.float32
    assert bool(jnp.all(jnp.isfinite(out)))
    print("KERNEL_OK")
</pallas_src>

<mosaic_0001>
module attributes {stable_mosaic.version = 11 : i64} {
  func.func @encoder_kernel(%arg0: i32, %arg1: memref<2x16x128xf32, #tpu.memory_space<vmem>>, %arg2: memref<2x384x128xf32, #tpu.memory_space<vmem>>, %arg3: memref<128x384xf32, #tpu.memory_space<vmem>>, %arg4: memref<1x384xf32, #tpu.memory_space<vmem>>, %arg5: memref<16x8x128xf32, #tpu.memory_space<vmem>>, %arg6: memref<8x128xf32, #tpu.memory_space<vmem>>, %arg7: memref<128x256xf32, #tpu.memory_space<vmem>>, %arg8: memref<1x256xf32, #tpu.memory_space<vmem>>, %arg9: memref<256x128xf32, #tpu.memory_space<vmem>>, %arg10: memref<2x16x128xf32, #tpu.memory_space<vmem>>) attributes {dimension_semantics = [#tpu.dimension_semantics<parallel>], iteration_bounds = array<i64: 1>, scalar_prefetch = 0 : i64, scratch_operands = 0 : i64, tpu.core_type = #tpu.core_type<tc>, window_params = [{transform_indices = @transform_0, window_bounds = array<i64: 2, 16, 128>}, {pipeline_mode = #tpu.pipeline_mode<synchronous>, transform_indices = @transform_1, window_bounds = array<i64: 2, 384, 128>}, {pipeline_mode = #tpu.pipeline_mode<synchronous>, transform_indices = @transform_2, window_bounds = array<i64: 128, 384>}, {pipeline_mode = #tpu.pipeline_mode<synchronous>, transform_indices = @transform_3, window_bounds = array<i64: 1, 384>}, {pipeline_mode = #tpu.pipeline_mode<synchronous>, transform_indices = @transform_4, window_bounds = array<i64: 16, 8, 128>}, {pipeline_mode = #tpu.pipeline_mode<synchronous>, transform_indices = @transform_5, window_bounds = array<i64: 8, 128>}, {pipeline_mode = #tpu.pipeline_mode<synchronous>, transform_indices = @transform_6, window_bounds = array<i64: 128, 256>}, {pipeline_mode = #tpu.pipeline_mode<synchronous>, transform_indices = @transform_7, window_bounds = array<i64: 1, 256>}, {pipeline_mode = #tpu.pipeline_mode<synchronous>, transform_indices = @transform_8, window_bounds = array<i64: 256, 128>}, {transform_indices = @transform_9, window_bounds = array<i64: 2, 16, 128>}]} {
    %c0 = arith.constant 0 : index
    %c0_0 = arith.constant 0 : index
    %c0_1 = arith.constant 0 : index
    %0 = vector.load %arg1[%c0, %c0_0, %c0_1] : memref<2x16x128xf32, #tpu.memory_space<vmem>>, vector<2x16x128xf32>
    %1 = vector.shape_cast %0 : vector<2x16x128xf32> to vector<32x128xf32>
    %c0_2 = arith.constant 0 : index
    %c0_3 = arith.constant 0 : index
    %2 = vector.load %arg6[%c0_2, %c0_3] : memref<8x128xf32, #tpu.memory_space<vmem>>, vector<8x128xf32>
    %3 = tpu.iota {dimensions = array<i32: 1>} : vector<2x16x128xi32>
    %4 = vector.shape_cast %3 : vector<2x16x128xi32> to vector<32x128xi32>
    %c0_i32 = arith.constant 0 : i32
    %5 = vector.broadcast %c0_i32 : i32 to vector<32x128xi32>
    %6 = arith.cmpi ne, %4, %5 : vector<32x128xi32>
    %c15_i32 = arith.constant 15 : i32
    %7 = vector.broadcast %c15_i32 : i32 to vector<32x128xi32>
    %8 = arith.cmpi ne, %4, %7 : vector<32x128xi32>
    %c1_i32 = arith.constant 1 : i32
    %9 = tpu.dynamic_rotate %1 by %c1_i32 dim 0 : vector<32x128xf32>, i32 -> vector<32x128xf32>
    %cst = arith.constant 0.000000e+00 : f32
    %10 = vector.broadcast %cst : f32 to vector<32x128xf32>
    %11 = arith.select %6, %9, %10 : vector<32x128xi1>, vector<32x128xf32>
    %c31_i32 = arith.constant 31 : i32
    %12 = tpu.dynamic_rotate %1 by %c31_i32 dim 0 : vector<32x128xf32>, i32 -> vector<32x128xf32>
    %cst_4 = arith.constant 0.000000e+00 : f32
    %13 = vector.broadcast %cst_4 : f32 to vector<32x128xf32>
    %14 = arith.select %8, %12, %13 : vector<32x128xi1>, vector<32x128xf32>
    %15 = tpu.concatenate %11, %1, %14 in 1 : vector<32x128xf32>, vector<32x128xf32>, vector<32x128xf32> -> vector<32x384xf32>
    %c0_5 = arith.constant 0 : index
    %c0_6 = arith.constant 0 : index
    %c0_7 = arith.constant 0 : index
    %16 = vector.load %arg2[%c0_5, %c0_6, %c0_7] : memref<2x384x128xf32, #tpu.memory_space<vmem>>, vector<1x384x128xf32>
    %17 = vector.shape_cast %16 : vector<1x384x128xf32> to vector<384x128xf32>
    %cst_8 = arith.constant dense<0.000000e+00> : vector<32x128xf32>
    %18 = tpu.matmul %15, %17, %cst_8 {dimension_numbers = #tpu.dot_dimension_numbers<[1], [0], [0], [1], [0, 0, 1, 1], [], []>} : vector<32x384xf32>, vector<384x128xf32>, vector<32x128xf32> -> vector<32x128xf32>
    %19 = vector.extract_strided_slice %2 {offsets = [0, 0], sizes = [1, 128], strides = [1, 1]} : vector<8x128xf32> to vector<1x128xf32>
    %20 = vector.broadcast %19 : vector<1x128xf32> to vector<32x128xf32>
    %21 = arith.addf %18, %20 : vector<32x128xf32>
    %cst_9 = arith.constant 0.000000e+00 : f32
    %22 = vector.broadcast %cst_9 : f32 to vector<32x128xf32>
    %23 = arith.maximumf %21, %22 : vector<32x128xf32>
    %c1_i32_10 = arith.constant 1 : i32
    %24 = tpu.dynamic_rotate %23 by %c1_i32_10 dim 0 : vector<32x128xf32>, i32 -> vector<32x128xf32>
    %cst_11 = arith.constant 0.000000e+00 : f32
    %25 = vector.broadcast %cst_11 : f32 to vector<32x128xf32>
    %26 = arith.select %6, %24, %25 : vector<32x128xi1>, vector<32x128xf32>
    %c31_i32_12 = arith.constant 31 : i32
    %27 = tpu.dynamic_rotate %23 by %c31_i32_12 dim 0 : vector<32x128xf32>, i32 -> vector<32x128xf32>
    %cst_13 = arith.constant 0.000000e+00 : f32
    %28 = vector.broadcast %cst_13 : f32 to vector<32x128xf32>
    %29 = arith.select %8, %27, %28 : vector<32x128xi1>, vector<32x128xf32>
    %30 = tpu.concatenate %26, %23, %29 in 1 : vector<32x128xf32>, vector<32x128xf32>, vector<32x128xf32> -> vector<32x384xf32>
    %c1 = arith.constant 1 : index
    %c0_14 = arith.constant 0 : index
    %c0_15 = arith.constant 0 : index
    %31 = vector.load %arg2[%c1, %c0_14, %c0_15] : memref<2x384x128xf32, #tpu.memory_space<vmem>>, vector<1x384x128xf32>
    %32 = vector.shape_cast %31 : vector<1x384x128xf32> to vector<384x128xf32>
    %cst_16 = arith.constant dense<0.000000e+00> : vector<32x128xf32>
    %33 = tpu.matmul %30, %32, %cst_16 {dimension_numbers = #tpu.dot_dimension_numbers<[1], [0], [0], [1], [0, 0, 1, 1], [], []>} : vector<32x384xf32>, vector<384x128xf32>, vector<32x128xf32> -> vector<32x128xf32>
    %34 = vector.extract_strided_slice %2 {offsets = [1, 0], sizes = [1, 128], strides = [1, 1]} : vector<8x128xf32> to vector<1x128xf32>
    %35 = vector.broadcast %34 : vector<1x128xf32> to vector<32x128xf32>
    %36 = arith.addf %33, %35 : vector<32x128xf32>
    %cst_17 = arith.constant 0.000000e+00 : f32
    %37 = vector.broadcast %cst_17 : f32 to vector<32x128xf32>
    %38 = arith.maximumf %36, %37 : vector<32x128xf32>
    %c0_18 = arith.constant 0 : index
    %c0_19 = arith.constant 0 : index
    %39 = vector.load %arg3[%c0_18, %c0_19] : memref<128x384xf32, #tpu.memory_space<vmem>>, vector<128x384xf32>
    %c0_20 = arith.constant 0 : index
    %c0_21 = arith.constant 0 : index
    %40 = vector.load %arg4[%c0_20, %c0_21] : memref<1x384xf32, #tpu.memory_space<vmem>>, vector<1x384xf32>
    %c0_22 = arith.constant 0 : index
    %c0_23 = arith.constant 0 : index
    %c0_24 = arith.constant 0 : index
    %41 = vector.load %arg5[%c0_22, %c0_23, %c0_24] : memref<16x8x128xf32, #tpu.memory_space<vmem>>, vector<16x8x128xf32>
    %42 = vector.extract_strided_slice %38 {offsets = [0, 0], sizes = [16, 128], strides = [1, 1]} : vector<32x128xf32> to vector<16x128xf32>
    %cst_25 = arith.constant dense<0.000000e+00> : vector<16x384xf32>
    %43 = tpu.matmul %42, %39, %cst_25 {dimension_numbers = #tpu.dot_dimension_numbers<[1], [0], [0], [1], [0, 0, 1, 1], [], []>} : vector<16x128xf32>, vector<128x384xf32>, vector<16x384xf32> -> vector<16x384xf32>
    %44 = vector.broadcast %40 : vector<1x384xf32> to vector<16x384xf32>
    %45 = arith.addf %43, %44 : vector<16x384xf32>
    %46 = tpu.transpose %45, [1, 0] : vector<16x384xf32> -> vector<384x16xf32>
    %47 = vector.shape_cast %46 : vector<384x16xf32> to vector<48x8x16xf32>
    %48 = tpu.transpose %47, [0, 2, 1] : vector<48x8x16xf32> -> vector<48x16x8xf32>
    %49 = vector.extract_strided_slice %48 {offsets = [0, 0, 0], sizes = [16, 16, 8], strides = [1, 1, 1]} : vector<48x16x8xf32> to vector<16x16x8xf32>
    %50 = vector.extract_strided_slice %48 {offsets = [16, 0, 0], sizes = [16, 16, 8], strides = [1, 1, 1]} : vector<48x16x8xf32> to vector<16x16x8xf32>
    %51 = vector.extract_strided_slice %48 {offsets = [32, 0, 0], sizes = [16, 16, 8], strides = [1, 1, 1]} : vector<48x16x8xf32> to vector<16x16x8xf32>
    "tpu.trace_start"() <{level = 10 : i32, message = "htd,hsd->hts"}> : () -> ()
    %cst_26 = arith.constant dense<0.000000e+00> : vector<16x16x16xf32>
    %52 = tpu.matmul %49, %50, %cst_26 {dimension_numbers = #tpu.dot_dimension_numbers<[2], [2], [1], [1], [0, 0, 0, 1, 1, 1], [0], [0]>} : vector<16x16x8xf32>, vector<16x16x8xf32>, vector<16x16x16xf32> -> vector<16x16x16xf32>
    "tpu.trace_stop"() : () -> ()
    %cst_27 = arith.constant 0.353553385 : f32
    %53 = vector.broadcast %cst_27 : f32 to vector<16x16x16xf32>
    %54 = arith.mulf %52, %53 : vector<16x16x16xf32>
    %cst_28 = arith.constant dense<0xFF800000> : vector<16x16xf32>
    %55 = vector.multi_reduction <maximumf>, %54, %cst_28 [2] : vector<16x16x16xf32> to vector<16x16xf32>
    %56 = vector.shape_cast %55 : vector<16x16xf32> to vector<16x16x1xf32>
    %57 = vector.broadcast %56 : vector<16x16x1xf32> to vector<16x16x16xf32>
    %58 = arith.subf %54, %57 : vector<16x16x16xf32>
    %59 = math.exp %58 : vector<16x16x16xf32>
    %cst_29 = arith.constant dense<0.000000e+00> : vector<16x16xf32>
    %60 = vector.multi_reduction <add>, %59, %cst_29 [2] : vector<16x16x16xf32> to vector<16x16xf32>
    %61 = vector.shape_cast %60 : vector<16x16xf32> to vector<16x16x1xf32>
    %62 = tpu.reciprocal %61 {approx = true} : vector<16x16x1xf32> -> vector<16x16x1xf32>
    %63 = vector.broadcast %62 : vector<16x16x1xf32> to vector<16x16x16xf32>
    %64 = arith.mulf %59, %63 : vector<16x16x16xf32>
    "tpu.trace_start"() <{level = 10 : i32, message = "hts,hsd->htd"}> : () -> ()
    %cst_30 = arith.constant dense<0.000000e+00> : vector<16x16x8xf32>
    %65 = tpu.matmul %64, %51, %cst_30 {dimension_numbers = #tpu.dot_dimension_numbers<[2], [1], [1], [2], [0, 0, 0, 1, 1, 2], [0], [0]>} : vector<16x16x16xf32>, vector<16x16x8xf32>, vector<16x16x8xf32> -> vector<16x16x8xf32>
    "tpu.trace_stop"() : () -> ()
    "tpu.trace_start"() <{level = 10 : i32, message = "htd,hde->hte"}> : () -> ()
    %cst_31 = arith.constant dense<0.000000e+00> : vector<16x16x128xf32>
    %66 = tpu.matmul %65, %41, %cst_31 {dimension_numbers = #tpu.dot_dimension_numbers<[2], [1], [1], [2], [0, 0, 0, 1, 1, 2], [0], [0]>} : vector<16x16x8xf32>, vector<16x8x128xf32>, vector<16x16x128xf32> -> vector<16x16x128xf32>
    "tpu.trace_stop"() : () -> ()
    %cst_32 = arith.constant dense<0.000000e+00> : vector<16x128xf32>
    %67 = vector.multi_reduction <add>, %66, %cst_32 [0] : vector<16x16x128xf32> to vector<16x128xf32>
    %68 = vector.extract_strided_slice %38 {offsets = [16, 0], sizes = [16, 128], strides = [1, 1]} : vector<32x128xf32> to vector<16x128xf32>
    %cst_33 = arith.constant dense<0.000000e+00> : vector<16x384xf32>
    %69 = tpu.matmul %68, %39, %cst_33 {dimension_numbers = #tpu.dot_dimension_numbers<[1], [0], [0], [1], [0, 0, 1, 1], [], []>} : vector<16x128xf32>, vector<128x384xf32>, vector<16x384xf32> -> vector<16x384xf32>
    %70 = vector.broadcast %40 : vector<1x384xf32> to vector<16x384xf32>
    %71 = arith.addf %69, %70 : vector<16x384xf32>
    %72 = tpu.transpose %71, [1, 0] : vector<16x384xf32> -> vector<384x16xf32>
    %73 = vector.shape_cast %72 : vector<384x16xf32> to vector<48x8x16xf32>
    %74 = tpu.transpose %73, [0, 2, 1] : vector<48x8x16xf32> -> vector<48x16x8xf32>
    %75 = vector.extract_strided_slice %74 {offsets = [0, 0, 0], sizes = [16, 16, 8], strides = [1, 1, 1]} : vector<48x16x8xf32> to vector<16x16x8xf32>
    %76 = vector.extract_strided_slice %74 {offsets = [16, 0, 0], sizes = [16, 16, 8], strides = [1, 1, 1]} : vector<48x16x8xf32> to vector<16x16x8xf32>
    %77 = vector.extract_strided_slice %74 {offsets = [32, 0, 0], sizes = [16, 16, 8], strides = [1, 1, 1]} : vector<48x16x8xf32> to vector<16x16x8xf32>
    "tpu.trace_start"() <{level = 10 : i32, message = "htd,hsd->hts"}> : () -> ()
    %cst_34 = arith.constant dense<0.000000e+00> : vector<16x16x16xf32>
    %78 = tpu.matmul %75, %76, %cst_34 {dimension_numbers = #tpu.dot_dimension_numbers<[2], [2], [1], [1], [0, 0, 0, 1, 1, 1], [0], [0]>} : vector<16x16x8xf32>, vector<16x16x8xf32>, vector<16x16x16xf32> -> vector<16x16x16xf32>
    "tpu.trace_stop"() : () -> ()
    %cst_35 = arith.constant 0.353553385 : f32
    %79 = vector.broadcast %cst_35 : f32 to vector<16x16x16xf32>
    %80 = arith.mulf %78, %79 : vector<16x16x16xf32>
    %cst_36 = arith.constant dense<0xFF800000> : vector<16x16xf32>
    %81 = vector.multi_reduction <maximumf>, %80, %cst_36 [2] : vector<16x16x16xf32> to vector<16x16xf32>
    %82 = vector.shape_cast %81 : vector<16x16xf32> to vector<16x16x1xf32>
    %83 = vector.broadcast %82 : vector<16x16x1xf32> to vector<16x16x16xf32>
    %84 = arith.subf %80, %83 : vector<16x16x16xf32>
    %85 = math.exp %84 : vector<16x16x16xf32>
    %cst_37 = arith.constant dense<0.000000e+00> : vector<16x16xf32>
    %86 = vector.multi_reduction <add>, %85, %cst_37 [2] : vector<16x16x16xf32> to vector<16x16xf32>
    %87 = vector.shape_cast %86 : vector<16x16xf32> to vector<16x16x1xf32>
    %88 = tpu.reciprocal %87 {approx = true} : vector<16x16x1xf32> -> vector<16x16x1xf32>
    %89 = vector.broadcast %88 : vector<16x16x1xf32> to vector<16x16x16xf32>
    %90 = arith.mulf %85, %89 : vector<16x16x16xf32>
    "tpu.trace_start"() <{level = 10 : i32, message = "hts,hsd->htd"}> : () -> ()
    %cst_38 = arith.constant dense<0.000000e+00> : vector<16x16x8xf32>
    %91 = tpu.matmul %90, %77, %cst_38 {dimension_numbers = #tpu.dot_dimension_numbers<[2], [1], [1], [2], [0, 0, 0, 1, 1, 2], [0], [0]>} : vector<16x16x16xf32>, vector<16x16x8xf32>, vector<16x16x8xf32> -> vector<16x16x8xf32>
    "tpu.trace_stop"() : () -> ()
    "tpu.trace_start"() <{level = 10 : i32, message = "htd,hde->hte"}> : () -> ()
    %cst_39 = arith.constant dense<0.000000e+00> : vector<16x16x128xf32>
    %92 = tpu.matmul %91, %41, %cst_39 {dimension_numbers = #tpu.dot_dimension_numbers<[2], [1], [1], [2], [0, 0, 0, 1, 1, 2], [0], [0]>} : vector<16x16x8xf32>, vector<16x8x128xf32>, vector<16x16x128xf32> -> vector<16x16x128xf32>
    "tpu.trace_stop"() : () -> ()
    %cst_40 = arith.constant dense<0.000000e+00> : vector<16x128xf32>
    %93 = vector.multi_reduction <add>, %92, %cst_40 [0] : vector<16x16x128xf32> to vector<16x128xf32>
    %94 = tpu.concatenate %67, %93 in 0 : vector<16x128xf32>, vector<16x128xf32> -> vector<32x128xf32>
    %95 = vector.extract_strided_slice %2 {offsets = [2, 0], sizes = [1, 128], strides = [1, 1]} : vector<8x128xf32> to vector<1x128xf32>
    %96 = vector.broadcast %95 : vector<1x128xf32> to vector<32x128xf32>
    %97 = arith.addf %94, %96 : vector<32x128xf32>
    %98 = arith.addf %38, %97 : vector<32x128xf32>
    %99 = vector.extract_strided_slice %2 {offsets = [3, 0], sizes = [1, 128], strides = [1, 1]} : vector<8x128xf32> to vector<1x128xf32>
    %100 = vector.extract_strided_slice %2 {offsets = [4, 0], sizes = [1, 128], strides = [1, 1]} : vector<8x128xf32> to vector<1x128xf32>
    %cst_41 = arith.constant dense<0.000000e+00> : vector<32xf32>
    %101 = vector.multi_reduction <add>, %98, %cst_41 [1] : vector<32x128xf32> to vector<32xf32>
    %102 = vector.shape_cast %101 : vector<32xf32> to vector<32x1xf32>
    %cst_42 = arith.constant 1.280000e+02 : f32
    %103 = vector.broadcast %cst_42 : f32 to vector<32x1xf32>
    %104 = arith.divf %102, %103 : vector<32x1xf32>
    %105 = vector.broadcast %104 : vector<32x1xf32> to vector<32x128xf32>
    %106 = arith.subf %98, %105 : vector<32x128xf32>
    %107 = arith.mulf %106, %106 : vector<32x128xf32>
    %cst_43 = arith.constant dense<0.000000e+00> : vector<32xf32>
    %108 = vector.multi_reduction <add>, %107, %cst_43 [1] : vector<32x128xf32> to vector<32xf32>
    %109 = vector.shape_cast %108 : vector<32xf32> to vector<32x1xf32>
    %cst_44 = arith.constant 1.280000e+02 : f32
    %110 = vector.broadcast %cst_44 : f32 to vector<32x1xf32>
    %111 = arith.divf %109, %110 : vector<32x1xf32>
    %112 = vector.broadcast %104 : vector<32x1xf32> to vector<32x128xf32>
    %113 = arith.subf %98, %112 : vector<32x128xf32>
    %cst_45 = arith.constant 9.99999974E-6 : f32
    %114 = vector.broadcast %cst_45 : f32 to vector<32x1xf32>
    %115 = arith.addf %111, %114 : vector<32x1xf32>
    %116 = math.rsqrt %115 : vector<32x1xf32>
    %117 = vector.broadcast %116 : vector<32x1xf32> to vector<32x128xf32>
    %118 = arith.mulf %113, %117 : vector<32x128xf32>
    %119 = vector.broadcast %99 : vector<1x128xf32> to vector<32x128xf32>
    %120 = arith.mulf %118, %119 : vector<32x128xf32>
    %121 = vector.broadcast %100 : vector<1x128xf32> to vector<32x128xf32>
    %122 = arith.addf %120, %121 : vector<32x128xf32>
    %c0_46 = arith.constant 0 : index
    %c0_47 = arith.constant 0 : index
    %123 = vector.load %arg7[%c0_46, %c0_47] : memref<128x256xf32, #tpu.memory_space<vmem>>, vector<128x256xf32>
    %cst_48 = arith.constant dense<0.000000e+00> : vector<32x256xf32>
    %124 = tpu.matmul %122, %123, %cst_48 {dimension_numbers = #tpu.dot_dimension_numbers<[1], [0], [0], [1], [0, 0, 1, 1], [], []>} : vector<32x128xf32>, vector<128x256xf32>, vector<32x256xf32> -> vector<32x256xf32>
    %c0_49 = arith.constant 0 : index
    %c0_50 = arith.constant 0 : index
    %125 = vector.load %arg8[%c0_49, %c0_50] : memref<1x256xf32, #tpu.memory_space<vmem>>, vector<1x256xf32>
    %126 = vector.broadcast %125 : vector<1x256xf32> to vector<32x256xf32>
    %127 = arith.addf %124, %126 : vector<32x256xf32>
    %cst_51 = arith.constant 0.000000e+00 : f32
    %128 = vector.broadcast %cst_51 : f32 to vector<32x256xf32>
    %129 = arith.maximumf %127, %128 : vector<32x256xf32>
    %c0_52 = arith.constant 0 : index
    %c0_53 = arith.constant 0 : index
    %130 = vector.load %arg9[%c0_52, %c0_53] : memref<256x128xf32, #tpu.memory_space<vmem>>, vector<256x128xf32>
    %cst_54 = arith.constant dense<0.000000e+00> : vector<32x128xf32>
    %131 = tpu.matmul %129, %130, %cst_54 {dimension_numbers = #tpu.dot_dimension_numbers<[1], [0], [0], [1], [0, 0, 1, 1], [], []>} : vector<32x256xf32>, vector<256x128xf32>, vector<32x128xf32> -> vector<32x128xf32>
    %132 = vector.extract_strided_slice %2 {offsets = [5, 0], sizes = [1, 128], strides = [1, 1]} : vector<8x128xf32> to vector<1x128xf32>
    %133 = vector.broadcast %132 : vector<1x128xf32> to vector<32x128xf32>
    %134 = arith.addf %131, %133 : vector<32x128xf32>
    %135 = arith.addf %122, %134 : vector<32x128xf32>
    %136 = vector.extract_strided_slice %2 {offsets = [6, 0], sizes = [1, 128], strides = [1, 1]} : vector<8x128xf32> to vector<1x128xf32>
    %137 = vector.extract_strided_slice %2 {offsets = [7, 0], sizes = [1, 128], strides = [1, 1]} : vector<8x128xf32> to vector<1x128xf32>
    %cst_55 = arith.constant dense<0.000000e+00> : vector<32xf32>
    %138 = vector.multi_reduction <add>, %135, %cst_55 [1] : vector<32x128xf32> to vector<32xf32>
    %139 = vector.shape_cast %138 : vector<32xf32> to vector<32x1xf32>
    %cst_56 = arith.constant 1.280000e+02 : f32
    %140 = vector.broadcast %cst_56 : f32 to vector<32x1xf32>
    %141 = arith.divf %139, %140 : vector<32x1xf32>
    %142 = vector.broadcast %141 : vector<32x1xf32> to vector<32x128xf32>
    %143 = arith.subf %135, %142 : vector<32x128xf32>
    %144 = arith.mulf %143, %143 : vector<32x128xf32>
    %cst_57 = arith.constant dense<0.000000e+00> : vector<32xf32>
    %145 = vector.multi_reduction <add>, %144, %cst_57 [1] : vector<32x128xf32> to vector<32xf32>
    %146 = vector.shape_cast %145 : vector<32xf32> to vector<32x1xf32>
    %cst_58 = arith.constant 1.280000e+02 : f32
    %147 = vector.broadcast %cst_58 : f32 to vector<32x1xf32>
    %148 = arith.divf %146, %147 : vector<32x1xf32>
    %149 = vector.broadcast %141 : vector<32x1xf32> to vector<32x128xf32>
    %150 = arith.subf %135, %149 : vector<32x128xf32>
    %cst_59 = arith.constant 9.99999974E-6 : f32
    %151 = vector.broadcast %cst_59 : f32 to vector<32x1xf32>
    %152 = arith.addf %148, %151 : vector<32x1xf32>
    %153 = math.rsqrt %152 : vector<32x1xf32>
    %154 = vector.broadcast %153 : vector<32x1xf32> to vector<32x128xf32>
    %155 = arith.mulf %150, %154 : vector<32x128xf32>
    %156 = vector.broadcast %136 : vector<1x128xf32> to vector<32x128xf32>
    %157 = arith.mulf %155, %156 : vector<32x128xf32>
    %158 = vector.broadcast %137 : vector<1x128xf32> to vector<32x128xf32>
    %159 = arith.addf %157, %158 : vector<32x128xf32>
    %160 = vector.shape_cast %159 : vector<32x128xf32> to vector<2x16x128xf32>
    %c0_60 = arith.constant 0 : index
    %c0_61 = arith.constant 0 : index
    %c0_62 = arith.constant 0 : index
    %161 = vector.load %arg10[%c0_60, %c0_61, %c0_62] : memref<2x16x128xf32, #tpu.memory_space<vmem>>, vector<2x16x128xf32>
    tpu.vector_store %arg10[%c0_60, %c0_61, %c0_62], %160 {strides = array<i32>} : memref<2x16x128xf32, #tpu.memory_space<vmem>>, vector<2x16x128xf32>,
    return
  }
  func.func @transform_0(%arg0: i32) -> (i32, i32, i32) {
    %c0_i32 = arith.constant 0 : i32
    %c0_i32_0 = arith.constant 0 : i32
    %c0_i32_1 = arith.constant 0 : i32
    return %arg0, %c0_i32, %c0_i32_0 : i32, i32, i32
  }
  func.func @transform_1(%arg0: i32) -> (i32, i32, i32) {
    %c0_i32 = arith.constant 0 : i32
    %c0_i32_0 = arith.constant 0 : i32
    %c0_i32_1 = arith.constant 0 : i32
    %c0_i32_2 = arith.constant 0 : i32
    return %c0_i32, %c0_i32_0, %c0_i32_1 : i32, i32, i32
  }
  func.func @transform_2(%arg0: i32) -> (i32, i32) {
    %c0_i32 = arith.constant 0 : i32
    %c0_i32_0 = arith.constant 0 : i32
    %c0_i32_1 = arith.constant 0 : i32
    return %c0_i32, %c0_i32_0 : i32, i32
  }
  func.func @transform_3(%arg0: i32) -> (i32, i32) {
    %c0_i32 = arith.constant 0 : i32
    %c0_i32_0 = arith.constant 0 : i32
    %c0_i32_1 = arith.constant 0 : i32
    return %c0_i32, %c0_i32_0 : i32, i32
  }
  func.func @transform_4(%arg0: i32) -> (i32, i32, i32) {
    %c0_i32 = arith.constant 0 : i32
    %c0_i32_0 = arith.constant 0 : i32
    %c0_i32_1 = arith.constant 0 : i32
    %c0_i32_2 = arith.constant 0 : i32
    return %c0_i32, %c0_i32_0, %c0_i32_1 : i32, i32, i32
  }
  func.func @transform_5(%arg0: i32) -> (i32, i32) {
    %c0_i32 = arith.constant 0 : i32
    %c0_i32_0 = arith.constant 0 : i32
    %c0_i32_1 = arith.constant 0 : i32
    return %c0_i32, %c0_i32_0 : i32, i32
  }
  func.func @transform_6(%arg0: i32) -> (i32, i32) {
    %c0_i32 = arith.constant 0 : i32
    %c0_i32_0 = arith.constant 0 : i32
    %c0_i32_1 = arith.constant 0 : i32
    return %c0_i32, %c0_i32_0 : i32, i32
  }
  func.func @transform_7(%arg0: i32) -> (i32, i32) {
    %c0_i32 = arith.constant 0 : i32
    %c0_i32_0 = arith.constant 0 : i32
    %c0_i32_1 = arith.constant 0 : i32
    return %c0_i32, %c0_i32_0 : i32, i32
  }
  func.func @transform_8(%arg0: i32) -> (i32, i32) {
    %c0_i32 = arith.constant 0 : i32
    %c0_i32_0 = arith.constant 0 : i32
    %c0_i32_1 = arith.constant 0 : i32
    return %c0_i32, %c0_i32_0 : i32, i32
  }
  func.func @transform_9(%arg0: i32) -> (i32, i32, i32) {
    %c0_i32 = arith.constant 0 : i32
    %c0_i32_0 = arith.constant 0 : i32
    %c0_i32_1 = arith.constant 0 : i32
    return %arg0, %c0_i32, %c0_i32_0 : i32, i32, i32
  }
}

</mosaic_0001>

<bundles_post_ra>
// kernel: tpu_custom_call.1
= control target key start
LH: loop header
LB: loop body
LE: loop exit
PB: predicated region body
PF: predicated region fallthrough
CT: control target
= control target key end

     0   :  { %14 = vsyncpa [#allocation3], 0  ;;  %s18538_s0 = inlined_call_operand.hbm [shape: f32[2,16,128], index: 0, kind: input, shape index: {}]   ;;  %s18539_s1 = inlined_call_operand.hbm [shape: f32[2,384,128], index: 1, kind: input, shape index: {}]   ;;  %s18540_s2 = inlined_call_operand.hbm [shape: f32[128,384], index: 2, kind: input, shape index: {}]   ;;  %s18541_s3 = inlined_call_operand.vmem [shape: f32[1,384], index: 3, kind: input, shape index: {}]   ;;  %s18542_s4 = inlined_call_operand.hbm [shape: f32[16,8,128], index: 4, kind: input, shape index: {}]   ;;  %s18543_s5 = inlined_call_operand.vmem [shape: f32[8,128], index: 5, kind: input, shape index: {}]   ;;  %s18544_s6 = inlined_call_operand.hbm [shape: f32[128,256], index: 6, kind: input, shape index: {}]   ;;  %s18545_s7 = inlined_call_operand.vmem [shape: f32[1,256], index: 7, kind: input, shape index: {}]   ;;  %s18546_s8 = inlined_call_operand.hbm [shape: f32[256,128], index: 8, kind: input, shape index: {}]   ;;  %s18547_s9 = inlined_call_operand.hbm [shape: f32[2,16,128], index: 9, kind: output, shape index: {}]  }
   0x1   :  { %15 = vsyncpa [#allocation6], 0 }
   0x2   :  { %16 = vsyncpa [#allocation9], 0 }
   0x3   :  { %17 = vsyncpa [#allocation12], 0 }
   0x4   :  { %18 = vsyncpa [#allocation4], 0  ;;  %s16762_s30 = smov [#allocation5]   ;;  %s16763_s11 = smov [#allocation8]  }
   0x5   :  { %s36_s10 = sshll.u32 %s16762_s30, 4  ;;  %s62_s12 = sshll.u32 %s16763_s11, 4  ;;  %s37_s10 = int_to_ptr.vmem [resolvable:$true] %s36_s10  ;;  %s16826_s12 = int_to_ptr.vmem [resolvable:$true] %s62_s12 }
   0x6   :  { %s16598_s15 = scalar_lea.hbm %s18539_s1, 12288 }
   0x7   :  { %p16599_p0 = scmp.ne.s32.totalorder %s18539_s1, %s16598_s15  ;;  %p16602_p1 = scmp.lt.u32.totalorder %s16598_s15, %s18539_s1 }
   0x9   :  { %p16604_p2 = pnand %p16602_p1, %p16599_p0 }
   0xb   :  { %16607 = shalt.err (!%p16604_p2)
}
   0xc   :  { %s16608_s20 = scalar_lea.vmem %s37_s10, 12288  ;;  %p16613_p4 = scmp.lt.s32.totalorder %s37_s10, %s37_s10 }
   0xd   :  { %p16609_p3 = scmp.ne.s32.totalorder %s37_s10, %s16608_s20  ;;  %p16614_p5 = scmp.lt.s32.totalorder %s16608_s20, %s16608_s20 }
   0xf   :  { %p16615_p6 = por %p16614_p5, %p16613_p4 }
  0x11   :  { %p16616_p7 = pnand %p16615_p6, %p16609_p3 }
  0x13   :  { %16619 = shalt.err (!%p16616_p7)
}
  0x14   :  { %s16764_s21 = smov 128   ;;  %s16765_s22 = smov 8  }
  0x15   :  { %42 = dma.hbm_to_vmem [thread:$0]  %s18539_s1, 12288, %s37_s10, [#allocation6], %s16764_s21, %s16764_s21, %s16765_s22  }
  0x16   :  { %s16620_s27 = scalar_lea.hbm %s18542_s4, 2048 }
  0x17   :  { %p16621_p8 = scmp.ne.s32.totalorder %s18542_s4, %s16620_s27  ;;  %p16624_p9 = scmp.lt.u32.totalorder %s16620_s27, %s18542_s4 }
  0x19   :  { %p16626_p10 = pnand %p16624_p9, %p16621_p8 }
  0x1b   :  { %16629 = shalt.err (!%p16626_p10)
}
  0x1c   :  { %s16630_s13 = scalar_lea.vmem %s16826_s12, 2048  ;;  %p16635_p12 = scmp.lt.s32.totalorder %s16826_s12, %s16826_s12 }
  0x1d   :  { %p16631_p11 = scmp.ne.s32.totalorder %s16826_s12, %s16630_s13  ;;  %p16636_p13 = scmp.lt.s32.totalorder %s16630_s13, %s16630_s13 }
  0x1f   :  { %p16637_p0 = por %p16636_p13, %p16635_p12 }
  0x21   :  { %p16638_p1 = pnand %p16637_p0, %p16631_p11 }
  0x23   :  { %16641 = shalt.err (!%p16638_p1)
}
  0x24   :  { %68 = dma.hbm_to_vmem [thread:$0]  %s18542_s4, 2048, %s16826_s12, [#allocation9], %s16764_s21, %s16764_s21, %s16765_s22  }
  0x25   :  { %s16766_s14 = smov [#allocation2]   ;;  %s16767_s16 = smov [#allocation7]  }
  0x26   :  { %s24_s15 = sshll.u32 %s16766_s14, 4  ;;  %s48_s17 = sshll.u32 %s16767_s16, 4  ;;  %s25_s15 = int_to_ptr.vmem [resolvable:$true] %s24_s15  ;;  %s16863_s17 = int_to_ptr.vmem [resolvable:$true] %s48_s17 }
  0x27   :  { %s16642_s20 = scalar_lea.hbm %s18538_s0, 512 }
  0x28   :  { %p16643_p2 = scmp.ne.s32.totalorder %s18538_s0, %s16642_s20  ;;  %p16646_p3 = scmp.lt.u32.totalorder %s16642_s20, %s18538_s0 }
  0x2a   :  { %p16648_p4 = pnand %p16646_p3, %p16643_p2 }
  0x2c   :  { %16651 = shalt.err (!%p16648_p4)
}
  0x2d   :  { %s16652_s4 = scalar_lea.vmem %s25_s15, 512  ;;  %p16657_p6 = scmp.lt.s32.totalorder %s25_s15, %s25_s15 }
  0x2e   :  { %p16653_p5 = scmp.ne.s32.totalorder %s25_s15, %s16652_s4  ;;  %p16658_p7 = scmp.lt.s32.totalorder %s16652_s4, %s16652_s4 }
  0x30   :  { %p16659_p8 = por %p16658_p7, %p16657_p6 }
  0x32   :  { %p16660_p9 = pnand %p16659_p8, %p16653_p5 }
  0x34   :  { %16663 = shalt.err (!%p16660_p9)
}
  0x35   :  { %30 = dma.hbm_to_vmem [thread:$0]  %s18538_s0, 512, %s25_s15, [#allocation3], %s16764_s21, %s16764_s21, %s16765_s22  }
  0x36   :  { %s16664_s30 = scalar_lea.hbm %s18540_s2, 6144 }
  0x37   :  { %p16665_p10 = scmp.ne.s32.totalorder %s18540_s2, %s16664_s30  ;;  %p16668_p11 = scmp.lt.u32.totalorder %s16664_s30, %s18540_s2 }
  0x39   :  { %p16670_p12 = pnand %p16668_p11, %p16665_p10 }
  0x3b   :  { %16673 = shalt.err (!%p16670_p12)
}
  0x3c   :  { %s16674_s14 = scalar_lea.vmem %s16863_s17, 6144  ;;  %p16679_p0 = scmp.lt.s32.totalorder %s16863_s17, %s16863_s17 }
  0x3d   :  { %p16675_p13 = scmp.ne.s32.totalorder %s16863_s17, %s16674_s14  ;;  %p16680_p1 = scmp.lt.s32.totalorder %s16674_s14, %s16674_s14 }
  0x3f   :  { %p16681_p2 = por %p16680_p1, %p16679_p0 }
  0x41   :  { %p16682_p3 = pnand %p16681_p2, %p16675_p13 }
  0x43   :  { %16685 = shalt.err (!%p16682_p3)
}
  0x44   :  { %s16768_s0 = smov 384   ;;  %s16769_s15 = smov 24  }
  0x45   :  { %54 = dma.hbm_to_vmem [thread:$0]  %s18540_s2, 6144, %s16863_s17, [#allocation6], %s16768_s0, %s16768_s0, %s16769_s15  }
  0x46   :  { %s16770_s19 = smov [#allocation10]   ;;  %s16686_s25 = scalar_lea.hbm %s18544_s6, 4096 }
  0x47   :  { %s76_s20 = sshll.u32 %s16770_s19, 4  ;;  %p16687_p4 = scmp.ne.s32.totalorder %s18544_s6, %s16686_s25  ;;  %s77_s20 = int_to_ptr.vmem [resolvable:$true] %s76_s20 }
  0x48   :  { %p16690_p5 = scmp.lt.u32.totalorder %s16686_s25, %s18544_s6 }
  0x4a   :  { %p16692_p6 = pnand %p16690_p5, %p16687_p4 }
  0x4c   :  { %16695 = shalt.err (!%p16692_p6)
}
  0x4d   :  { %s16696_s28 = scalar_lea.vmem %s77_s20, 4096  ;;  %p16701_p8 = scmp.lt.s32.totalorder %s77_s20, %s77_s20 }
  0x4e   :  { %p16697_p7 = scmp.ne.s32.totalorder %s77_s20, %s16696_s28  ;;  %p16702_p9 = scmp.lt.s32.totalorder %s16696_s28, %s16696_s28 }
  0x50   :  { %p16703_p10 = por %p16702_p9, %p16701_p8 }
  0x52   :  { %p16704_p11 = pnand %p16703_p10, %p16697_p7 }
  0x54   :  { %16707 = shalt.err (!%p16704_p11)
}
  0x55   :  { %s16771_s2 = smov 256   ;;  %s16772_s17 = smov 16  }
  0x56   :  { %82 = dma.hbm_to_vmem [thread:$0]  %s18544_s6, 4096, %s77_s20, [#allocation9], %s16771_s2, %s16771_s2, %s16772_s17  }
  0x57   :  { %s16773_s11 = smov [#allocation11]   ;;  %s16708_s14 = scalar_lea.hbm %s18546_s8, 4096 }
  0x58   :  { %s90_s13 = sshll.u32 %s16773_s11, 4  ;;  %p16709_p12 = scmp.ne.s32.totalorder %s18546_s8, %s16708_s14  ;;  %s91_s13 = int_to_ptr.vmem [resolvable:$true] %s90_s13 }
  0x59   :  { %p16712_p13 = scmp.lt.u32.totalorder %s16708_s14, %s18546_s8 }
  0x5b   :  { %p16714_p0 = pnand %p16712_p13, %p16709_p12 }
  0x5d   :  { %16717 = shalt.err (!%p16714_p0)
}
  0x5e   :  { %s16718_s19 = scalar_lea.vmem %s91_s13, 4096  ;;  %p16723_p2 = scmp.lt.s32.totalorder %s91_s13, %s91_s13 }
  0x5f   :  { %p16719_p1 = scmp.ne.s32.totalorder %s91_s13, %s16718_s19  ;;  %p16724_p3 = scmp.lt.s32.totalorder %s16718_s19, %s16718_s19 }
  0x61   :  { %p16725_p4 = por %p16724_p3, %p16723_p2 }
  0x63   :  { %p16726_p5 = pnand %p16725_p4, %p16719_p1 }
  0x65   :  { %16729 = shalt.err (!%p16726_p5)
}
  0x66   :  { %96 = dma.hbm_to_vmem [thread:$0]  %s18546_s8, 4096, %s91_s13, [#allocation12], %s16764_s21, %s16764_s21, %s16765_s22  }
  0x67   :  { %16752 = dma.done.wait [#allocation3], 512  }
  0x68   :  { %16753 = vsyncadd [#allocation3], 4294966784 }
  0x69   :  { %16754 = dma.done.wait [#allocation6], 18432  }
  0x6a   :  { %16755 = vsyncadd [#allocation6], 4294948864 }
  0x6b   :  { %16756 = dma.done.wait [#allocation9], 6144  }
  0x6c   :  { %16757 = vsyncadd [#allocation9], 4294961152 }
  0x6d   :  { %16758 = dma.done.wait [#allocation12], 4096  }
  0x6e   :  { %16759 = vsyncadd [#allocation12], 4294963200  ;;  %v169_v0 = vld [vmem:[#allocation5 + $0x80] sm:$0xff]  ;;  %v170_v1 = vld [vmem:[#allocation5 + $0x88] sm:$0xff]  ;;  %v120_v36 = vlaneseq  ;;  %vm2495_vm4 = vcmask 64512   ;;  %vm3920_vm6 = vcmask 130048  }
  0x6f   :  { %v153_v2 = vld [vmem:[#allocation5] sm:$0xff]  ;;  %v15078_v3 = vpack.c.bf16 %v170_v1, %v169_v0  ;;  %v154_v4 = vld [vmem:[#allocation5 + $0x8] sm:$0xff]  ;;  %v171_v5 = vld [vmem:[#allocation5 + $0x90] sm:$0xff] }
  0x70   :  { %v172_v6 = vld [vmem:[#allocation5 + $0x98] sm:$0xff]  ;;  %v15080_v7 = vpack.c.bf16 %v154_v4, %v153_v2  ;;  %v185_v9 = vld [vmem:[#allocation5 + $0x100] sm:$0xff]  ;;  %v186_v10 = vld [vmem:[#allocation5 + $0x108] sm:$0xff]  ;;  %v16924_v46 = vshrl.u32 %v120_v36, 7 }
  0x71   :  { %v15082_v8 = vpack.c.bf16 %v172_v6, %v171_v5  ;;  %v155_v11 = vld [vmem:[#allocation5 + $0x10] sm:$0xff]  ;;  %15079 = vmatprep.subr.bf16.mxu0 %v15078_v3  ;;  %v15110_v12 = vpack.c.bf16 %v186_v10, %v185_v9  ;;  %v156_v13 = vld [vmem:[#allocation5 + $0x18] sm:$0xff]  ;;  %v173_v14 = vld [vmem:[#allocation5 + $0xa0] sm:$0xff] }
  0x72   :  { %v174_v15 = vld [vmem:[#allocation5 + $0xa8] sm:$0xff]  ;;  %15081 = vmatpush3.bf16.msra.mxu0 %v15080_v7  ;;  %v15084_v16 = vpack.c.bf16 %v156_v13, %v155_v11  ;;  %v187_v17 = vld [vmem:[#allocation5 + $0x110] sm:$0xff]  ;;  %v188_v18 = vld [vmem:[#allocation5 + $0x118] sm:$0xff]  ;;  %18598 = vst [vmem:[#allocation19_spill] sm:$0xff] %v16924_v46  ;;  %vm144_vm0 = vcmp.lt.s32.totalorder %v16924_v46, 7  ;;  %vm131_vm1 = vcmp.lt.s32.totalorder %v16924_v46, 1 }
  0x73   :  { %15083 = vmatprep.subr.bf16.mxu0 %v15082_v8  ;;  %15111 = vmatprep.subr.bf16.mxu1 %v15110_v12  ;;  %v15086_v19 = vpack.c.bf16 %v174_v15, %v173_v14  ;;  %v15114_v20 = vpack.c.bf16 %v188_v18, %v187_v17  ;;  %v157_v21 = vld [vmem:[#allocation5 + $0x20] sm:$0xff]  ;;  %v158_v22 = vld [vmem:[#allocation5 + $0x28] sm:$0xff]  ;;  %v175_v23 = vld [vmem:[#allocation5 + $0xb0] sm:$0xff]  ;;  %vm123_vm2 = vcmp.ne.s32.totalorder %v16924_v46, 0 }
  0x74   :  { %15113 = vmatpush3.bf16.msra.mxu1 %v15110_v12  ;;  %v176_v24 = vld [vmem:[#allocation5 + $0xb8] sm:$0xff]  ;;  %v189_v25 = vld [vmem:[#allocation5 + $0x120] sm:$0xff]  ;;  %v190_v26 = vld [vmem:[#allocation5 + $0x128] sm:$0xff]  ;;  %v15088_v28 = vpack.c.bf16 %v158_v22, %v157_v21 }
  0x75   :  { %15115 = vmatprep.subr.bf16.mxu1 %v15114_v20  ;;  %v15118_v27 = vpack.c.bf16 %v190_v26, %v189_v25  ;;  %v191_v29 = vld [vmem:[#allocation5 + $0x130] sm:$0xff]  ;;  %v192_v30 = vld [vmem:[#allocation5 + $0x138] sm:$0xff]  ;;  %v15090_v31 = vpack.c.bf16 %v176_v24, %v175_v23  ;;  %v177_v34 = vld [vmem:[#allocation5 + $0xc0] sm:$0xff]  ;;  %v16948_v26 = vadd.s32 8, %v16924_v46 }
  0x76   :  { %15085 = vmatpush3.bf16.msra.mxu0 %v15084_v16  ;;  %v159_v32 = vld [vmem:[#allocation5 + $0x30] sm:$0xff]  ;;  %v160_v33 = vld [vmem:[#allocation5 + $0x38] sm:$0xff]  ;;  %v178_v35 = vld [vmem:[#allocation5 + $0xc8] sm:$0xff]  ;;  %v15122_v37 = vpack.c.bf16 %v192_v30, %v191_v29 }
  0x77   :  { %15087 = vmatprep.subr.bf16.mxu0 %v15086_v19  ;;  %v15092_v38 = vpack.c.bf16 %v160_v33, %v159_v32  ;;  %v193_v39 = vld [vmem:[#allocation5 + $0x140] sm:$0xff]  ;;  %v194_v40 = vld [vmem:[#allocation5 + $0x148] sm:$0xff]  ;;  %v15094_v41 = vpack.c.bf16 %v178_v35, %v177_v34  ;;  %v179_v44 = vld [vmem:[#allocation5 + $0xd0] sm:$0xff]  ;;  %vm126_vm3 = vcmp.ne.s32.totalorder %v16948_v26, 15 }
  0x78   :  { %15117 = vmatpush3.bf16.msra.mxu1 %v15114_v20  ;;  %v161_v42 = vld [vmem:[#allocation5 + $0x40] sm:$0xff]  ;;  %v162_v43 = vld [vmem:[#allocation5 + $0x48] sm:$0xff]  ;;  %v180_v45 = vld [vmem:[#allocation5 + $0xd8] sm:$0xff]  ;;  %v15126_v47 = vpack.c.bf16 %v194_v40, %v193_v39 }
  0x79   :  { %15119 = vmatprep.subr.bf16.mxu1 %v15118_v27  ;;  %v16926_v48 = vld [vmem:[#allocation2] sm:$0xff]  ;;  %v15096_v49 = vpack.c.bf16 %v162_v43, %v161_v42  ;;  %v195_v50 = vld [vmem:[#allocation5 + $0x150] sm:$0xff]  ;;  %v196_v51 = vld [vmem:[#allocation5 + $0x158] sm:$0xff]  ;;  %v15098_v54 = vpack.c.bf16 %v180_v45, %v179_v44 }
  0x7a   :  { %15089 = vmatpush3.bf16.msra.mxu0 %v15088_v28  ;;  %v140_v52 = vrot.slane %v16926_v48, 1  ;;  %269 = vmatprep.mubr.f32.mxu0 %v16926_v48  ;;  %v16930_v53 = vld [vmem:[#allocation2 + $0x8] sm:$0xff]  ;;  %v163_v55 = vld [vmem:[#allocation5 + $0x50] sm:$0xff]  ;;  %v164_v56 = vld [vmem:[#allocation5 + $0x58] sm:$0xff]  ;;  %v15130_v60 = vpack.c.bf16 %v196_v51, %v195_v50  ;;  %v127_v19 = vrot.slane %v16926_v48, 7 }
  0x7b   :  { %15091 = vmatprep.subr.bf16.mxu0 %v15090_v31  ;;  %v141_v57 = vrot.slane %v16930_v53, 1  ;;  %v181_v58 = vld [vmem:[#allocation5 + $0xe0] sm:$0xff]  ;;  %v182_v59 = vld [vmem:[#allocation5 + $0xe8] sm:$0xff]  ;;  %v15100_v62 = vpack.c.bf16 %v164_v56, %v163_v55  ;;  %v183_v4 = vld [vmem:[#allocation5 + $0xf0] sm:$0xff]  ;;  %v128_v33 = vrot.slane %v16930_v53, 7 }
  0x7c   :  { %15121 = vmatpush3.bf16.msra.mxu1 %v15118_v27  ;;  %v197_v63 = vld [vmem:[#allocation5 + $0x160] sm:$0xff]  ;;  %v198_v0 = vld [vmem:[#allocation5 + $0x168] sm:$0xff]  ;;  %v15102_v1 = vpack.c.bf16 %v182_v59, %v181_v58  ;;  %v184_v5 = vld [vmem:[#allocation5 + $0xf8] sm:$0xff] }
  0x7d   :  { %15123 = vmatprep.subr.bf16.mxu1 %v15122_v37  ;;  %v147_v61 = vsel %vm144_vm0, %v140_v52, %v141_v57  ;;  %v165_v2 = vld [vmem:[#allocation5 + $0x60] sm:$0xff]  ;;  %v166_v3 = vld [vmem:[#allocation5 + $0x68] sm:$0xff]  ;;  %v15134_v6 = vpack.c.bf16 %v198_v0, %v197_v63  ;;  %v199_v8 = vld [vmem:[#allocation5 + $0x170] sm:$0xff]  ;;  %v15106_v10 = vpack.c.bf16 %v184_v5, %v183_v4  ;;  %v134_v43 = vsel %vm131_vm1, %v127_v19, %v128_v33 }
  0x7e   :  { %15093 = vmatpush3.bf16.msra.mxu0 %v15092_v38  ;;  %14356 = vmatprep.mubr.f32.mxu1 %v147_v61  ;;  %v15104_v7 = vpack.c.bf16 %v166_v3, %v165_v2  ;;  %v200_v9 = vld [vmem:[#allocation5 + $0x178] sm:$0xff]  ;;  %v167_v11 = vld [vmem:[#allocation5 + $0x70] sm:$0xff]  ;;  %v420_v14 = vld [vmem:[#allocation5 + $0x200] sm:$0xff] }
  0x7f   :  { %15095 = vmatprep.subr.bf16.mxu0 %v15094_v41  ;;  %v168_v12 = vld [vmem:[#allocation5 + $0x78] sm:$0xff]  ;;  %v421_v15 = vld [vmem:[#allocation5 + $0x208] sm:$0xff]  ;;  %v15138_v16 = vpack.c.bf16 %v200_v9, %v199_v8  ;;  %v16942_v17 = vld [vmem:[#allocation2 + $0x10] sm:$0xff] }
  0x80   :  { %15125 = vmatpush3.bf16.msra.mxu1 %v15122_v37  ;;  %v16940_v13 = vld [vmem:[#allocation2 + $0x18] sm:$0xff]  ;;  %v15108_v18 = vpack.c.bf16 %v168_v12, %v167_v11  ;;  %v436_v21 = vld [vmem:[#allocation5 + $0x280] sm:$0xff]  ;;  %v437_v22 = vld [vmem:[#allocation5 + $0x288] sm:$0xff]  ;;  %v15142_v23 = vpack.c.bf16 %v421_v15, %v420_v14  ;;  %v142_v27 = vrot.slane %v16942_v17, 1  ;;  %v129_v44 = vrot.slane %v16942_v17, 7 }
  0x81   :  { %15127 = vmatprep.subr.bf16.mxu1 %v15126_v47  ;;  %v130_v20 = vrot.slane %v16940_v13, 7  ;;  %v404_v24 = vld [vmem:[#allocation5 + $0x180] sm:$0xff]  ;;  %v405_v25 = vld [vmem:[#allocation5 + $0x188] sm:$0xff]  ;;  %v422_v28 = vld [vmem:[#allocation5 + $0x210] sm:$0xff]  ;;  %v143_v30 = vrot.slane %v16940_v13, 1  ;;  %v15174_v31 = vpack.c.bf16 %v437_v22, %v436_v21 }
  0x82   :  { %15097 = vmatpush3.bf16.msra.mxu0 %v15096_v49  ;;  %v423_v29 = vld [vmem:[#allocation5 + $0x218] sm:$0xff]  ;;  %v438_v34 = vld [vmem:[#allocation5 + $0x290] sm:$0xff]  ;;  %v15144_v36 = vpack.c.bf16 %v405_v25, %v404_v24  ;;  %v146_v40 = vsel %vm144_vm0, %v141_v57, %v142_v27  ;;  %v440_v45 = vld [vmem:[#allocation5 + $0x2a0] sm:$0xff] }
  0x83   :  { %15099 = vmatprep.subr.bf16.mxu0 %v15098_v54  ;;  %v135_v32 = vsel %vm131_vm1, %v130_v20, %v127_v19  ;;  %v439_v35 = vld [vmem:[#allocation5 + $0x298] sm:$0xff]  ;;  %v15146_v37 = vpack.c.bf16 %v423_v29, %v422_v28  ;;  %v406_v38 = vld [vmem:[#allocation5 + $0x190] sm:$0xff]  ;;  %v145_v41 = vsel %vm144_vm0, %v142_v27, %v143_v30  ;;  %v148_v50 = vsel %vm144_vm0, %v143_v30, %v140_v52  ;;  %v424_v52 = vld [vmem:[#allocation5 + $0x220] sm:$0xff] }
  0x84   :  { %15129 = vmatpush3.bf16.msra.mxu1 %v15126_v47  ;;  %v407_v39 = vld [vmem:[#allocation5 + $0x198] sm:$0xff]  ;;  %v15178_v42 = vpack.c.bf16 %v439_v35, %v438_v34  ;;  %v441_v47 = vld [vmem:[#allocation5 + $0x2a8] sm:$0xff]  ;;  %v132_v48 = vsel %vm131_vm1, %v129_v44, %v130_v20  ;;  %v442_v55 = vld [vmem:[#allocation5 + $0x2b0] sm:$0xff] }
  0x85   :  { %15131 = vmatprep.subr.bf16.mxu1 %v15130_v60  ;;  %v15148_v49 = vpack.c.bf16 %v407_v39, %v406_v38  ;;  %v15182_v51 = vpack.c.bf16 %v441_v47, %v440_v45  ;;  %v425_v54 = vld [vmem:[#allocation5 + $0x228] sm:$0xff]  ;;  %v443_v57 = vld [vmem:[#allocation5 + $0x2b8] sm:$0xff]  ;;  %v408_v58 = vld [vmem:[#allocation5 + $0x1a0] sm:$0xff] }
  0x86   :  { %15101 = vmatpush3.bf16.msra.mxu0 %v15100_v62  ;;  %v15150_v56 = vpack.c.bf16 %v425_v54, %v424_v52  ;;  %v409_v59 = vld [vmem:[#allocation5 + $0x1a8] sm:$0xff]  ;;  %v426_v62 = vld [vmem:[#allocation5 + $0x230] sm:$0xff]  ;;  %v427_v63 = vld [vmem:[#allocation5 + $0x238] sm:$0xff] }
  0x87   :  { %15103 = vmatprep.subr.bf16.mxu0 %v15102_v1  ;;  %v15152_v61 = vpack.c.bf16 %v409_v59, %v408_v58  ;;  %v444_v0 = vld [vmem:[#allocation5 + $0x2c0] sm:$0xff]  ;;  %v15154_v1 = vpack.c.bf16 %v427_v63, %v426_v62  ;;  %v445_v2 = vld [vmem:[#allocation5 + $0x2c8] sm:$0xff]  ;;  %v410_v3 = vld [vmem:[#allocation5 + $0x1b0] sm:$0xff] }
  0x88   :  { %15133 = vmatpush3.bf16.msra.mxu1 %v15130_v60  ;;  %v15186_v60 = vpack.c.bf16 %v443_v57, %v442_v55  ;;  %v411_v4 = vld [vmem:[#allocation5 + $0x1b8] sm:$0xff]  ;;  %v15190_v5 = vpack.c.bf16 %v445_v2, %v444_v0  ;;  %v429_v8 = vld [vmem:[#allocation5 + $0x248] sm:$0xff]  ;;  %v446_v9 = vld [vmem:[#allocation5 + $0x2d0] sm:$0xff] }
  0x89   :  { %15135 = vmatprep.subr.bf16.mxu1 %v15134_v6  ;;  %v447_v11 = vld [vmem:[#allocation5 + $0x2d8] sm:$0xff]  ;;  %v412_v12 = vld [vmem:[#allocation5 + $0x1c0] sm:$0xff]  ;;  %v449_v20 = vld [vmem:[#allocation5 + $0x2e8] sm:$0xff] }
  0x8a   :  { %15105 = vmatpush3.bf16.msra.mxu0 %v15104_v7  ;;  %v428_v7 = vld [vmem:[#allocation5 + $0x240] sm:$0xff]  ;;  %v15194_v14 = vpack.c.bf16 %v447_v11, %v446_v9  ;;  %v414_v21 = vld [vmem:[#allocation5 + $0x1d0] sm:$0xff]  ;;  %v415_v22 = vld [vmem:[#allocation5 + $0x1d8] sm:$0xff] }
  0x8b   :  { %15107 = vmatprep.subr.bf16.mxu0 %v15106_v10  ;;  %v15158_v10 = vpack.c.bf16 %v429_v8, %v428_v7  ;;  %v15164_v24 = vpack.c.bf16 %v415_v22, %v414_v21  ;;  %v432_v25 = vld [vmem:[#allocation5 + $0x260] sm:$0xff]  ;;  %v433_v27 = vld [vmem:[#allocation5 + $0x268] sm:$0xff]  ;;  %v450_v28 = vld [vmem:[#allocation5 + $0x2f0] sm:$0xff] }
  0x8c   :  { %15137 = vmatpush3.bf16.msra.mxu1 %v15134_v6  ;;  %v15156_v6 = vpack.c.bf16 %v411_v4, %v410_v3  ;;  %v15166_v29 = vpack.c.bf16 %v433_v27, %v432_v25  ;;  %v451_v30 = vld [vmem:[#allocation5 + $0x2f8] sm:$0xff]  ;;  %v434_v35 = vld [vmem:[#allocation5 + $0x270] sm:$0xff]  ;;  %v635_v45 = vld [vmem:[#allocation7 + $0x28] sm:$0xff] }
  0x8d   :  { %15139 = vmatprep.subr.bf16.mxu1 %v15138_v16  ;;  %v418_v38 = vld [vmem:[#allocation5 + $0x1f0] sm:$0xff]  ;;  %v419_v39 = vld [vmem:[#allocation5 + $0x1f8] sm:$0xff]  ;;  %vm17190_vm5 = vmpackc.low %vm2495_vm4, %vm2495_vm4 }
  0x8e   :  { %15109 = vmatpush3.bf16.msra.mxu0 %v15108_v18  ;;  %v448_v18 = vld [vmem:[#allocation5 + $0x2e0] sm:$0xff]  ;;  %v633_v25 = vld [vmem:[#allocation7 + $0x18] sm:$0xff]  ;;  %v652_v26 = vld [vmem:[#allocation7 + $0xb0] sm:$0xff] }
  0x8f   :  { %15143 = vmatprep.subr.bf16.mxu0 %v15142_v23  ;;  %v15198_v23 = vpack.c.bf16 %v449_v20, %v448_v18  ;;  %v641_v20 = vld [vmem:[#allocation7 + $0x58] sm:$0xff] }
  0x90   :  { %15141 = vmatpush3.bf16.msra.mxu1 %v15138_v16  ;;  %v430_v16 = vld [vmem:[#allocation5 + $0x250] sm:$0xff]  ;;  %v637_v27 = vld [vmem:[#allocation7 + $0x38] sm:$0xff] }
  0x91   :  { %13500 = vmatmul.mubr.msk.f32.vlgmr.msra.gmra.mrb[0].mxu0 %vm123_vm2, %v135_v32  ;;  %15175 = vmatprep.subr.bf16.mxu1 %v15174_v31  ;;  %v417_v32 = vld [vmem:[#allocation5 + $0x1e8] sm:$0xff] }
  0x92   :  { %274 = vmatprep.mubr.f32.mxu0 %v16930_v53  ;;  %15145 = vmatpush3.bf16.msra.mxu0 %v15144_v36  ;;  %v133_v53 = vsel %vm131_vm1, %v128_v33, %v129_v44  ;;  %v15202_v33 = vpack.c.bf16 %v451_v30, %v450_v28  ;;  %v435_v36 = vld [vmem:[#allocation5 + $0x278] sm:$0xff]  ;;  %v632_v44 = vld [vmem:[#allocation7 + $0x10] sm:$0xff] }
  0x93   :  { %14357 = vmatmul.mubr.msk.f32.vlgmr.msra.gmra.mrb[0].mxu1 %vm126_vm3, %v146_v40  ;;  %15147 = vmatprep.subr.bf16.mxu0 %v15146_v37  ;;  %v15170_v37 = vpack.c.bf16 %v435_v36, %v434_v35  ;;  %v15172_v40 = vpack.c.bf16 %v419_v39, %v418_v38  ;;  %v16988_v47 = vpack.c.bf16 %v635_v45, %v632_v44  ;;  %v636_v45 = vld [vmem:[#allocation7 + $0x30] sm:$0xff] }
  0x94   :  { %14359 = vmatprep.mubr.f32.mxu1 %v145_v41  ;;  %15177 = vmatpush3.bf16.msra.mxu1 %v15174_v31  ;;  %v416_v31 = vld [vmem:[#allocation5 + $0x1e0] sm:$0xff]  ;;  %v631_v41 = vld [vmem:[#allocation7 + $0x8] sm:$0xff] }
  0x95   :  { %275 = vmatmul.mubr.f32.gmra.mrb[2].mxu0 %v134_v43  ;;  %15179 = vmatprep.subr.bf16.mxu1 %v15178_v42  ;;  %v15168_v34 = vpack.c.bf16 %v417_v32, %v416_v31  ;;  %18599 = vst [vmem:[#allocation20_spill] sm:$0xff] %v16988_v47  ;;  %v640_v32 = vld [vmem:[#allocation7 + $0x50] sm:$0xff] }
  0x96   :  { %279 = vmatprep.mubr.f32.mxu0 %v16942_v17  ;;  %15149 = vmatpush3.bf16.msra.mxu0 %v15148_v49  ;;  %v431_v17 = vld [vmem:[#allocation5 + $0x258] sm:$0xff]  ;;  %v16992_v49 = vsub.s32 0, %v16924_v46  ;;  %v17016_v38 = vpack.c.bf16 %v640_v32, %v637_v27  ;;  %v671_v32 = vld [vmem:[#allocation7 + $0x148] sm:$0xff] }
  0x97   :  { %14360 = vmatmul.mubr.msk.f32.gmra.mrb[2].mxu1 %vm126_vm3, %v148_v50  ;;  %15151 = vmatprep.subr.bf16.mxu0 %v15150_v56  ;;  %v15162_v19 = vpack.c.bf16 %v431_v17, %v430_v16  ;;  %v16997_v50 = vld [vmem:[%s18543_s5] sm:$0xff]  ;;  %v673_v27 = vld [vmem:[#allocation7 + $0x158] sm:$0xff] }
  0x98   :  { %15181 = vmatpush3.bf16.msra.mxu1 %v15178_v42  ;;  %v634_v42 = vld [vmem:[#allocation7 + $0x20] sm:$0xff]  ;;  %18600 = vst [vmem:[#allocation21_spill] sm:$0xff] %v16992_v49  ;;  %18602 = vst [vmem:[#allocation23_spill] sm:$0xff] %v17016_v38 }
  0x99   :  { %13501 = vmatmul.mubr.msk.f32.gmra.mrb[4].mxu0 %vm123_vm2, %v133_v53  ;;  %15183 = vmatprep.subr.bf16.mxu1 %v15182_v51  ;;  %v16985_v43 = vpack.c.bf16 %v634_v42, %v631_v41  ;;  %v204_v53 = vrot.slane %v16997_v50, %v16992_v49 }
  0x9a   :  { %284 = vmatprep.mubr.f32.mxu0 %v16940_v13  ;;  %15153 = vmatpush3.bf16.msra.mxu0 %v15152_v61  ;;  %v413_v13 = vld [vmem:[#allocation5 + $0x1c8] sm:$0xff] }
  0x9b   :  { %15155 = vmatprep.subr.bf16.mxu0 %v15154_v1  ;;  %v15160_v15 = vpack.c.bf16 %v413_v13, %v412_v12 }
  0x9c   :  { %15185 = vmatpush3.bf16.msra.mxu1 %v15182_v51 }
  0x9d   :  { %285 = vmatmul.mubr.f32.gmra.mrb[6].mxu0 %v132_v48  ;;  %15187 = vmatprep.subr.bf16.mxu1 %v15186_v60 }
  0x9e   :  { %15157 = vmatpush3.bf16.msra.mxu0 %v15156_v6 }
  0x9f   :  { %15159 = vmatprep.subr.bf16.mxu0 %v15158_v10 }
  0xa0   :  { %15189 = vmatpush3.bf16.msra.mxu1 %v15186_v60 }
  0xa1   :  { %15191 = vmatprep.subr.bf16.mxu1 %v15190_v5 }
  0xa2   :  { %15161 = vmatpush3.bf16.msra.mxu0 %v15160_v15 }
  0xa3   :  { %15163 = vmatprep.subr.bf16.mxu0 %v15162_v19  ;;  %v638_v19 = vld [vmem:[#allocation7 + $0x40] sm:$0xff] }
  0xa4   :  { %15193 = vmatpush3.bf16.msra.mxu1 %v15190_v5  ;;  %v17005_v28 = vpack.c.bf16 %v641_v20, %v638_v19  ;;  %v662_v19 = vld [vmem:[#allocation7 + $0x100] sm:$0xff] }
  0xa5   :  { %15195 = vmatprep.subr.bf16.mxu1 %v15194_v14 }
  0xa6   :  { %15165 = vmatpush3.bf16.msra.mxu0 %v15164_v24  ;;  %v630_v24 = vld [vmem:[#allocation7] sm:$0xff]  ;;  %18601 = vst [vmem:[#allocation22_spill] sm:$0xff] %v17005_v28 }
  0xa7   :  { %15167 = vmatprep.subr.bf16.mxu0 %v15166_v29 }
  0xa8   :  { %15197 = vmatpush3.bf16.msra.mxu1 %v15194_v14 }
  0xa9   :  { %15199 = vmatprep.subr.bf16.mxu1 %v15198_v23 }
  0xaa   :  { %15169 = vmatpush3.bf16.msra.mxu0 %v15168_v34  ;;  %v647_v34 = vld [vmem:[#allocation7 + $0x88] sm:$0xff] }
  0xab   :  { %15171 = vmatprep.subr.bf16.mxu0 %v15170_v37  ;;  %v17014_v37 = vpack.c.bf16 %v633_v25, %v630_v24 }
  0xac   :  { %15201 = vmatpush3.bf16.msra.mxu1 %v15198_v23 }
  0xad   :  { %15203 = vmatprep.subr.bf16.mxu1 %v15202_v33 }
  0xae   :  { %15173 = vmatpush3.bf16.msra.mxu0 %v15172_v40 }
  0xaf   :  { %15207 = vmatprep.subr.bf16.mxu0 %v16985_v43 }
  0xb0   :  { %15205 = vmatpush3.bf16.msra.mxu1 %v15202_v33  ;;  %v644_v33 = vld [vmem:[#allocation7 + $0x70] sm:$0xff] }
  0xb1   :  { %15239 = vmatprep.subr.bf16.mxu1 %v16988_v47  ;;  %v17019_v39 = vpack.c.bf16 %v647_v34, %v644_v33  ;;  %v672_v33 = vld [vmem:[#allocation7 + $0x150] sm:$0xff]  ;;  %v675_v34 = vld [vmem:[#allocation7 + $0x168] sm:$0xff] }
  0xb3   :  { %18603 = vst [vmem:[#allocation24_spill] sm:$0xff] %v17019_v39 }
 0x164   :  { %v13796_v51 = vpop.f32.mrb[0].mxu0 }
 0x165   :  { %v13797_v48 = vpop.f32.mrb[1].mxu0 }
 0x166   :  { %v13798_v52 = vadd.f32 %v13797_v48, %v13796_v51  ;;  %v14358_v54 = vpop.f32.mrb[0].mxu1  ;;  %v639_v51 = vld [vmem:[#allocation7 + $0x48] sm:$0xff]  ;;  %v646_v48 = vld [vmem:[#allocation7 + $0x80] sm:$0xff] }
 0x167   :  { %v356_v55 = vpop.f32.mrb[1].mxu1 }
 0x168   :  { %v13799_v56 = vpop.f32.mrb[2].mxu0  ;;  %v272_v57 = vadd.f32 %v13798_v52, %v204_v53  ;;  %v650_v52 = vld [vmem:[#allocation7 + $0xa0] sm:$0xff] }
 0x169   :  { %v13800_v58 = vpop.f32.mrb[3].mxu0 }
 0x16a   :  { %v13801_v59 = vadd.f32 %v13800_v58, %v13799_v56  ;;  %v357_v60 = vadd.f32 %v356_v55, %v272_v57  ;;  %v14361_v61 = vpop.f32.mrb[2].mxu1  ;;  %v17034_v55 = vpack.c.bf16 %v639_v51, %v636_v45  ;;  %v642_v57 = vld [vmem:[#allocation7 + $0x60] sm:$0xff]  ;;  %v645_v58 = vld [vmem:[#allocation7 + $0x78] sm:$0xff]  ;;  %v17101_v51 = vsub.s32 1, %v16924_v46 }
 0x16b   :  { %v366_v62 = vpop.f32.mrb[3].mxu1 }
 0x16c   :  { %v277_v63 = vadd.f32 %v13801_v59, %v204_v53  ;;  %v375_v0 = vmax.f32 %v357_v60, 0.0  ;;  %v13802_v1 = vpop.f32.mrb[4].mxu0  ;;  %18604 = vst [vmem:[#allocation25_spill] sm:$0xff] %v17034_v55  ;;  %v649_v60 = vld [vmem:[#allocation7 + $0x98] sm:$0xff]  ;;  %18622 = vst [vmem:[#allocation43_spill] sm:$0xff] %v17101_v51 }
 0x16d   :  { %v13803_v2 = vpop.f32.mrb[5].mxu0 }
 0x16e   :  { %v362_v3 = vadd.f32 %v14358_v54, %v277_v63  ;;  %v13804_v4 = vadd.f32 %v13803_v2, %v13802_v1  ;;  %520 = vmatprep.mubr.f32.mxu0 %v375_v0  ;;  %v379_v8 = vrot.slane %v375_v0, 7  ;;  %v391_v9 = vrot.slane %v375_v0, 1  ;;  %v653_v54 = vld [vmem:[#allocation7 + $0xb8] sm:$0xff]  ;;  %v648_v63 = vld [vmem:[#allocation7 + $0x90] sm:$0xff]  ;;  %v651_v0 = vld [vmem:[#allocation7 + $0xa8] sm:$0xff] }
 0x16f   :  { %v17041_v59 = vpack.c.bf16 %v653_v54, %v650_v52  ;;  %v655_v1 = vld [vmem:[#allocation7 + $0xc8] sm:$0xff]  ;;  %v658_v2 = vld [vmem:[#allocation7 + $0xe0] sm:$0xff]  ;;  %v455_v52 = vrot.slane %v16997_v50, %v17101_v51 }
 0x170   :  { %v376_v5 = vmax.f32 %v362_v3, 0.0  ;;  %v13805_v6 = vpop.f32.mrb[6].mxu0  ;;  %v282_v7 = vadd.f32 %v13804_v4, %v204_v53  ;;  %v17054_v3 = vpack.c.bf16 %v651_v0, %v648_v63  ;;  %v17058_v4 = vpack.c.bf16 %v658_v2, %v655_v1 }
 0x171   :  { %v13806_v10 = vpop.f32.mrb[7].mxu0  ;;  %18606 = vst [vmem:[#allocation27_spill] sm:$0xff] %v17041_v59 }
 0x172   :  { %v13807_v11 = vadd.f32 %v13806_v10, %v13805_v6  ;;  %v367_v12 = vadd.f32 %v366_v62, %v282_v7  ;;  %v392_v13 = vrot.slane %v376_v5, 1  ;;  %v380_v14 = vrot.slane %v376_v5, 7  ;;  %18609 = vst [vmem:[#allocation30_spill] sm:$0xff] %v17054_v3  ;;  %18610 = vst [vmem:[#allocation31_spill] sm:$0xff] %v17058_v4  ;;  %v657_v6 = vld [vmem:[#allocation7 + $0xd8] sm:$0xff]  ;;  %v656_v10 = vld [vmem:[#allocation7 + $0xd0] sm:$0xff] }
 0x173   :  { %v17048_v62 = vpack.c.bf16 %v652_v26, %v649_v60 }
 0x174   :  { %v287_v15 = vadd.f32 %v13807_v11, %v204_v53  ;;  %v377_v16 = vmax.f32 %v367_v12, 0.0  ;;  %v397_v17 = vsel %vm144_vm0, %v391_v9, %v392_v13  ;;  %v385_v18 = vsel %vm131_vm1, %v379_v8, %v380_v14  ;;  %v643_v53 = vld [vmem:[#allocation7 + $0x68] sm:$0xff] }
 0x175   :  { %14394 = vmatprep.mubr.f32.mxu1 %v397_v17  ;;  %v17038_v56 = vpack.c.bf16 %v646_v48, %v643_v53  ;;  %18608 = vst [vmem:[#allocation29_spill] sm:$0xff] %v17048_v62  ;;  %v659_v12 = vld [vmem:[#allocation7 + $0xe8] sm:$0xff] }
 0x176   :  { %v372_v21 = vadd.f32 %v14361_v61, %v287_v15  ;;  %v381_v22 = vrot.slane %v377_v16, 7  ;;  %v393_v23 = vrot.slane %v377_v16, 1  ;;  %v17044_v61 = vpack.c.bf16 %v645_v58, %v642_v57  ;;  %v667_v17 = vld [vmem:[#allocation7 + $0x128] sm:$0xff] }
 0x177   :  { %18605 = vst [vmem:[#allocation26_spill] sm:$0xff] %v17038_v56  ;;  %v17067_v15 = vpack.c.bf16 %v659_v12, %v656_v10 }
 0x178   :  { %v378_v29 = vmax.f32 %v372_v21, 0.0  ;;  %v396_v30 = vsel %vm144_vm0, %v392_v13, %v393_v23  ;;  %v384_v31 = vsel %vm131_vm1, %v380_v14, %v381_v22  ;;  %18607 = vst [vmem:[#allocation28_spill] sm:$0xff] %v17044_v61  ;;  %v660_v13 = vld [vmem:[#allocation7 + $0xf0] sm:$0xff]  ;;  %v663_v14 = vld [vmem:[#allocation7 + $0x108] sm:$0xff]  ;;  %v665_v21 = vld [vmem:[#allocation7 + $0x118] sm:$0xff] }
 0x179   :  { %14395 = vmatmul.mubr.msk.f32.vlgmr.msra.gmra.mrb[4].mxu1 %vm126_vm3, %v396_v30  ;;  %18613 = vst [vmem:[#allocation34_spill] sm:$0xff] %v17067_v15  ;;  %v17077_v24 = vpack.c.bf16 %v665_v21, %v662_v19  ;;  %v668_v30 = vld [vmem:[#allocation7 + $0x130] sm:$0xff] }
 0x17a   :  { %v382_v35 = vrot.slane %v378_v29, 7  ;;  %v394_v36 = vrot.slane %v378_v29, 1  ;;  %15241 = vmatpush3.bf16.msra.mxu1 %v16988_v47 }
 0x17b   :  { %15243 = vmatprep.subr.bf16.mxu1 %v17005_v28  ;;  %18616 = vst [vmem:[#allocation37_spill] sm:$0xff] %v17077_v24 }
 0x17c   :  { %v386_v40 = vsel %vm131_vm1, %v382_v35, %v379_v8  ;;  %v395_v41 = vsel %vm144_vm0, %v393_v23, %v394_v36  ;;  %v398_v42 = vsel %vm144_vm0, %v394_v36, %v391_v9  ;;  %v383_v44 = vsel %vm131_vm1, %v381_v22, %v382_v35  ;;  %v661_v8 = vld [vmem:[#allocation7 + $0xf8] sm:$0xff]  ;;  %v664_v9 = vld [vmem:[#allocation7 + $0x110] sm:$0xff]  ;;  %v666_v22 = vld [vmem:[#allocation7 + $0x120] sm:$0xff] }
 0x17d   :  { %13504 = vmatmul.mubr.msk.f32.vlgmr.msra.gmra.mrb[8].mxu0 %vm123_vm2, %v386_v40  ;;  %14397 = vmatprep.mubr.f32.mxu1 %v395_v41  ;;  %v17065_v11 = vpack.c.bf16 %v664_v9, %v661_v8  ;;  %v669_v23 = vld [vmem:[#allocation7 + $0x138] sm:$0xff]  ;;  %v17087_v35 = vpack.c.bf16 %v671_v32, %v668_v30  ;;  %v17089_v36 = vpack.c.bf16 %v675_v34, %v672_v33  ;;  %v674_v40 = vld [vmem:[#allocation7 + $0x160] sm:$0xff] }
 0x17e   :  { %525 = vmatprep.mubr.f32.mxu0 %v376_v5  ;;  %14398 = vmatmul.mubr.msk.f32.gmra.mrb[6].mxu1 %vm126_vm3, %v398_v42  ;;  %v654_v5 = vld [vmem:[#allocation7 + $0xc0] sm:$0xff]  ;;  %v17079_v25 = vpack.c.bf16 %v669_v23, %v666_v22  ;;  %v677_v41 = vld [vmem:[#allocation7 + $0x178] sm:$0xff] }
 0x17f   :  { %15209 = vmatpush1.bf16.msra.mxu0 %v17014_v37  ;;  %15245 = vmatpush3.bf16.msra.mxu1 %v17005_v28  ;;  %v17061_v7 = vpack.c.bf16 %v657_v6, %v654_v5  ;;  %18612 = vst [vmem:[#allocation33_spill] sm:$0xff] %v17065_v11  ;;  %18619 = vst [vmem:[#allocation40_spill] sm:$0xff] %v17087_v35  ;;  %v17095_v42 = vpack.c.bf16 %v677_v41, %v674_v40  ;;  %v678_v23 = vld [vmem:[%s18541_s3] sm:$0x7] }
 0x180   :  { %15211 = vmatprep.subr.bf16.mxu0 %v17016_v38  ;;  %15247 = vmatprep.subr.bf16.mxu1 %v17019_v39  ;;  %18617 = vst [vmem:[#allocation38_spill] sm:$0xff] %v17079_v25  ;;  %18620 = vst [vmem:[#allocation41_spill] sm:$0xff] %v17089_v36  ;;  %v17131_v40 = vrot.slane %v678_v23, %v17101_v51 }
 0x181   :  { %526 = vmatmul.mubr.f32.gmra.mrb[10].mxu0 %v385_v18  ;;  %18611 = vst [vmem:[#allocation32_spill] sm:$0xff] %v17061_v7  ;;  %v670_v18 = vld [vmem:[#allocation7 + $0x140] sm:$0xff]  ;;  %18621 = vst [vmem:[#allocation42_spill] sm:$0xff] %v17095_v42 }
 0x182   :  { %530 = vmatprep.mubr.f32.mxu0 %v377_v16  ;;  %v17069_v16 = vpack.c.bf16 %v663_v14, %v660_v13  ;;  %v17075_v20 = vpack.c.bf16 %v670_v18, %v667_v17  ;;  %18629 = vst [vmem:[#allocation50_spill] sm:$0xff] %v17131_v40 }
 0x183   :  { %15213 = vmatpush1.bf16.msra.mxu0 %v17034_v55  ;;  %15249 = vmatpush3.bf16.msra.mxu1 %v17019_v39 }
 0x184   :  { %15215 = vmatprep.subr.bf16.mxu0 %v17038_v56  ;;  %15251 = vmatprep.subr.bf16.mxu1 %v17041_v59  ;;  %18614 = vst [vmem:[#allocation35_spill] sm:$0xff] %v17069_v16  ;;  %18615 = vst [vmem:[#allocation36_spill] sm:$0xff] %v17075_v20 }
 0x185   :  { %13505 = vmatmul.mubr.msk.f32.gmra.mrb[12].mxu0 %vm123_vm2, %v384_v31 }
 0x186   :  { %535 = vmatprep.mubr.f32.mxu0 %v378_v29  ;;  %v676_v29 = vld [vmem:[#allocation7 + $0x170] sm:$0xff] }
 0x187   :  { %15217 = vmatpush1.bf16.msra.mxu0 %v17044_v61  ;;  %15253 = vmatpush3.bf16.msra.mxu1 %v17041_v59  ;;  %v17085_v31 = vpack.c.bf16 %v676_v29, %v673_v27  ;;  %v17122_v27 = vrot.slane %v678_v23, %v16992_v49  ;;  %v18548_v29 = vsub.s32 2, %v16924_v46 }
 0x188   :  { %15219 = vmatprep.subr.bf16.mxu0 %v17048_v62  ;;  %15255 = vmatprep.subr.bf16.mxu1 %v17067_v15 }
 0x189   :  { %536 = vmatmul.mubr.f32.gmra.mrb[14].mxu0 %v383_v44  ;;  %18618 = vst [vmem:[#allocation39_spill] sm:$0xff] %v17085_v31  ;;  %v18549_v44 = vmov 0.0   ;;  %18627 = vst [vmem:[#allocation48_spill] sm:$0xff] %v17122_v27  ;;  %v17128_v34 = vrot.slane %v678_v23, %v18548_v29 }
 0x18a   :  { %775 = vmatprep.mubr.f32.mxu0 %v18549_v44 }
 0x18b   :  { %15221 = vmatpush1.bf16.msra.mxu0 %v17054_v3  ;;  %15257 = vmatpush3.bf16.msra.mxu1 %v17067_v15  ;;  %18628 = vst [vmem:[#allocation49_spill] sm:$0xff] %v17128_v34 }
 0x18c   :  { %15223 = vmatprep.subr.bf16.mxu0 %v17058_v4  ;;  %15259 = vmatprep.subr.bf16.mxu1 %v17077_v24 }
 0x18f   :  { %15225 = vmatpush1.bf16.msra.mxu0 %v17061_v7  ;;  %15261 = vmatpush3.bf16.msra.mxu1 %v17077_v24 }
 0x190   :  { %15227 = vmatprep.subr.bf16.mxu0 %v17065_v11  ;;  %15263 = vmatprep.subr.bf16.mxu1 %v17087_v35 }
 0x193   :  { %15229 = vmatpush1.bf16.msra.mxu0 %v17069_v16  ;;  %15265 = vmatpush3.bf16.msra.mxu1 %v17087_v35 }
 0x194   :  { %15231 = vmatprep.subr.bf16.mxu0 %v17075_v20  ;;  %15267 = vmatprep.subr.bf16.mxu1 %v17095_v42 }
 0x197   :  { %15233 = vmatpush1.bf16.msra.mxu0 %v17079_v25  ;;  %15269 = vmatpush3.bf16.msra.mxu1 %v17095_v42 }
 0x198   :  { %15235 = vmatprep.subr.bf16.mxu0 %v17085_v31 }
 0x19b   :  { %15237 = vmatpush1.bf16.msra.mxu0 %v17089_v36 }
 0x24c   :  { %v14396_v45 = vpop.f32.mrb[4].mxu1 }
 0x24d   :  { %v607_v53 = vpop.f32.mrb[5].mxu1 }
 0x250   :  { %v13860_v48 = vpop.f32.mrb[8].mxu0 }
 0x251   :  { %v13861_v54 = vpop.f32.mrb[9].mxu0  ;;  %v14399_v57 = vpop.f32.mrb[6].mxu1 }
 0x252   :  { %v13862_v58 = vadd.f32 %v13861_v54, %v13860_v48  ;;  %v617_v60 = vpop.f32.mrb[7].mxu1 }
 0x254   :  { %v523_v26 = vadd.f32 %v13862_v58, %v455_v52  ;;  %v13863_v63 = vpop.f32.mrb[10].mxu0 }
 0x255   :  { %v13864_v0 = vpop.f32.mrb[11].mxu0 }
 0x256   :  { %v608_v1 = vadd.f32 %v607_v53, %v523_v26  ;;  %v13865_v2 = vadd.f32 %v13864_v0, %v13863_v63 }
 0x258   :  { %v17105_v5 = vmax.f32 %v608_v1, 0.0  ;;  %v528_v6 = vadd.f32 %v13865_v2, %v455_v52  ;;  %v13866_v8 = vpop.f32.mrb[12].mxu0 }
 0x259   :  { %v13867_v9 = vpop.f32.mrb[13].mxu0 }
 0x25a   :  { %18623 = vst [vmem:[#allocation44_spill] sm:$0xff] %v17105_v5  ;;  %v13868_v10 = vadd.f32 %v13867_v9, %v13866_v8  ;;  %776 = vmatmul.mubr.f32.vlgmr.msra.gmra.mrb[16].mxu0 %v17105_v5  ;;  %14432 = vmatprep.mubr.f32.mxu1 %v17105_v5  ;;  %v613_v50 = vadd.f32 %v14396_v45, %v528_v6 }
 0x25b   :  { %781 = vmatprep.mubr.f32.mxu0 %v18549_v44 }
 0x25c   :  { %v533_v12 = vadd.f32 %v13868_v10, %v455_v52  ;;  %v13869_v13 = vpop.f32.mrb[14].mxu0  ;;  %v17110_v14 = vmax.f32 %v613_v50, 0.0 }
 0x25d   :  { %v13870_v17 = vpop.f32.mrb[15].mxu0 }
 0x25e   :  { %18624 = vst [vmem:[#allocation45_spill] sm:$0xff] %v17110_v14  ;;  %v17112_v18 = vadd.f32 %v617_v60, %v533_v12  ;;  %v13871_v19 = vadd.f32 %v13870_v17, %v13869_v13  ;;  %782 = vmatmul.mubr.f32.gmra.mrb[18].mxu0 %v17110_v14  ;;  %14433 = vmatmul.mubr.f32.vlgmr.msra.gmra.mrb[8].mxu1 %v17110_v14 }
 0x260   :  { %18625 = vst [vmem:[#allocation46_spill] sm:$0xff] %v17112_v18  ;;  %v538_v21 = vadd.f32 %v13871_v19, %v455_v52 }
 0x262   :  { %v17116_v22 = vadd.f32 %v14399_v57, %v538_v21 }
 0x264   :  { %18626 = vst [vmem:[#allocation47_spill] sm:$0xff] %v17116_v22 }
 0x32d   :  { %v777_v30 = vpop.f32.mrb[16].mxu0 }
 0x32e   :  { %v779_v32 = vpop.f32.mrb[17].mxu0  ;;  %v778_v33 = vadd.f32 %v777_v30, %v17122_v27 }
 0x32f   :  { %v780_v57 = vadd.f32 %v779_v32, %v17131_v40 }
 0x330   :  { %863 = vxpose.xlu1.b32.start [1/2] (short) %v778_v33, 128 }
 0x331   :  { %v783_v41 = vpop.f32.mrb[18].mxu0  ;;  %v14434_v45 = vpop.f32.mrb[8].mxu1 }
 0x332   :  { %v784_v53 = vadd.f32 %v783_v41, %v17122_v27  ;;  %v860_v48 = vadd.f32 %v14434_v45, %v17128_v34  ;;  %v785_v52 = vpop.f32.mrb[19].mxu0  ;;  %v854_v54 = vpop.f32.mrb[9].mxu1 }
 0x333   :  { %v786_v58 = vadd.f32 %v785_v52, %v17131_v40  ;;  %v855_v60 = vadd.f32 %v854_v54, %v17128_v34 }
 0x334   :  { %864 = vxpose.xlu1.b32.end [2/2] (short) %v784_v53, 128 }
 0x335   :  { %v15792_v26 = vpack.i.bf16 %v855_v60, %v780_v57  ;;  %v15794_v63 = vpack.i.bf16 %v860_v48, %v786_v58 }
 0x337   :  { %15793 = vxpose.xlu0.b32.start [1/2] (short) %v15792_v26, 128 }
 0x33b   :  { %15795 = vxpose.xlu0.b32.end [2/2] (short) %v15794_v63, 128 }
 0x3b0   :  { %v879_v0 = vpop.trf.xlu1 }
 0x3b4   :  { %v880_v1 = vpop.trf.xlu1 }
 0x3b7   :  { %v17138_v2 = vpop.trf.xlu0 }
 0x3b8   :  { %v881_v6 = vpop.trf.xlu1  ;;  %v15797_v52 = vunpack.i.l.bf16 %v17138_v2 }
 0x3bb   :  { %v17140_v8 = vpop.trf.xlu0 }
 0x3bc   :  { %v882_v9 = vpop.trf.xlu1  ;;  %v15802_v63 = vunpack.i.l.bf16 %v17140_v8 }
 0x3bd   :  { %1055 = vxpose.xlu1.b32.start.end [1/1] (short) (narrow) %v882_v9, 16 }
 0x3bf   :  { %v17142_v10 = vpop.trf.xlu0 }
 0x3c0   :  { %v883_v50 = vpop.trf.xlu1 }
 0x3c3   :  { %v17144_v12 = vpop.trf.xlu0 }
 0x3c4   :  { %v884_v13 = vpop.trf.xlu1  ;;  %v15812_v30 = vunpack.i.l.bf16 %v17144_v12 }
 0x3c5   :  { %1119 = vxpose.xlu1.b32.start.end [1/1] (short) (narrow) %v884_v13, 16 }
 0x3c7   :  { %v17146_v17 = vpop.trf.xlu0 }
 0x3c8   :  { %v885_v19 = vpop.trf.xlu1 }
 0x3ca   :  { %959 = vxpose.xlu1.b32.start.end [1/1] (short) (narrow) %v879_v0, 16 }
 0x3cb   :  { %v17148_v21 = vpop.trf.xlu0 }
 0x3cc   :  { %v15822_v23 = vunpack.i.l.bf16 %v17148_v21  ;;  %v886_v32 = vpop.trf.xlu1 }
 0x3ce   :  { %v15876_v33 = vpack.i.bf16 %v15822_v23, %v15812_v30 }
 0x3cf   :  { %v17152_v41 = vpop.trf.xlu0  ;;  %991 = vxpose.xlu1.b32.start.end [1/1] (short) (narrow) %v880_v1, 16 }
 0x3d0   :  { %15877 = vxpose.xlu0.b32.start.end [1/1] (short) (narrow) %v15876_v33, 16  ;;  %v887_v45 = vpop.trf.xlu1  ;;  %v15827_v14 = vunpack.i.l.bf16 %v17152_v41 }
 0x3d3   :  { %v17154_v53 = vpop.trf.xlu0 }
 0x3d4   :  { %v15832_v48 = vunpack.i.l.bf16 %v17154_v53  ;;  %v888_v54 = vpop.trf.xlu1 }
 0x3d5   :  { %1247 = vxpose.xlu1.b32.start.end [1/1] (short) (narrow) %v888_v54, 16 }
 0x3d6   :  { %v15888_v57 = vpack.i.bf16 %v15832_v48, %v15797_v52 }
 0x3d7   :  { %v17158_v58 = vpop.trf.xlu0 }
 0x3d8   :  { %15889 = vxpose.xlu0.b32.start.end [1/1] (short) (narrow) %v15888_v57, 16  ;;  %v889_v0 = vpop.trf.xlu1  ;;  %v15837_v5 = vunpack.i.l.bf16 %v17158_v58 }
 0x3db   :  { %v15841_v60 = vpop.trf.xlu0 }
 0x3dc   :  { %v15842_v26 = vunpack.i.l.bf16 %v15841_v60  ;;  %v890_v13 = vpop.trf.xlu1 }
 0x3de   :  { %v15900_v1 = vpack.i.bf16 %v15842_v26, %v15802_v63 }
 0x3df   :  { %v17161_v9 = vpop.trf.xlu0 }
 0x3e0   :  { %15901 = vxpose.xlu0.b32.start.end [1/1] (short) (narrow) %v15900_v1, 16  ;;  %v891_v33 = vpop.trf.xlu1 }
 0x3e3   :  { %v17163_v23 = vpop.trf.xlu0 }
 0x3e4   :  { %v15852_v54 = vunpack.i.l.bf16 %v17163_v23  ;;  %v892_v29 = vpop.trf.xlu1 }
 0x3e5   :  { %1183 = vxpose.xlu0.b32.start.end [1/1] (short) (narrow) %v886_v32, 16  ;;  %v15807_v32 = vunpack.i.l.bf16 %v17142_v10 }
 0x3e7   :  { %v17165_v30 = vpop.trf.xlu0 }
 0x3e8   :  { %v893_v1 = vpop.trf.xlu1 }
 0x3eb   :  { %v17167_v48 = vpop.trf.xlu0 }
 0x3ec   :  { %v15862_v52 = vunpack.i.l.bf16 %v17167_v48  ;;  %v894_v49 = vpop.trf.xlu1 }
 0x3ee   :  { %v15912_v57 = vpack.i.bf16 %v15862_v52, %v15852_v54  ;;  %v15817_v52 = vunpack.i.l.bf16 %v17146_v17 }
 0x3ef   :  { %v17171_v44 = vpop.trf.xlu0 }
 0x3f0   :  { %15913 = vxpose.xlu0.b32.start.end [1/1] (short) (narrow) %v15912_v57, 16  ;;  %v15936_v54 = vpack.i.bf16 %v15827_v14, %v15817_v52  ;;  %v15847_v57 = vunpack.i.l.bf16 %v17161_v9  ;;  %v15805_v14 = vunpack.i.h.bf16 %v17140_v8 }
 0x3f2   :  { %v15948_v46 = vpack.i.bf16 %v15847_v57, %v15837_v5  ;;  %v15800_v5 = vunpack.i.h.bf16 %v17138_v2  ;;  %v18630_v2 = vmov 0 }
 0x3f3   :  { %v17173_v26 = vpop.trf.xlu0  ;;  %v18631_v2 = vsel %vm17190_vm5, 4294967295, %v18630_v2 }
 0x3f4   :  { %v15872_v63 = vunpack.i.l.bf16 %v17173_v26  ;;  %18632 = vst [vmem:[#allocation51_spill] sm:$0xff] %v18631_v2 }
 0x3f5   :  { %1311 = vxpose.xlu0.b32.start.end [1/1] (short) (narrow) %v890_v13, 16  ;;  %v15845_v13 = vunpack.i.h.bf16 %v15841_v60 }
 0x3f6   :  { %v15924_v51 = vpack.i.bf16 %v15807_v32, %v15872_v63 }
 0x3f8   :  { %15925 = vxpose.xlu1.b32.start.end [1/1] (short) (narrow) %v15924_v51, 16  ;;  %v15867_v51 = vunpack.i.l.bf16 %v17171_v44 }
 0x3fa   :  { %1375 = vxpose.xlu0.b32.start.end [1/1] (short) (narrow) %v892_v29, 16  ;;  %v15857_v29 = vunpack.i.l.bf16 %v17165_v30 }
 0x3fd   :  { %1439 = vxpose.xlu1.b32.start.end [1/1] (short) (narrow) %v894_v49, 16  ;;  %v15960_v49 = vpack.i.bf16 %v15867_v51, %v15857_v29 }
 0x3ff   :  { %1023 = vxpose.xlu0.b32.start.end [1/1] (short) (narrow) %v881_v6, 16  ;;  %v15815_v6 = vunpack.i.h.bf16 %v17144_v12 }
 0x402   :  { %15937 = vxpose.xlu1.b32.start.end [1/1] (short) (narrow) %v15936_v54, 16 }
 0x404   :  { %1087 = vxpose.xlu0.b32.start.end [1/1] (short) (narrow) %v883_v50, 16  ;;  %v15972_v50 = vpack.i.bf16 %v15815_v6, %v15805_v14 }
 0x407   :  { %1151 = vxpose.xlu1.b32.start.end [1/1] (short) (narrow) %v885_v19, 16 }
 0x409   :  { %15949 = vxpose.xlu0.b32.start.end [1/1] (short) (narrow) %v15948_v46, 16  ;;  %v15984_v46 = vpack.i.bf16 %v15800_v5, %v15845_v13 }
 0x40c   :  { %1215 = vxpose.xlu1.b32.start.end [1/1] (short) (narrow) %v887_v45, 16 }
 0x40e   :  { %1279 = vxpose.xlu0.b32.start.end [1/1] (short) (narrow) %v889_v0, 16 }
 0x411   :  { %15961 = vxpose.xlu1.b32.start.end [1/1] (short) (narrow) %v15960_v49, 16 }
 0x413   :  { %1343 = vxpose.xlu0.b32.start.end [1/1] (short) (narrow) %v891_v33, 16 }
 0x416   :  { %1407 = vxpose.xlu1.b32.start.end [1/1] (short) (narrow) %v893_v1, 16 }
 0x418   :  { %15973 = vxpose.xlu0.b32.start.end [1/1] (short) (narrow) %v15972_v50, 16 }
 0x41d   :  { %15985 = vxpose.xlu0.b32.start.end [1/1] (short) (narrow) %v15984_v46, 16 }
 0x43d   :  { %v1071_v19 = vpop.trf.xlu1 }
 0x43e   :  { %14460 = vmatprep.mubr.msk.f32.mxu1 %vm2495_vm4, %v1071_v19 }
 0x441   :  { %v1072_v45 = vpop.trf.xlu1 }
 0x445   :  { %v1135_v0 = vpop.trf.xlu1 }
 0x449   :  { %v1136_v63 = vpop.trf.xlu1 }
 0x44d   :  { %v975_v32 = vpop.trf.xlu1 }
 0x44e   :  { %14439 = vmatprep.mubr.msk.f32.mxu0 %vm2495_vm4, %v975_v32 }
 0x450   :  { %v15878_v12 = vpop.trf.xlu0 }
 0x451   :  { %v15879_v8 = vunpack.i.l.bf16 %v15878_v12  ;;  %v15882_v52 = vunpack.i.h.bf16 %v15878_v12  ;;  %v976_v29 = vpop.trf.xlu1 }
 0x454   :  { %v15883_v33 = vpop.trf.xlu0 }
 0x455   :  { %v15887_v1 = vunpack.i.h.bf16 %v15883_v33  ;;  %v15884_v60 = vunpack.i.l.bf16 %v15883_v33  ;;  %v1007_v19 = vpop.trf.xlu1 }
 0x457   :  { %v15288_v54 = vpack.c.bf16 %v15884_v60, %v15879_v8  ;;  %v15300_v51 = vpack.c.bf16 %v15887_v1, %v15882_v52 }
 0x458   :  { %v15890_v57 = vpop.trf.xlu0 }
 0x459   :  { %15290 = vmatprep.subr.msk.bf16.mxu1 %vm17190_vm5, %v15288_v54  ;;  %v15891_v49 = vunpack.i.l.bf16 %v15890_v57  ;;  %v15894_v13 = vunpack.i.h.bf16 %v15890_v57  ;;  %v1008_v60 = vpop.trf.xlu1 }
 0x45a   :  { %15293 = vmatpush3.bf16.xpose.msk.msra.mxu1 %vm17190_vm5, %v15288_v54 }
 0x45b   :  { %15302 = vmatprep.subr.msk.bf16.mxu1 %vm17190_vm5, %v15300_v51 }
 0x45c   :  { %v15895_v6 = vpop.trf.xlu0 }
 0x45d   :  { %v15899_v14 = vunpack.i.h.bf16 %v15895_v6  ;;  %v15896_v50 = vunpack.i.l.bf16 %v15895_v6 }
 0x45f   :  { %v15270_v5 = vpack.c.bf16 %v15896_v50, %v15891_v49  ;;  %v15312_v32 = vpack.c.bf16 %v15899_v14, %v15894_v13 }
 0x460   :  { %v15902_v46 = vpop.trf.xlu0 }
 0x461   :  { %15272 = vmatprep.subr.msk.bf16.mxu0 %vm17190_vm5, %v15270_v5  ;;  %14461 = vmatmul.mubr.msk.f32.vlgmr.msra.gmra.mrb[10].mxu1 %vm2495_vm4, %v1072_v45  ;;  %v15903_v8 = vunpack.i.l.bf16 %v15902_v46  ;;  %v15906_v54 = vunpack.i.h.bf16 %v15902_v46 }
 0x462   :  { %15275 = vmatpush3.bf16.xpose.msk.msra.mxu0 %vm17190_vm5, %v15270_v5  ;;  %15305 = vmatpush3.bf16.xpose.msk.msra.mxu1 %vm17190_vm5, %v15300_v51  ;;  %v1263_v51 = vpop.trf.xlu1 }
 0x463   :  { %14474 = vmatprep.mubr.msk.f32.mxu1 %vm2495_vm4, %v1135_v0  ;;  %15314 = vmatprep.subr.msk.bf16.mxu1 %vm17190_vm5, %v15312_v32 }
 0x464   :  { %v15907_v12 = vpop.trf.xlu0 }
 0x465   :  { %v15908_v33 = vunpack.i.l.bf16 %v15907_v12  ;;  %v15911_v1 = vunpack.i.h.bf16 %v15907_v12 }
 0x467   :  { %v15276_v52 = vpack.c.bf16 %v15908_v33, %v15903_v8  ;;  %v15324_v0 = vpack.c.bf16 %v15911_v1, %v15906_v54 }
 0x468   :  { %v1199_v45 = vpop.trf.xlu0 }
 0x469   :  { %14440 = vmatmul.mubr.msk.f32.vlgmr.msra.gmra.mrb[20].mxu0 %vm2495_vm4, %v976_v29  ;;  %15278 = vmatprep.subr.msk.bf16.mxu0 %vm17190_vm5, %v15276_v52 }
 0x46a   :  { %14475 = vmatmul.mubr.msk.f32.vlgmr.msra.gmra.mrb[12].mxu1 %vm2495_vm4, %v1136_v63  ;;  %15281 = vmatpush3.bf16.xpose.msk.msra.mxu0 %vm17190_vm5, %v15276_v52  ;;  %v1264_v63 = vpop.trf.xlu1 }
 0x46b   :  { %14446 = vmatprep.mubr.msk.f32.mxu0 %vm2495_vm4, %v1007_v19  ;;  %15317 = vmatpush3.bf16.xpose.msk.msra.mxu1 %vm17190_vm5, %v15312_v32 }
 0x46c   :  { %14488 = vmatprep.mubr.msk.f32.mxu1 %vm2495_vm4, %v1199_v45  ;;  %15326 = vmatprep.subr.msk.bf16.mxu1 %vm17190_vm5, %v15324_v0  ;;  %v1200_v57 = vpop.trf.xlu0 }
 0x470   :  { %v15914_v29 = vpop.trf.xlu0 }
 0x471   :  { %14447 = vmatmul.mubr.msk.f32.vlgmr.msra.gmra.mrb[22].mxu0 %vm2495_vm4, %v1008_v60  ;;  %v15915_v6 = vunpack.i.l.bf16 %v15914_v29  ;;  %v15918_v5 = vunpack.i.h.bf16 %v15914_v29 }
 0x472   :  { %14489 = vmatmul.mubr.msk.f32.vlgmr.msra.gmra.mrb[14].mxu1 %vm2495_vm4, %v1200_v57 }
 0x473   :  { %15329 = vmatpush3.bf16.xpose.msk.msra.mxu1 %vm17190_vm5, %v15324_v0  ;;  %14502 = vmatprep.mubr.msk.f32.mxu1 %vm2495_vm4, %v1263_v51 }
 0x474   :  { %v15919_v49 = vpop.trf.xlu0 }
 0x475   :  { %v15920_v14 = vunpack.i.l.bf16 %v15919_v49  ;;  %v15923_v50 = vunpack.i.h.bf16 %v15919_v49 }
 0x477   :  { %v15336_v13 = vpack.c.bf16 %v15920_v14, %v15915_v6  ;;  %v15348_v32 = vpack.c.bf16 %v15923_v50, %v15918_v5 }
 0x478   :  { %v1327_v46 = vpop.trf.xlu0  ;;  %v15926_v19 = vpop.trf.xlu1 }
 0x479   :  { %15338 = vmatprep.subr.msk.bf16.mxu1 %vm17190_vm5, %v15336_v13  ;;  %v15930_v33 = vunpack.i.h.bf16 %v15926_v19  ;;  %v15927_v54 = vunpack.i.l.bf16 %v15926_v19 }
 0x47a   :  { %14503 = vmatmul.mubr.msk.f32.vlgmr.msra.gmra.mrb[16].mxu1 %vm2495_vm4, %v1264_v63 }
 0x47b   :  { %15341 = vmatpush3.bf16.xpose.msk.msra.mxu1 %vm17190_vm5, %v15336_v13  ;;  %14516 = vmatprep.mubr.msk.f32.mxu1 %vm2495_vm4, %v1327_v46 }
 0x47c   :  { %15350 = vmatprep.subr.msk.bf16.mxu1 %vm17190_vm5, %v15348_v32  ;;  %v1328_v12 = vpop.trf.xlu0  ;;  %v15931_v8 = vpop.trf.xlu1 }
 0x47d   :  { %v15935_v1 = vunpack.i.h.bf16 %v15931_v8  ;;  %v15932_v60 = vunpack.i.l.bf16 %v15931_v8 }
 0x47f   :  { %v15282_v52 = vpack.c.bf16 %v15935_v1, %v15930_v33  ;;  %v15360_v57 = vpack.c.bf16 %v15932_v60, %v15927_v54 }
 0x480   :  { %v1391_v45 = vpop.trf.xlu0  ;;  %v1455_v0 = vpop.trf.xlu1 }
 0x481   :  { %15284 = vmatprep.subr.msk.bf16.mxu0 %vm17190_vm5, %v15282_v52 }
 0x482   :  { %14517 = vmatmul.mubr.msk.f32.vlgmr.msra.gmra.mrb[18].mxu1 %vm2495_vm4, %v1328_v12  ;;  %15287 = vmatpush3.bf16.xpose.msk.msra.mxu0 %vm17190_vm5, %v15282_v52 }
 0x483   :  { %15353 = vmatpush3.bf16.xpose.msk.msra.mxu1 %vm17190_vm5, %v15348_v32  ;;  %14530 = vmatprep.mubr.msk.f32.mxu1 %vm2495_vm4, %v1391_v45 }
 0x484   :  { %15362 = vmatprep.subr.msk.bf16.mxu1 %vm17190_vm5, %v15360_v57  ;;  %v1392_v51 = vpop.trf.xlu0  ;;  %v1456_v29 = vpop.trf.xlu1 }
 0x488   :  { %v1039_v63 = vpop.trf.xlu0  ;;  %v15938_v49 = vpop.trf.xlu1 }
 0x489   :  { %14453 = vmatprep.mubr.msk.f32.mxu0 %vm2495_vm4, %v1039_v63  ;;  %v15939_v6 = vunpack.i.l.bf16 %v15938_v49  ;;  %v15942_v46 = vunpack.i.h.bf16 %v15938_v49 }
 0x48a   :  { %14531 = vmatmul.mubr.msk.f32.vlgmr.msra.gmra.mrb[20].mxu1 %vm2495_vm4, %v1392_v51 }
 0x48b   :  { %15365 = vmatpush3.bf16.xpose.msk.msra.mxu1 %vm17190_vm5, %v15360_v57  ;;  %14544 = vmatprep.mubr.msk.f32.mxu1 %vm2495_vm4, %v1455_v0 }
 0x48c   :  { %v1040_v14 = vpop.trf.xlu0  ;;  %v15943_v50 = vpop.trf.xlu1 }
 0x48d   :  { %v15947_v13 = vunpack.i.h.bf16 %v15943_v50  ;;  %v15944_v5 = vunpack.i.l.bf16 %v15943_v50  ;;  %14454 = vmatmul.mubr.msk.f32.vlgmr.msra.gmra.mrb[24].mxu0 %vm2495_vm4, %v1040_v14 }
 0x48f   :  { %v15294_v19 = vpack.c.bf16 %v15944_v5, %v15939_v6  ;;  %v15306_v8 = vpack.c.bf16 %v15947_v13, %v15942_v46 }
 0x490   :  { %v1103_v32 = vpop.trf.xlu0  ;;  %v1167_v12 = vpop.trf.xlu1 }
 0x491   :  { %15296 = vmatprep.subr.msk.bf16.mxu0 %vm17190_vm5, %v15294_v19  ;;  %14467 = vmatprep.mubr.msk.f32.mxu0 %vm2495_vm4, %v1103_v32 }
 0x492   :  { %14545 = vmatmul.mubr.msk.f32.vlgmr.msra.gmra.mrb[22].mxu1 %vm2495_vm4, %v1456_v29  ;;  %15299 = vmatpush3.bf16.xpose.msk.msra.mxu0 %vm17190_vm5, %v15294_v19 }
 0x493   :  { %15308 = vmatprep.subr.msk.bf16.mxu0 %vm17190_vm5, %v15306_v8 }
 0x494   :  { %v1104_v33 = vpop.trf.xlu0  ;;  %v1168_v1 = vpop.trf.xlu1 }
 0x498   :  { %v15950_v60 = vpop.trf.xlu0  ;;  %v1231_v52 = vpop.trf.xlu1 }
 0x499   :  { %14468 = vmatmul.mubr.msk.f32.vlgmr.msra.gmra.mrb[26].mxu0 %vm2495_vm4, %v1104_v33  ;;  %v15951_v54 = vunpack.i.l.bf16 %v15950_v60  ;;  %v15954_v29 = vunpack.i.h.bf16 %v15950_v60 }
 0x49a   :  { %15311 = vmatpush3.bf16.xpose.msk.msra.mxu0 %vm17190_vm5, %v15306_v8  ;;  %14481 = vmatprep.mubr.msk.f32.mxu0 %vm2495_vm4, %v1167_v12 }
 0x49c   :  { %v15955_v45 = vpop.trf.xlu0  ;;  %v1232_v0 = vpop.trf.xlu1 }
 0x49d   :  { %v15959_v57 = vunpack.i.h.bf16 %v15955_v45  ;;  %v15956_v51 = vunpack.i.l.bf16 %v15955_v45 }
 0x49f   :  { %v15318_v63 = vpack.c.bf16 %v15956_v51, %v15951_v54  ;;  %v15330_v6 = vpack.c.bf16 %v15959_v57, %v15954_v29 }
 0x4a0   :  { %v15962_v49 = vpop.trf.xlu1  ;;  %v1295_v50 = vpop.trf.xlu0 }
 0x4a1   :  { %14482 = vmatmul.mubr.msk.f32.vlgmr.msra.gmra.mrb[28].mxu0 %vm2495_vm4, %v1168_v1  ;;  %15320 = vmatprep.subr.msk.bf16.mxu0 %vm17190_vm5, %v15318_v63  ;;  %v15963_v14 = vunpack.i.l.bf16 %v15962_v49  ;;  %v15966_v32 = vunpack.i.h.bf16 %v15962_v49 }
 0x4a2   :  { %15323 = vmatpush3.bf16.xpose.msk.msra.mxu0 %vm17190_vm5, %v15318_v63  ;;  %14495 = vmatprep.mubr.msk.f32.mxu0 %vm2495_vm4, %v1231_v52 }
 0x4a3   :  { %15332 = vmatprep.subr.msk.bf16.mxu0 %vm17190_vm5, %v15330_v6 }
 0x4a4   :  { %v15967_v13 = vpop.trf.xlu1  ;;  %v1296_v19 = vpop.trf.xlu0 }
 0x4a5   :  { %v15968_v5 = vunpack.i.l.bf16 %v15967_v13  ;;  %v15971_v12 = vunpack.i.h.bf16 %v15967_v13 }
 0x4a7   :  { %v15342_v46 = vpack.c.bf16 %v15968_v5, %v15963_v14  ;;  %v15354_v33 = vpack.c.bf16 %v15971_v12, %v15966_v32 }
 0x4a8   :  { %v1359_v8 = vpop.trf.xlu0  ;;  %v1423_v60 = vpop.trf.xlu1 }
 0x4a9   :  { %14496 = vmatmul.mubr.msk.f32.vlgmr.msra.gmra.mrb[30].mxu0 %vm2495_vm4, %v1232_v0 }
 0x4aa   :  { %15335 = vmatpush3.bf16.xpose.msk.msra.mxu0 %vm17190_vm5, %v15330_v6  ;;  %14509 = vmatprep.mubr.msk.f32.mxu0 %vm2495_vm4, %v1295_v50 }
 0x4ab   :  { %15344 = vmatprep.subr.msk.bf16.mxu0 %vm17190_vm5, %v15342_v46 }
 0x4ac   :  { %v1360_v1 = vpop.trf.xlu0  ;;  %v1424_v52 = vpop.trf.xlu1 }
 0x4b0   :  { %v17288_v54 = vpop.trf.xlu0 }
 0x4b1   :  { %14510 = vmatmul.mubr.msk.f32.vlgmr.msra.gmra.mrb[32].mxu0 %vm2495_vm4, %v1296_v19 }
 0x4b2   :  { %15347 = vmatpush3.bf16.xpose.msk.msra.mxu0 %vm17190_vm5, %v15342_v46  ;;  %14523 = vmatprep.mubr.msk.f32.mxu0 %vm2495_vm4, %v1359_v8 }
 0x4b3   :  { %15356 = vmatprep.subr.msk.bf16.mxu0 %vm17190_vm5, %v15354_v33 }
 0x4b4   :  { %v17290_v45 = vpop.trf.xlu0 }
 0x4b5   :  { %v15980_v22 = vunpack.i.l.bf16 %v17290_v45  ;;  %v15983_v18 = vunpack.i.h.bf16 %v17290_v45 }
 0x4b8   :  { %v17292_v0 = vpop.trf.xlu0 }
 0x4b9   :  { %14524 = vmatmul.mubr.msk.f32.vlgmr.msra.gmra.mrb[34].mxu0 %vm2495_vm4, %v1360_v1 }
 0x4ba   :  { %15359 = vmatpush3.bf16.xpose.msk.msra.mxu0 %vm17190_vm5, %v15354_v33  ;;  %14537 = vmatprep.mubr.msk.f32.mxu0 %vm2495_vm4, %v1423_v60 }
 0x4bc   :  { %v17294_v57 = vpop.trf.xlu0 }
 0x4c1   :  { %14538 = vmatmul.mubr.msk.f32.vlgmr.msra.gmra.mrb[36].mxu0 %vm2495_vm4, %v1424_v52 }
 0x534   :  { %v14462_v51 = vpop.f32.mrb[10].mxu1 }
 0x535   :  { %v2835_v29 = vpop.f32.mrb[11].mxu1  ;;  %v17308_v60 = vmul.f32 0.35355338, %v14462_v51 }
 0x53c   :  { %v14441_v63 = vpop.f32.mrb[20].mxu0 }
 0x53d   :  { %v17296_v49 = vmul.f32 0.35355338, %v14441_v63  ;;  %v14476_v6 = vpop.f32.mrb[12].mxu1  ;;  %v2574_v14 = vpop.f32.mrb[21].mxu0 }
 0x53e   :  { %v17298_v50 = vmul.f32 0.35355338, %v2574_v14  ;;  %v3009_v13 = vpop.f32.mrb[13].mxu1  ;;  %v17314_v14 = vmul.f32 0.35355338, %v2835_v29 }
 0x53f   :  { %v3924_v5 = vsel %vm3920_vm6, %v17296_v49, -inf  ;;  %v17334_v35 = vmul.f32 0.35355338, %v3009_v13 }
 0x540   :  { %3925 = vmax.xlane.f32.xlu1 %v3924_v5  ;;  %v3921_v46 = vsel %vm3920_vm6, %v17298_v50, -inf  ;;  %v3942_v5 = vsel %vm3920_vm6, %v17308_v60, -inf  ;;  %v3939_v51 = vsel %vm3920_vm6, %v17314_v14, -inf }
 0x541   :  { %3922 = vmax.xlane.f32.xlu0 %v3921_v46 }
 0x544   :  { %v14448_v19 = vpop.f32.mrb[22].mxu0 }
 0x545   :  { %v17304_v32 = vmul.f32 0.35355338, %v14448_v19  ;;  %v14490_v12 = vpop.f32.mrb[14].mxu1  ;;  %v2661_v8 = vpop.f32.mrb[23].mxu0 }
 0x546   :  { %v17306_v33 = vmul.f32 0.35355338, %v2661_v8  ;;  %v3183_v1 = vpop.f32.mrb[15].mxu1  ;;  %v17350_v39 = vmul.f32 0.35355338, %v14490_v12  ;;  %v15975_v12 = vunpack.i.l.bf16 %v17288_v54 }
 0x547   :  { %v3930_v52 = vsel %vm3920_vm6, %v17304_v32, -inf  ;;  %v17354_v28 = vmul.f32 0.35355338, %v3183_v1 }
 0x548   :  { %3931 = vmax.xlane.f32.xlu1 %v3930_v52  ;;  %v3927_v63 = vsel %vm3920_vm6, %v17306_v33, -inf  ;;  %v15370_v25 = vpack.c.bf16 %v15980_v22, %v15975_v12  ;;  %v15990_v22 = vunpack.i.h.bf16 %v17292_v0 }
 0x549   :  { %3928 = vmax.xlane.f32.xlu0 %v3927_v63 }
 0x54a   :  { %15371 = vmatprep.subr.bf16.mxu1 %v15370_v25 }
 0x54b   :  { %15373 = vmatpush3.bf16.msra.mxu1 %v15370_v25 }
 0x54c   :  { %3943 = vmax.xlane.f32.xlu1 %v3942_v5  ;;  %v17330_v5 = vmul.f32 0.35355338, %v14476_v6  ;;  %v3951_v6 = vsel %vm3920_vm6, %v17334_v35, -inf }
 0x54d   :  { %v14504_v46 = vpop.f32.mrb[16].mxu1 }
 0x54e   :  { %v3357_v19 = vpop.f32.mrb[17].mxu1  ;;  %v17370_v36 = vmul.f32 0.35355338, %v14504_v46 }
 0x54f   :  { %v17374_v31 = vmul.f32 0.35355338, %v3357_v19 }
 0x550   :  { %3940 = vmax.xlane.f32.xlu1 %v3939_v51 }
 0x551   :  { %v3975_v46 = vsel %vm3920_vm6, %v17374_v31, -inf }
 0x555   :  { %v14518_v8 = vpop.f32.mrb[18].mxu1 }
 0x556   :  { %v17320_v2 = vpop.f32.mrb[19].mxu1 }
 0x55d   :  { %v17322_v52 = vpop.f32.mrb[20].mxu1 }
 0x55e   :  { %v17324_v27 = vpop.f32.mrb[21].mxu1  ;;  %v17409_v20 = vmul.f32 0.35355338, %v17322_v52 }
 0x560   :  { %v14455_v63 = vpop.f32.mrb[24].mxu0 }
 0x561   :  { %v17326_v29 = vmul.f32 0.35355338, %v14455_v63  ;;  %v2748_v34 = vpop.f32.mrb[25].mxu0 }
 0x562   :  { %v17328_v40 = vmul.f32 0.35355338, %v2748_v34  ;;  %v3954_v34 = vsel %vm3920_vm6, %v17330_v5, -inf }
 0x563   :  { %v3936_v42 = vsel %vm3920_vm6, %v17326_v29, -inf }
 0x564   :  { %3937 = vmax.xlane.f32.xlu1 %v3936_v42  ;;  %v3933_v51 = vsel %vm3920_vm6, %v17328_v40, -inf }
 0x565   :  { %v17338_v24 = vpop.f32.mrb[22].mxu1  ;;  %3934 = vmax.xlane.f32.xlu0 %v3933_v51 }
 0x566   :  { %v17340_v15 = vpop.f32.mrb[23].mxu1 }
 0x568   :  { %3955 = vmax.xlane.f32.xlu1 %v3954_v34 }
 0x569   :  { %3952 = vmax.xlane.f32.xlu0 %v3951_v6  ;;  %v3966_v6 = vsel %vm3920_vm6, %v17350_v39, -inf }
 0x56c   :  { %v14469_v63 = vpop.f32.mrb[26].mxu0 }
 0x56d   :  { %v17346_v13 = vmul.f32 0.35355338, %v14469_v63  ;;  %v2922_v42 = vpop.f32.mrb[27].mxu0 }
 0x56e   :  { %v17348_v59 = vmul.f32 0.35355338, %v2922_v42  ;;  %v3963_v42 = vsel %vm3920_vm6, %v17354_v28, -inf }
 0x56f   :  { %v3948_v51 = vsel %vm3920_vm6, %v17346_v13, -inf }
 0x570   :  { %3949 = vmax.xlane.f32.xlu1 %v3948_v51  ;;  %v3945_v34 = vsel %vm3920_vm6, %v17348_v59, -inf }
 0x571   :  { %3946 = vmax.xlane.f32.xlu0 %v3945_v34  ;;  %v15978_v34 = vunpack.i.h.bf16 %v17288_v54  ;;  %v3978_v54 = vsel %vm3920_vm6, %v17370_v36, -inf }
 0x574   :  { %3967 = vmax.xlane.f32.xlu1 %v3966_v6  ;;  %v14483_v63 = vpop.f32.mrb[28].mxu0 }
 0x575   :  { %v17364_v47 = vmul.f32 0.35355338, %v14483_v63  ;;  %3964 = vmax.xlane.f32.xlu0 %v3963_v42  ;;  %v3096_v1 = vpop.f32.mrb[29].mxu0  ;;  %v17378_v42 = vpack.c.bf16 %v15983_v18, %v15978_v34  ;;  %v17390_v18 = vmul.f32 0.35355338, %v14518_v8  ;;  %v15995_v34 = vunpack.i.h.bf16 %v17294_v57 }
 0x576   :  { %v17366_v51 = vmul.f32 0.35355338, %v3096_v1 }
 0x577   :  { %v3960_v6 = vsel %vm3920_vm6, %v17364_v47, -inf  ;;  %15379 = vmatprep.subr.bf16.mxu1 %v17378_v42 }
 0x578   :  { %3961 = vmax.xlane.f32.xlu1 %v3960_v6  ;;  %v3957_v63 = vsel %vm3920_vm6, %v17366_v51, -inf  ;;  %v17396_v6 = vmul.f32 0.35355338, %v17320_v2 }
 0x579   :  { %3958 = vmax.xlane.f32.xlu0 %v3957_v63 }
 0x57c   :  { %3979 = vmax.xlane.f32.xlu1 %v3978_v54  ;;  %v14497_v45 = vpop.f32.mrb[30].mxu0  ;;  %v15366_v54 = vpack.c.bf16 %v15995_v34, %v15990_v22  ;;  %v17414_v34 = vmul.f32 0.35355338, %v17324_v27  ;;  %v17427_v27 = vmul.f32 0.35355338, %v17338_v24 }
 0x57d   :  { %v17385_v19 = vmul.f32 0.35355338, %v14497_v45  ;;  %3976 = vmax.xlane.f32.xlu0 %v3975_v46  ;;  %v3270_v1 = vpop.f32.mrb[31].mxu0  ;;  %v3990_v45 = vsel %vm3920_vm6, %v17390_v18, -inf  ;;  %v3987_v46 = vsel %vm3920_vm6, %v17396_v6, -inf }
 0x57e   :  { %v17388_v12 = vmul.f32 0.35355338, %v3270_v1  ;;  %15367 = vmatprep.subr.bf16.mxu0 %v15366_v54  ;;  %v3999_v52 = vsel %vm3920_vm6, %v17414_v34, -inf }
 0x57f   :  { %v3972_v25 = vsel %vm3920_vm6, %v17385_v19, -inf  ;;  %15369 = vmatpush3.bf16.msra.mxu0 %v15366_v54  ;;  %v4002_v54 = vsel %vm3920_vm6, %v17409_v20, -inf }
 0x580   :  { %3973 = vmax.xlane.f32.xlu1 %v3972_v25  ;;  %v3969_v63 = vsel %vm3920_vm6, %v17388_v12, -inf }
 0x581   :  { %3970 = vmax.xlane.f32.xlu0 %v3969_v63 }
 0x584   :  { %3991 = vmax.xlane.f32.xlu1 %v3990_v45  ;;  %v14511_v8 = vpop.f32.mrb[32].mxu0 }
 0x585   :  { %v17404_v1 = vmul.f32 0.35355338, %v14511_v8  ;;  %3988 = vmax.xlane.f32.xlu0 %v3987_v46  ;;  %v3444_v2 = vpop.f32.mrb[33].mxu0 }
 0x586   :  { %v17406_v25 = vmul.f32 0.35355338, %v3444_v2 }
 0x587   :  { %v3984_v22 = vsel %vm3920_vm6, %v17404_v1, -inf }
 0x588   :  { %3985 = vmax.xlane.f32.xlu1 %v3984_v22  ;;  %v3981_v63 = vsel %vm3920_vm6, %v17406_v25, -inf }
 0x589   :  { %3982 = vmax.xlane.f32.xlu0 %v3981_v63  ;;  %v17432_v63 = vmul.f32 0.35355338, %v17340_v15 }
 0x58b   :  { %v4011_v24 = vsel %vm3920_vm6, %v17432_v63, -inf }
 0x58c   :  { %4003 = vmax.xlane.f32.xlu1 %v4002_v54  ;;  %v14525_v45 = vpop.f32.mrb[34].mxu0 }
 0x58d   :  { %v17422_v8 = vmul.f32 0.35355338, %v14525_v45  ;;  %4000 = vmax.xlane.f32.xlu0 %v3999_v52  ;;  %v3618_v46 = vpop.f32.mrb[35].mxu0  ;;  %v4014_v45 = vsel %vm3920_vm6, %v17427_v27, -inf }
 0x58e   :  { %v17424_v2 = vmul.f32 0.35355338, %v3618_v46 }
 0x58f   :  { %v3996_v22 = vsel %vm3920_vm6, %v17422_v8, -inf }
 0x590   :  { %3997 = vmax.xlane.f32.xlu1 %v3996_v22  ;;  %v3993_v54 = vsel %vm3920_vm6, %v17424_v2, -inf }
 0x591   :  { %3994 = vmax.xlane.f32.xlu0 %v3993_v54 }
 0x594   :  { %v14539_v52 = vpop.f32.mrb[36].mxu0  ;;  %4015 = vmax.xlane.f32.xlu1 %v4014_v45 }
 0x595   :  { %v17440_v46 = vmul.f32 0.35355338, %v14539_v52  ;;  %4012 = vmax.xlane.f32.xlu0 %v4011_v24  ;;  %v3792_v16 = vpop.f32.mrb[37].mxu0 }
 0x596   :  { %v17442_v11 = vmul.f32 0.35355338, %v3792_v16 }
 0x597   :  { %v4008_v15 = vsel %vm3920_vm6, %v17440_v46, -inf }
 0x598   :  { %4009 = vmax.xlane.f32.xlu1 %v4008_v15  ;;  %v4005_v22 = vsel %vm3920_vm6, %v17442_v11, -inf }
 0x59c   :  { %4006 = vmax.xlane.f32.xlu1 %v4005_v22 }
 0x5cd   :  { %v3926_v54 = vpop.xlane.xlu1 %3925 }
 0x5ce   :  { %v4018_v45 = vsub.f32 %v17296_v49, %v3926_v54  ;;  %v3923_v7 = vpop.xlane.xlu0 %3922 }
 0x5cf   :  { %v4017_v4 = vsub.f32 %v17298_v50, %v3923_v7 }
 0x5d0   :  { %v4051_v52 = vmul.f32 1.442695, %v4018_v45 }
 0x5d1   :  { %v4049_v3 = vmul.f32 1.442695, %v4017_v4 }
 0x5d2   :  { %16308 = vpow2.f32 %v4051_v52 }
 0x5d3   :  { %16310 = vpow2.f32 %v4049_v3 }
 0x5d5   :  { %v3932_v16 = vpop.xlane.xlu1 %3931 }
 0x5d6   :  { %v4020_v24 = vsub.f32 %v17304_v32, %v3932_v16  ;;  %v3929_v62 = vpop.xlane.xlu0 %3928 }
 0x5d7   :  { %v4019_v15 = vsub.f32 %v17306_v33, %v3929_v62 }
 0x5d8   :  { %v4055_v61 = vmul.f32 1.442695, %v4020_v24 }
 0x5d9   :  { %v4053_v56 = vmul.f32 1.442695, %v4019_v15  ;;  %v3944_v55 = vpop.xlane.xlu1 %3943 }
 0x5da   :  { %16312 = vpow2.f32 %v4055_v61  ;;  %v4024_v22 = vsub.f32 %v17308_v60, %v3944_v55 }
 0x5db   :  { %16314 = vpow2.f32 %v4053_v56 }
 0x5dc   :  { %v17453_v49 = vpop.eup %16308  ;;  %v4063_v7 = vmul.f32 1.442695, %v4024_v22 }
 0x5dd   :  { %v17455_v50 = vpop.eup %16310  ;;  %v3941_v4 = vpop.xlane.xlu1 %3940  ;;  %v4116_v3 = vsel %vm3920_vm6, %v17453_v49, 0.0 }
 0x5de   :  { %16316 = vpow2.f32 %v4063_v7  ;;  %v4023_v32 = vsub.f32 %v17314_v14, %v3941_v4  ;;  %4117 = vadd.xlane.f32.xlu1 %v4116_v3  ;;  %v4113_v62 = vsel %vm3920_vm6, %v17455_v50, 0.0 }
 0x5df   :  { %4114 = vadd.xlane.f32.xlu0 %v4113_v62 }
 0x5e0   :  { %v4061_v61 = vmul.f32 1.442695, %v4023_v32 }
 0x5e2   :  { %16318 = vpow2.f32 %v4061_v61 }
 0x5e4   :  { %v17462_v55 = vpop.eup %16312 }
 0x5e5   :  { %v17464_v56 = vpop.eup %16314  ;;  %v4122_v33 = vsel %vm3920_vm6, %v17462_v55, 0.0 }
 0x5e6   :  { %4123 = vadd.xlane.f32.xlu1 %v4122_v33  ;;  %v4119_v60 = vsel %vm3920_vm6, %v17464_v56, 0.0 }
 0x5e7   :  { %4120 = vadd.xlane.f32.xlu0 %v4119_v60 }
 0x5e8   :  { %v17470_v14 = vpop.eup %16316 }
 0x5e9   :  { %v4134_v54 = vsel %vm3920_vm6, %v17470_v14, 0.0 }
 0x5ea   :  { %4135 = vadd.xlane.f32.xlu1 %v4134_v54 }
 0x5ec   :  { %v17474_v45 = vpop.eup %16318 }
 0x5ed   :  { %v4131_v52 = vsel %vm3920_vm6, %v17474_v45, 0.0 }
 0x5ee   :  { %4132 = vadd.xlane.f32.xlu0 %v4131_v52 }
 0x5f1   :  { %v3938_v16 = vpop.xlane.xlu1 %3937 }
 0x5f2   :  { %v4022_v24 = vsub.f32 %v17326_v29, %v3938_v16  ;;  %v3935_v15 = vpop.xlane.xlu0 %3934 }
 0x5f3   :  { %v4021_v22 = vsub.f32 %v17328_v40, %v3935_v15 }
 0x5f4   :  { %v4059_v7 = vmul.f32 1.442695, %v4022_v24 }
 0x5f5   :  { %v4057_v4 = vmul.f32 1.442695, %v4021_v22  ;;  %v3956_v3 = vpop.xlane.xlu1 %3955 }
 0x5f6   :  { %16320 = vpow2.f32 %v4059_v7  ;;  %v4028_v32 = vsub.f32 %v17330_v5, %v3956_v3  ;;  %v3953_v62 = vpop.xlane.xlu0 %3952 }
 0x5f7   :  { %16322 = vpow2.f32 %v4057_v4  ;;  %v4027_v61 = vsub.f32 %v17334_v35, %v3953_v62 }
 0x5f8   :  { %v4071_v33 = vmul.f32 1.442695, %v4028_v32 }
 0x5f9   :  { %v4069_v60 = vmul.f32 1.442695, %v4027_v61 }
 0x5fa   :  { %16324 = vpow2.f32 %v4071_v33 }
 0x5fb   :  { %16326 = vpow2.f32 %v4069_v60 }
 0x5fd   :  { %v3950_v54 = vpop.xlane.xlu1 %3949 }
 0x5fe   :  { %v4026_v29 = vsub.f32 %v17346_v13, %v3950_v54  ;;  %v3947_v52 = vpop.xlane.xlu0 %3946 }
 0x5ff   :  { %v4025_v40 = vsub.f32 %v17348_v59, %v3947_v52 }
 0x600   :  { %v17484_v16 = vpop.eup %16320  ;;  %v4067_v24 = vmul.f32 1.442695, %v4026_v29 }
 0x601   :  { %v17486_v15 = vpop.eup %16322  ;;  %v4065_v5 = vmul.f32 1.442695, %v4025_v40  ;;  %v3968_v22 = vpop.xlane.xlu1 %3967  ;;  %v4128_v35 = vsel %vm3920_vm6, %v17484_v16, 0.0 }
 0x602   :  { %16328 = vpow2.f32 %v4067_v24  ;;  %v4032_v7 = vsub.f32 %v17350_v39, %v3968_v22  ;;  %v3965_v4 = vpop.xlane.xlu0 %3964  ;;  %4129 = vadd.xlane.f32.xlu1 %v4128_v35  ;;  %v4125_v13 = vsel %vm3920_vm6, %v17486_v15, 0.0 }
 0x603   :  { %16330 = vpow2.f32 %v4065_v5  ;;  %v4031_v59 = vsub.f32 %v17354_v28, %v3965_v4  ;;  %4126 = vadd.xlane.f32.xlu0 %v4125_v13 }
 0x604   :  { %v17494_v3 = vpop.eup %16324  ;;  %v4079_v32 = vmul.f32 1.442695, %v4032_v7 }
 0x605   :  { %v17496_v62 = vpop.eup %16326  ;;  %v4077_v61 = vmul.f32 1.442695, %v4031_v59  ;;  %v3962_v33 = vpop.xlane.xlu1 %3961  ;;  %v4146_v60 = vsel %vm3920_vm6, %v17494_v3, 0.0 }
 0x606   :  { %16332 = vpow2.f32 %v4079_v32  ;;  %v4030_v39 = vsub.f32 %v17364_v47, %v3962_v33  ;;  %v3959_v54 = vpop.xlane.xlu0 %3958  ;;  %4147 = vadd.xlane.f32.xlu1 %v4146_v60  ;;  %v4143_v29 = vsel %vm3920_vm6, %v17496_v62, 0.0 }
 0x607   :  { %16334 = vpow2.f32 %v4077_v61  ;;  %v4029_v28 = vsub.f32 %v17366_v51, %v3959_v54  ;;  %4144 = vadd.xlane.f32.xlu0 %v4143_v29 }
 0x608   :  { %v4075_v52 = vmul.f32 1.442695, %v4030_v39 }
 0x609   :  { %v4073_v40 = vmul.f32 1.442695, %v4029_v28  ;;  %v3980_v24 = vpop.xlane.xlu1 %3979 }
 0x60a   :  { %16336 = vpow2.f32 %v4075_v52  ;;  %v4036_v5 = vsub.f32 %v17370_v36, %v3980_v24  ;;  %v3977_v22 = vpop.xlane.xlu0 %3976 }
 0x60b   :  { %16338 = vpow2.f32 %v4073_v40  ;;  %v4035_v35 = vsub.f32 %v17374_v31, %v3977_v22 }
 0x60c   :  { %v17506_v47 = vpop.eup %16328  ;;  %v4087_v7 = vmul.f32 1.442695, %v4036_v5 }
 0x60d   :  { %v17508_v4 = vpop.eup %16330  ;;  %v4085_v13 = vmul.f32 1.442695, %v4035_v35  ;;  %v17510_v59 = vpop.xlane.xlu1 %3973  ;;  %v4140_v51 = vsel %vm3920_vm6, %v17506_v47, 0.0 }
 0x60e   :  { %16340 = vpow2.f32 %v4087_v7  ;;  %v3971_v32 = vpop.xlane.xlu0 %3970  ;;  %4141 = vadd.xlane.f32.xlu1 %v4140_v51  ;;  %v4137_v36 = vsel %vm3920_vm6, %v17508_v4, 0.0 }
 0x60f   :  { %16342 = vpow2.f32 %v4085_v13  ;;  %4138 = vadd.xlane.f32.xlu0 %v4137_v36 }
 0x610   :  { %v17516_v31 = vpop.eup %16332 }
 0x611   :  { %v17518_v61 = vpop.eup %16334  ;;  %v3992_v33 = vpop.xlane.xlu1 %3991  ;;  %v4158_v60 = vsel %vm3920_vm6, %v17516_v31, 0.0 }
 0x612   :  { %v4040_v39 = vsub.f32 %v17390_v18, %v3992_v33  ;;  %v3989_v54 = vpop.xlane.xlu0 %3988  ;;  %4159 = vadd.xlane.f32.xlu1 %v4158_v60  ;;  %v4155_v29 = vsel %vm3920_vm6, %v17518_v61, 0.0 }
 0x613   :  { %v4039_v28 = vsub.f32 %v17396_v6, %v3989_v54  ;;  %4156 = vadd.xlane.f32.xlu0 %v4155_v29 }
 0x614   :  { %v17526_v52 = vpop.eup %16336  ;;  %v4095_v40 = vmul.f32 1.442695, %v4040_v39 }
 0x615   :  { %v17528_v24 = vpop.eup %16338  ;;  %v4093_v5 = vmul.f32 1.442695, %v4039_v28  ;;  %v17530_v22 = vpop.xlane.xlu1 %3985  ;;  %v4152_v35 = vsel %vm3920_vm6, %v17526_v52, 0.0 }
 0x616   :  { %16344 = vpow2.f32 %v4095_v40  ;;  %v17534_v18 = vpop.xlane.xlu0 %3982  ;;  %4153 = vadd.xlane.f32.xlu1 %v4152_v35  ;;  %v4149_v7 = vsel %vm3920_vm6, %v17528_v24, 0.0 }
 0x617   :  { %16346 = vpow2.f32 %v4093_v5  ;;  %4150 = vadd.xlane.f32.xlu0 %v4149_v7 }
 0x618   :  { %v17538_v6 = vpop.eup %16340 }
 0x619   :  { %v17540_v13 = vpop.eup %16342  ;;  %v4004_v51 = vpop.xlane.xlu1 %4003  ;;  %v4170_v36 = vsel %vm3920_vm6, %v17538_v6, 0.0 }
 0x61a   :  { %v4044_v33 = vsub.f32 %v17409_v20, %v4004_v51  ;;  %v4001_v60 = vpop.xlane.xlu0 %4000  ;;  %4171 = vadd.xlane.f32.xlu1 %v4170_v36  ;;  %v4167_v39 = vsel %vm3920_vm6, %v17540_v13, 0.0  ;;  %v4033_v20 = vsub.f32 %v17388_v12, %v3971_v32 }
 0x61b   :  { %v4043_v54 = vsub.f32 %v17414_v34, %v4001_v60  ;;  %4168 = vadd.xlane.f32.xlu0 %v4167_v39 }
 0x61c   :  { %v4103_v29 = vmul.f32 1.442695, %v4044_v33  ;;  %v4081_v12 = vmul.f32 1.442695, %v4033_v20 }
 0x61d   :  { %v4101_v28 = vmul.f32 1.442695, %v4043_v54  ;;  %v17548_v40 = vpop.xlane.xlu1 %3997  ;;  %v4034_v54 = vsub.f32 %v17385_v19, %v17510_v59 }
 0x61e   :  { %16348 = vpow2.f32 %v4103_v29  ;;  %v17550_v5 = vpop.xlane.xlu0 %3994 }
 0x61f   :  { %16350 = vpow2.f32 %v4101_v28  ;;  %v4083_v38 = vmul.f32 1.442695, %v4034_v54  ;;  %v15810_v54 = vunpack.i.h.bf16 %v17142_v10  ;;  %v15855_v10 = vunpack.i.h.bf16 %v17163_v23 }
 0x620   :  { %v17552_v35 = vpop.eup %16344 }
 0x621   :  { %v17555_v7 = vpop.eup %16346  ;;  %v4016_v51 = vpop.xlane.xlu1 %4015  ;;  %v4182_v36 = vsel %vm3920_vm6, %v17552_v35, 0.0 }
 0x622   :  { %v4048_v34 = vsub.f32 %v17427_v27, %v4016_v51  ;;  %4183 = vadd.xlane.f32.xlu1 %v4182_v36  ;;  %v4013_v33 = vpop.xlane.xlu0 %4012  ;;  %v4179_v60 = vsel %vm3920_vm6, %v17555_v7, 0.0 }
 0x623   :  { %v4047_v39 = vsub.f32 %v17432_v63, %v4013_v33  ;;  %4180 = vadd.xlane.f32.xlu0 %v4179_v60 }
 0x624   :  { %v4111_v32 = vmul.f32 1.442695, %v4048_v34 }
 0x625   :  { %v4109_v29 = vmul.f32 1.442695, %v4047_v39  ;;  %v15875_v39 = vunpack.i.h.bf16 %v17173_v26 }
 0x626   :  { %16352 = vpow2.f32 %v4111_v32  ;;  %v17591_v32 = vpop.xlane.xlu1 %4009 }
 0x627   :  { %16354 = vpow2.f32 %v4109_v29  ;;  %v15835_v29 = vunpack.i.h.bf16 %v17154_v53  ;;  %v15820_v53 = vunpack.i.h.bf16 %v17146_v17 }
 0x628   :  { %v17565_v28 = vpop.eup %16348  ;;  %16356 = vpow2.f32 %v4081_v12  ;;  %v15996_v12 = vpack.i.bf16 %v15810_v54, %v15875_v39  ;;  %v15830_v39 = vunpack.i.h.bf16 %v17152_v41  ;;  %v4037_v41 = vsub.f32 %v17406_v25, %v17534_v18 }
 0x629   :  { %v17567_v27 = vpop.eup %16350  ;;  %v4194_v51 = vsel %vm3920_vm6, %v17565_v28, 0.0  ;;  %16358 = vpow2.f32 %v4083_v38  ;;  %v4042_v25 = vsub.f32 %v17422_v8, %v17548_v40  ;;  %v4038_v8 = vsub.f32 %v17404_v1, %v17530_v22 }
 0x62a   :  { %4195 = vadd.xlane.f32.xlu1 %v4194_v51  ;;  %v4191_v63 = vsel %vm3920_vm6, %v17567_v27, 0.0  ;;  %v17594_v51 = vpop.xlane.xlu1 %4006 }
 0x62b   :  { %4192 = vadd.xlane.f32.xlu0 %v4191_v63  ;;  %v15825_v63 = vunpack.i.h.bf16 %v17148_v21  ;;  %v16032_v21 = vpack.i.bf16 %v15830_v39, %v15820_v53  ;;  %v4091_v40 = vmul.f32 1.442695, %v4038_v8 }
 0x630   :  { %v17573_v19 = vpop.eup %16352 }
 0x631   :  { %v17575_v59 = vpop.eup %16354  ;;  %v4206_v20 = vsel %vm3920_vm6, %v17573_v19, 0.0 }
 0x632   :  { %v17579_v36 = vpop.eup %16356  ;;  %4207 = vadd.xlane.f32.xlu1 %v4206_v20  ;;  %v4203_v34 = vsel %vm3920_vm6, %v17575_v59, 0.0 }
 0x633   :  { %4204 = vadd.xlane.f32.xlu0 %v4203_v34  ;;  %v4161_v33 = vsel %vm3920_vm6, %v17579_v36, 0.0  ;;  %v17585_v60 = vpop.eup %16358  ;;  %v16008_v34 = vpack.i.bf16 %v15835_v29, %v15825_v63 }
 0x634   :  { %v4164_v38 = vsel %vm3920_vm6, %v17585_v60, 0.0 }
 0x636   :  { %4162 = vadd.xlane.f32.xlu1 %v4161_v33 }
 0x63a   :  { %4165 = vadd.xlane.f32.xlu1 %v4164_v38  ;;  %v15865_v38 = vunpack.i.h.bf16 %v17167_v48 }
 0x63c   :  { %v16020_v26 = vpack.i.bf16 %v15865_v38, %v15855_v10  ;;  %v4089_v38 = vmul.f32 1.442695, %v4037_v41  ;;  %v4041_v10 = vsub.f32 %v17424_v2, %v17550_v5 }
 0x63e   :  { %v4097_v18 = vmul.f32 1.442695, %v4041_v10  ;;  %v15850_v10 = vunpack.i.h.bf16 %v17161_v9 }
 0x660   :  { %15997 = vxpose.xlu0.b32.start.end [1/1] (short) (narrow) %v15996_v12, 16 }
 0x66b   :  { %v4118_v20 = vpop.xlane.xlu1 %4117 }
 0x66c   :  { %16360 = vrcp.f32 %v4118_v20  ;;  %v4115_v33 = vpop.xlane.xlu0 %4114 }
 0x66d   :  { %16362 = vrcp.f32 %v4115_v33  ;;  %16009 = vxpose.xlu1.b32.start.end [1/1] (short) (narrow) %v16008_v34, 16 }
 0x672   :  { %16021 = vxpose.xlu1.b32.start.end [1/1] (short) (narrow) %v16020_v26, 16 }
 0x673   :  { %v4124_v54 = vpop.xlane.xlu1 %4123 }
 0x674   :  { %16364 = vrcp.f32 %v4124_v54  ;;  %v4121_v12 = vpop.xlane.xlu0 %4120  ;;  %v4099_v54 = vmul.f32 1.442695, %v4042_v25 }
 0x675   :  { %16366 = vrcp.f32 %v4121_v12  ;;  %v4045_v12 = vsub.f32 %v17442_v11, %v17594_v51 }
 0x676   :  { %v16361_v29 = vpop.eup %16360 }
 0x677   :  { %v16363_v63 = vpop.eup %16362  ;;  %16033 = vxpose.xlu1.b32.start.end [1/1] (short) (narrow) %v16032_v21, 16  ;;  %v4136_v20 = vpop.xlane.xlu1 %4135  ;;  %v4242_v34 = vmul.f32 %v16361_v29, %v17453_v49 }
 0x678   :  { %v4241_v48 = vmul.f32 %v16363_v63, %v17455_v50  ;;  %16368 = vrcp.f32 %v4136_v20 }
 0x67a   :  { %14551 = vmatprep.mubr.msk.f32.mxu0 %vm3920_vm6, %v4241_v48 }
 0x67b   :  { %14552 = vmatmul.mubr.msk.f32.vlgmr.msra.gmra.mrb[38].mxu0 %vm3920_vm6, %v4242_v34  ;;  %v4133_v17 = vpop.xlane.xlu0 %4132 }
 0x67c   :  { %16370 = vrcp.f32 %v4133_v17 }
 0x67d   :  { %16372 = vpow2.f32 %v4089_v38 }
 0x67e   :  { %v16365_v23 = vpop.eup %16364  ;;  %16374 = vpow2.f32 %v4097_v18 }
 0x67f   :  { %v16367_v33 = vpop.eup %16366  ;;  %v4244_v49 = vmul.f32 %v16365_v23, %v17462_v55  ;;  %16376 = vpow2.f32 %v4099_v54 }
 0x680   :  { %v4243_v50 = vmul.f32 %v16367_v33, %v17464_v56 }
 0x682   :  { %14558 = vmatprep.mubr.msk.f32.mxu1 %vm3920_vm6, %v4243_v50  ;;  %v16369_v26 = vpop.eup %16368  ;;  %v15840_v50 = vunpack.i.h.bf16 %v17158_v58 }
 0x683   :  { %14559 = vmatmul.mubr.msk.f32.vlgmr.msra.gmra.mrb[24].mxu1 %vm3920_vm6, %v4244_v49  ;;  %v4248_v56 = vmul.f32 %v16369_v26, %v17470_v14 }
 0x684   :  { %15381 = vmatpush3.bf16.msra.mxu1 %v17378_v42  ;;  %v4046_v42 = vsub.f32 %v17440_v46, %v17591_v32  ;;  %v4105_v46 = vmul.f32 1.442695, %v4045_v12  ;;  %v16044_v25 = vpack.i.bf16 %v15850_v10, %v15840_v50 }
 0x686   :  { %v16371_v39 = vpop.eup %16370  ;;  %v4107_v14 = vmul.f32 1.442695, %v4046_v42 }
 0x687   :  { %v4247_v2 = vmul.f32 %v16371_v39, %v17474_v45  ;;  %v17622_v55 = vpop.eup %16372 }
 0x688   :  { %v4173_v45 = vsel %vm3920_vm6, %v17622_v55, 0.0  ;;  %v17628_v53 = vpop.eup %16374 }
 0x689   :  { %14572 = vmatprep.mubr.msk.f32.mxu1 %vm3920_vm6, %v4247_v2  ;;  %v4185_v22 = vsel %vm3920_vm6, %v17628_v53, 0.0  ;;  %v17634_v21 = vpop.eup %16376 }
 0x68a   :  { %14573 = vmatmul.mubr.msk.f32.vlgmr.msra.gmra.mrb[26].mxu1 %vm3920_vm6, %v4248_v56  ;;  %v4188_v32 = vsel %vm3920_vm6, %v17634_v21, 0.0 }
 0x68f   :  { %v4130_v23 = vpop.xlane.xlu1 %4129 }
 0x690   :  { %v4127_v5 = vpop.xlane.xlu0 %4126 }
 0x691   :  { %16378 = vrcp.f32 %v4127_v5  ;;  %4174 = vadd.xlane.f32.xlu0 %v4173_v45  ;;  %v15860_v5 = vunpack.i.h.bf16 %v17165_v30 }
 0x692   :  { %16380 = vpow2.f32 %v4091_v40  ;;  %v15870_v40 = vunpack.i.h.bf16 %v17171_v44 }
 0x694   :  { %v4145_v1 = vpop.xlane.xlu0 %4144  ;;  %v16056_v45 = vpack.i.bf16 %v15870_v40, %v15860_v5 }
 0x695   :  { %16382 = vrcp.f32 %v4145_v1  ;;  %4186 = vadd.xlane.f32.xlu0 %v4185_v22 }
 0x696   :  { %16384 = vpow2.f32 %v4107_v14 }
 0x697   :  { %16386 = vpow2.f32 %v4105_v46 }
 0x698   :  { %16388 = vrcp.f32 %v4130_v23 }
 0x699   :  { %4189 = vadd.xlane.f32.xlu0 %v4188_v32 }
 0x69b   :  { %v16379_v29 = vpop.eup %16378 }
 0x69c   :  { %v4245_v63 = vmul.f32 %v16379_v29, %v17486_v15  ;;  %v17639_v20 = vpop.eup %16380  ;;  %v4139_v33 = vpop.xlane.xlu0 %4138 }
 0x69d   :  { %v4176_v48 = vsel %vm3920_vm6, %v17639_v20, 0.0  ;;  %16390 = vrcp.f32 %v4139_v33 }
 0x69e   :  { %14565 = vmatprep.mubr.msk.f32.mxu0 %vm3920_vm6, %v4245_v63 }
 0x69f   :  { %v16383_v11 = vpop.eup %16382 }
 0x6a0   :  { %v4251_v51 = vmul.f32 %v16383_v11, %v17496_v62  ;;  %v17645_v34 = vpop.eup %16384  ;;  %v4148_v62 = vpop.xlane.xlu1 %4147 }
 0x6a1   :  { %v4200_v41 = vsel %vm3920_vm6, %v17645_v34, 0.0  ;;  %v17650_v17 = vpop.eup %16386  ;;  %v4157_v49 = vpop.xlane.xlu0 %4156  ;;  %16392 = vrcp.f32 %v4148_v62 }
 0x6a2   :  { %4177 = vadd.xlane.f32.xlu1 %v4176_v48  ;;  %14586 = vmatprep.mubr.msk.f32.mxu1 %vm3920_vm6, %v4251_v51  ;;  %v4197_v15 = vsel %vm3920_vm6, %v17650_v17, 0.0  ;;  %v16389_v30 = vpop.eup %16388  ;;  %16394 = vrcp.f32 %v4157_v49 }
 0x6a3   :  { %v4246_v11 = vmul.f32 %v16389_v30, %v17484_v16  ;;  %v15987_v16 = vunpack.i.l.bf16 %v17292_v0 }
 0x6a4   :  { %v4142_v38 = vpop.xlane.xlu1 %4141 }
 0x6a5   :  { %v17656_v26 = vpop.xlane.xlu0 %4150 }
 0x6a6   :  { %4201 = vadd.xlane.f32.xlu1 %v4200_v41 }
 0x6a7   :  { %v16391_v29 = vpop.eup %16390 }
 0x6a8   :  { %v4160_v18 = vpop.xlane.xlu1 %4159  ;;  %v4249_v51 = vmul.f32 %v16391_v29, %v17508_v4  ;;  %v15992_v4 = vunpack.i.l.bf16 %v17294_v57 }
 0x6a9   :  { %v4169_v54 = vpop.xlane.xlu0 %4168  ;;  %16396 = vrcp.f32 %v4160_v18 }
 0x6aa   :  { %4198 = vadd.xlane.f32.xlu1 %v4197_v15  ;;  %16398 = vrcp.f32 %v4169_v54  ;;  %v15402_v5 = vpack.c.bf16 %v15992_v4, %v15987_v16  ;;  %v18634_v4 = vld [vmem:[#allocation23_spill] sm:$0xff] }
 0x6ab   :  { %v16393_v50 = vpop.eup %16392 }
 0x6ac   :  { %v17658_v39 = vpop.xlane.xlu1 %4153  ;;  %v4252_v18 = vmul.f32 %v16393_v50, %v17494_v3 }
 0x6b0   :  { %v4172_v2 = vpop.xlane.xlu1 %4171  ;;  %v4181_v56 = vpop.xlane.xlu0 %4180 }
 0x6b1   :  { %16400 = vrcp.f32 %v4172_v2 }
 0x6b2   :  { %16402 = vrcp.f32 %v4181_v56 }
 0x6b4   :  { %v4184_v8 = vpop.xlane.xlu1 %4183 }
 0x6b5   :  { %16404 = vrcp.f32 %v4184_v8 }
 0x6b6   :  { %16406 = vrcp.f32 %v4142_v38 }
 0x6b8   :  { %v4193_v42 = vpop.xlane.xlu0 %4192  ;;  %v4196_v9 = vpop.xlane.xlu1 %4195 }
 0x6b9   :  { %16408 = vrcp.f32 %v4193_v42 }
 0x6ba   :  { %16410 = vrcp.f32 %v4196_v9 }
 0x6bb   :  { %16412 = vrcp.f32 %v17656_v26 }
 0x6bf   :  { %v17662_v14 = vpop.xlane.xlu1 %4207 }
 0x6c0   :  { %v4205_v58 = vpop.xlane.xlu0 %4204 }
 0x6c1   :  { %16414 = vrcp.f32 %v4205_v58 }
 0x6c2   :  { %16416 = vrcp.f32 %v17658_v39 }
 0x6c3   :  { %v17666_v1 = vpop.xlane.xlu1 %4162  ;;  %16418 = vrcp.f32 %v17662_v14 }
 0x6c4   :  { %16420 = vrcp.f32 %v17666_v1 }
 0x6c6   :  { %16045 = vxpose.xlu0.b32.start.end [1/1] (short) (narrow) %v16044_v25, 16  ;;  %v16395_v25 = vpop.eup %16394 }
 0x6c7   :  { %v17672_v63 = vpop.xlane.xlu1 %4165  ;;  %v16397_v54 = vpop.eup %16396  ;;  %v4255_v56 = vmul.f32 %v16395_v25, %v17518_v61  ;;  %v18635_v25 = vld [vmem:[#allocation25_spill] sm:$0xff] }
 0x6c8   :  { %v4256_v3 = vmul.f32 %v16397_v54, %v17516_v31  ;;  %v18642_v54 = vld [vmem:[#allocation33_spill] sm:$0xff]  ;;  %16422 = vrcp.f32 %v17672_v63 }
 0x6dd   :  { %16057 = vxpose.xlu1.b32.start.end [1/1] (short) (narrow) %v16056_v45, 16  ;;  %v16399_v45 = vpop.eup %16398 }
 0x6de   :  { %v4259_v42 = vmul.f32 %v16399_v45, %v17540_v13  ;;  %v18647_v45 = vld [vmem:[#allocation41_spill] sm:$0xff] }
 0x6e0   :  { %v17664_v12 = vpop.trf.xlu0 }
 0x6e1   :  { %v16002_v22 = vunpack.i.h.bf16 %v17664_v12 }
 0x6e4   :  { %v17669_v46 = vpop.trf.xlu0 }
 0x6e5   :  { %v16007_v44 = vunpack.i.h.bf16 %v17669_v46  ;;  %v16004_v29 = vunpack.i.l.bf16 %v17669_v46 }
 0x6e7   :  { %v15374_v32 = vpack.c.bf16 %v16007_v44, %v16002_v22  ;;  %v16401_v22 = vpop.eup %16400 }
 0x6e8   :  { %v16403_v38 = vpop.eup %16402  ;;  %v4260_v31 = vmul.f32 %v16401_v22, %v17538_v6  ;;  %v18650_v22 = vld [vmem:[#allocation20_spill] sm:$0xff] }
 0x6e9   :  { %15375 = vmatprep.subr.bf16.mxu0 %v15374_v32  ;;  %v4263_v58 = vmul.f32 %v16403_v38, %v17555_v7  ;;  %v16405_v13 = vpop.eup %16404 }
 0x6ea   :  { %15377 = vmatpush3.bf16.msra.mxu0 %v15374_v32  ;;  %v16407_v14 = vpop.eup %16406  ;;  %v4264_v7 = vmul.f32 %v16405_v13, %v17552_v35 }
 0x6eb   :  { %v16409_v6 = vpop.eup %16408  ;;  %v4250_v35 = vmul.f32 %v16407_v14, %v17506_v47 }
 0x6ed   :  { %v16010_v48 = vpop.trf.xlu1  ;;  %14566 = vmatmul.mubr.msk.f32.vlgmr.msra.gmra.mrb[40].mxu0 %vm3920_vm6, %v4246_v11  ;;  %v15999_v11 = vunpack.i.l.bf16 %v17664_v12  ;;  %v4267_v12 = vmul.f32 %v16409_v6, %v17567_v27 }
 0x6ee   :  { %14579 = vmatprep.mubr.msk.f32.mxu0 %vm3920_vm6, %v4249_v51  ;;  %v16011_v41 = vunpack.i.l.bf16 %v16010_v48  ;;  %v16014_v10 = vunpack.i.h.bf16 %v16010_v48 }
 0x6ef   :  { %v15426_v46 = vpack.c.bf16 %v16004_v29, %v15999_v11 }
 0x6f1   :  { %v16015_v15 = vpop.trf.xlu1 }
 0x6f2   :  { %v16016_v23 = vunpack.i.l.bf16 %v16015_v15  ;;  %v16019_v33 = vunpack.i.h.bf16 %v16015_v15 }
 0x6f4   :  { %v15386_v62 = vpack.c.bf16 %v16016_v23, %v16011_v41  ;;  %v15394_v40 = vpack.c.bf16 %v16019_v33, %v16014_v10  ;;  %v16411_v41 = vpop.eup %16410 }
 0x6f5   :  { %v16022_v49 = vpop.trf.xlu1  ;;  %v16413_v23 = vpop.eup %16412 }
 0x6f6   :  { %15387 = vmatprep.subr.bf16.mxu1 %v15386_v62  ;;  %v16023_v0 = vunpack.i.l.bf16 %v16022_v49  ;;  %v16026_v8 = vunpack.i.h.bf16 %v16022_v49  ;;  %v16415_v33 = vpop.eup %16414  ;;  %v4253_v16 = vmul.f32 %v16413_v23, %v17528_v24 }
 0x6f7   :  { %15389 = vmatpush3.bf16.msra.mxu1 %v15386_v62  ;;  %v16417_v10 = vpop.eup %16416  ;;  %v4268_v62 = vmul.f32 %v16411_v41, %v17565_v28  ;;  %v4271_v27 = vmul.f32 %v16415_v33, %v17575_v59  ;;  %v18633_v59 = vmov 0.0  }
 0x6f8   :  { %15395 = vmatprep.subr.bf16.mxu1 %v15394_v40  ;;  %v16419_v50 = vpop.eup %16418  ;;  %v4254_v28 = vmul.f32 %v16417_v10, %v17526_v52  ;;  %v18636_v52 = vld [vmem:[#allocation26_spill] sm:$0xff] }
 0x6f9   :  { %v16027_v2 = vpop.trf.xlu1  ;;  %v16421_v49 = vpop.eup %16420  ;;  %v4272_v47 = vmul.f32 %v16419_v50, %v17573_v19  ;;  %v18637_v19 = vld [vmem:[#allocation28_spill] sm:$0xff] }
 0x6fa   :  { %14587 = vmatmul.mubr.msk.f32.vlgmr.msra.gmra.mrb[28].mxu1 %vm3920_vm6, %v4252_v18  ;;  %v16028_v57 = vunpack.i.l.bf16 %v16027_v2  ;;  %v16031_v44 = vunpack.i.h.bf16 %v16027_v2  ;;  %v4257_v24 = vmul.f32 %v16421_v49, %v17579_v36  ;;  %v18639_v36 = vld [vmem:[#allocation30_spill] sm:$0xff]  ;;  %v18641_v18 = vld [vmem:[#allocation32_spill] sm:$0xff] }
 0x6fb   :  { %15397 = vmatpush3.bf16.msra.mxu1 %v15394_v40  ;;  %14600 = vmatprep.mubr.msk.f32.mxu1 %vm3920_vm6, %v4255_v56  ;;  %v18640_v40 = vld [vmem:[#allocation31_spill] sm:$0xff]  ;;  %v18644_v2 = vld [vmem:[#allocation36_spill] sm:$0xff]  ;;  %v18645_v56 = vld [vmem:[#allocation38_spill] sm:$0xff] }
 0x6fc   :  { %15403 = vmatprep.subr.bf16.mxu1 %v15402_v5  ;;  %v15410_v9 = vpack.c.bf16 %v16028_v57, %v16023_v0  ;;  %v15418_v39 = vpack.c.bf16 %v16031_v44, %v16026_v8  ;;  %v18648_v0 = vld [vmem:[#allocation46_spill] sm:$0xff]  ;;  %v18655_v44 = vld [vmem:[#allocation27_spill] sm:$0xff] }
 0x6fd   :  { %v16034_v61 = vpop.trf.xlu1  ;;  %v17734_v57 = vmax.f32 %v18648_v0, 0.0  ;;  %v18653_v8 = vld [vmem:[#allocation22_spill] sm:$0xff] }
 0x6fe   :  { %14601 = vmatmul.mubr.msk.f32.vlgmr.msra.gmra.mrb[30].mxu1 %vm3920_vm6, %v4256_v3  ;;  %v16035_v26 = vunpack.i.l.bf16 %v16034_v61  ;;  %v16038_v32 = vunpack.i.h.bf16 %v16034_v61  ;;  %v18651_v3 = vld [vmem:[#allocation47_spill] sm:$0xff]  ;;  %v18654_v61 = vld [vmem:[#allocation24_spill] sm:$0xff] }
 0x6ff   :  { %15405 = vmatpush3.bf16.msra.mxu1 %v15402_v5  ;;  %14614 = vmatprep.mubr.msk.f32.mxu1 %vm3920_vm6, %v4259_v42  ;;  %v18646_v5 = vld [vmem:[#allocation39_spill] sm:$0xff]  ;;  %18649 = vst [vmem:[#allocation23_spill] sm:$0xff] %v17734_v57  ;;  %v17741_v38 = vmax.f32 %v18651_v3, 0.0 }
 0x700   :  { %15411 = vmatprep.subr.bf16.mxu1 %v15410_v9 }
 0x701   :  { %v16039_v30 = vpop.trf.xlu1  ;;  %18652 = vst [vmem:[#allocation25_spill] sm:$0xff] %v17741_v38 }
 0x702   :  { %14615 = vmatmul.mubr.msk.f32.vlgmr.msra.gmra.mrb[32].mxu1 %vm3920_vm6, %v4260_v31  ;;  %v16040_v51 = vunpack.i.l.bf16 %v16039_v30  ;;  %v16043_v48 = vunpack.i.h.bf16 %v16039_v30  ;;  %v18656_v31 = vld [vmem:[#allocation34_spill] sm:$0xff] }
 0x703   :  { %15413 = vmatpush3.bf16.msra.mxu1 %v15410_v9  ;;  %14628 = vmatprep.mubr.msk.f32.mxu1 %vm3920_vm6, %v4263_v58 }
 0x704   :  { %15419 = vmatprep.subr.bf16.mxu1 %v15418_v39  ;;  %v15382_v1 = vpack.c.bf16 %v16040_v51, %v16035_v26  ;;  %v15390_v15 = vpack.c.bf16 %v16043_v48, %v16038_v32  ;;  %v18657_v26 = vld [vmem:[#allocation37_spill] sm:$0xff]  ;;  %v18658_v32 = vld [vmem:[#allocation40_spill] sm:$0xff] }
 0x706   :  { %15383 = vmatprep.subr.bf16.mxu0 %v15382_v1  ;;  %14629 = vmatmul.mubr.msk.f32.vlgmr.msra.gmra.mrb[34].mxu1 %vm3920_vm6, %v4264_v7 }
 0x707   :  { %15385 = vmatpush3.bf16.msra.mxu0 %v15382_v1  ;;  %15421 = vmatpush3.bf16.msra.mxu1 %v15418_v39  ;;  %v18659_v39 = vld [vmem:[#allocation42_spill] sm:$0xff]  ;;  %v16423_v1 = vpop.eup %16422 }
 0x708   :  { %14642 = vmatprep.mubr.msk.f32.mxu1 %vm3920_vm6, %v4267_v12  ;;  %15427 = vmatprep.subr.bf16.mxu1 %v15426_v46  ;;  %v4258_v23 = vmul.f32 %v16423_v1, %v17585_v60 }
 0x709   :  { %15391 = vmatprep.subr.bf16.mxu0 %v15390_v15 }
 0x70a   :  { %14580 = vmatmul.mubr.msk.f32.vlgmr.msra.gmra.mrb[42].mxu0 %vm3920_vm6, %v4250_v35  ;;  %14643 = vmatmul.mubr.msk.f32.vlgmr.msra.gmra.mrb[36].mxu1 %vm3920_vm6, %v4268_v62 }
 0x70b   :  { %15393 = vmatpush3.bf16.msra.mxu0 %v15390_v15  ;;  %14593 = vmatprep.mubr.msk.f32.mxu0 %vm3920_vm6, %v4253_v16 }
 0x70c   :  { %15429 = vmatpush3.bf16.msra.mxu1 %v15426_v46  ;;  %14656 = vmatprep.mubr.msk.f32.mxu1 %vm3920_vm6, %v4271_v27 }
 0x70d   :  { %15431 = vmatprep.subr.bf16.mxu1 %v16985_v43  ;;  %v18638_v43 = vld [vmem:[#allocation29_spill] sm:$0xff] }
 0x70e   :  { %14594 = vmatmul.mubr.msk.f32.vlgmr.msra.gmra.mrb[44].mxu0 %vm3920_vm6, %v4254_v28 }
 0x70f   :  { %14657 = vmatmul.mubr.msk.f32.vlgmr.msra.gmra.mrb[38].mxu1 %vm3920_vm6, %v4272_v47  ;;  %14607 = vmatprep.mubr.msk.f32.mxu0 %vm3920_vm6, %v4257_v24 }
 0x710   :  { %15433 = vmatpush1.bf16.msra.mxu1 %v17014_v37  ;;  %6959 = vmatprep.mubr.f32.mxu1 %v18633_v59  ;;  %v18643_v37 = vld [vmem:[#allocation35_spill] sm:$0xff] }
 0x711   :  { %15435 = vmatprep.subr.bf16.mxu1 %v18634_v4 }
 0x714   :  { %15437 = vmatpush1.bf16.msra.mxu1 %v18635_v25 }
 0x715   :  { %15439 = vmatprep.subr.bf16.mxu1 %v18636_v52 }
 0x718   :  { %15441 = vmatpush1.bf16.msra.mxu1 %v18637_v19 }
 0x719   :  { %15443 = vmatprep.subr.bf16.mxu1 %v18638_v43 }
 0x71c   :  { %15445 = vmatpush1.bf16.msra.mxu1 %v18639_v36 }
 0x71d   :  { %15447 = vmatprep.subr.bf16.mxu1 %v18640_v40 }
 0x71e   :  { %v4175_v42 = vpop.xlane.xlu0 %4174 }
 0x71f   :  { %16424 = vrcp.f32 %v4175_v42 }
 0x720   :  { %15449 = vmatpush1.bf16.msra.mxu1 %v18641_v18  ;;  %v679_v18 = vld [vmem:[#allocation8] sm:$0xff] }
 0x721   :  { %15451 = vmatprep.subr.bf16.mxu1 %v18642_v54 }
 0x722   :  { %v4187_v9 = vpop.xlane.xlu0 %4186 }
 0x724   :  { %15453 = vmatpush1.bf16.msra.mxu1 %v18643_v37  ;;  %v680_v37 = vld [vmem:[#allocation8 + $0x8] sm:$0xff] }
 0x725   :  { %15455 = vmatprep.subr.bf16.mxu1 %v18644_v2 }
 0x726   :  { %v4190_v58 = vpop.xlane.xlu0 %4189 }
 0x728   :  { %15457 = vmatpush1.bf16.msra.mxu1 %v18645_v56  ;;  %v683_v56 = vld [vmem:[#allocation8 + $0x20] sm:$0xff] }
 0x729   :  { %15459 = vmatprep.subr.bf16.mxu1 %v18646_v5  ;;  %v16425_v41 = vpop.eup %16424  ;;  %v684_v5 = vld [vmem:[#allocation8 + $0x28] sm:$0xff] }
 0x72a   :  { %v4261_v46 = vmul.f32 %v16425_v41, %v17622_v55  ;;  %v18660_v41 = vld [vmem:[#allocation50_spill] sm:$0xff] }
 0x72c   :  { %15461 = vmatpush1.bf16.msra.mxu1 %v18647_v45 }
 0x72d   :  { %15463 = vmatprep.subr.bf16.mxu1 %v18650_v22 }
 0x72f   :  { %6960 = vmatmul.mubr.f32.vlgmr.msra.gmra.mrb[40].mxu1 %v17734_v57  ;;  %v4178_v13 = vpop.xlane.xlu1 %4177 }
 0x730   :  { %15465 = vmatpush3.bf16.msra.mxu1 %v18650_v22  ;;  %6965 = vmatprep.mubr.f32.mxu1 %v18633_v59  ;;  %16426 = vrcp.f32 %v4178_v13  ;;  %v685_v13 = vld [vmem:[#allocation8 + $0x30] sm:$0xff] }
 0x731   :  { %15467 = vmatprep.subr.bf16.mxu1 %v18653_v8  ;;  %16428 = vrcp.f32 %v4187_v9 }
 0x732   :  { %16430 = vrcp.f32 %v4190_v58 }
 0x733   :  { %6966 = vmatmul.mubr.f32.gmra.mrb[42].mxu1 %v17741_v38  ;;  %v4202_v10 = vpop.xlane.xlu1 %4201 }
 0x734   :  { %15469 = vmatpush3.bf16.msra.mxu1 %v18653_v8  ;;  %14771 = vmatprep.mubr.f32.mxu1 %v17734_v57 }
 0x735   :  { %15471 = vmatprep.subr.bf16.mxu1 %v18654_v61 }
 0x737   :  { %v4199_v60 = vpop.xlane.xlu1 %4198 }
 0x738   :  { %15473 = vmatpush3.bf16.msra.mxu1 %v18654_v61  ;;  %16432 = vrcp.f32 %v4199_v60  ;;  %v689_v60 = vld [vmem:[#allocation8 + $0x50] sm:$0xff] }
 0x739   :  { %15475 = vmatprep.subr.bf16.mxu1 %v18655_v44  ;;  %16434 = vrcp.f32 %v4202_v10 }
 0x73a   :  { %v16427_v12 = vpop.eup %16426 }
 0x73b   :  { %v16429_v33 = vpop.eup %16428  ;;  %v4262_v62 = vmul.f32 %v16427_v12, %v17639_v20 }
 0x73c   :  { %15477 = vmatpush3.bf16.msra.mxu1 %v18655_v44  ;;  %v4265_v50 = vmul.f32 %v16429_v33, %v17628_v53  ;;  %v16431_v53 = vpop.eup %16430 }
 0x73d   :  { %15479 = vmatprep.subr.bf16.mxu1 %v18656_v31  ;;  %v4266_v43 = vmul.f32 %v16431_v53, %v17634_v21  ;;  %v681_v21 = vld [vmem:[#allocation8 + $0x10] sm:$0xff]  ;;  %v694_v53 = vld [vmem:[#allocation8 + $0x78] sm:$0xff] }
 0x740   :  { %15481 = vmatpush3.bf16.msra.mxu1 %v18656_v31 }
 0x741   :  { %15483 = vmatprep.subr.bf16.mxu1 %v18657_v26 }
 0x742   :  { %v16433_v19 = vpop.eup %16432 }
 0x743   :  { %v16435_v36 = vpop.eup %16434  ;;  %v4269_v40 = vmul.f32 %v16433_v19, %v17650_v17  ;;  %v682_v17 = vld [vmem:[#allocation8 + $0x18] sm:$0xff]  ;;  %v18662_v19 = vld [vmem:[#allocation48_spill] sm:$0xff] }
 0x744   :  { %15485 = vmatpush3.bf16.msra.mxu1 %v18657_v26  ;;  %v4270_v54 = vmul.f32 %v16435_v36, %v17645_v34 }
 0x745   :  { %15487 = vmatprep.subr.bf16.mxu1 %v18658_v32 }
 0x746   :  { %v16046_v30 = vpop.trf.xlu0 }
 0x747   :  { %v16047_v29 = vunpack.i.l.bf16 %v16046_v30  ;;  %v16050_v11 = vunpack.i.h.bf16 %v16046_v30 }
 0x748   :  { %15489 = vmatpush3.bf16.msra.mxu1 %v18658_v32 }
 0x749   :  { %15491 = vmatprep.subr.bf16.mxu1 %v18659_v39 }
 0x74a   :  { %v16051_v14 = vpop.trf.xlu0 }
 0x74b   :  { %v16052_v51 = vunpack.i.l.bf16 %v16051_v14  ;;  %v16055_v48 = vunpack.i.h.bf16 %v16051_v14  ;;  %v687_v14 = vld [vmem:[#allocation8 + $0x40] sm:$0xff] }
 0x74c   :  { %15493 = vmatpush3.bf16.msra.mxu1 %v18659_v39 }
 0x74d   :  { %v15398_v63 = vpack.c.bf16 %v16052_v51, %v16047_v29  ;;  %v15406_v6 = vpack.c.bf16 %v16055_v48, %v16050_v11  ;;  %v686_v11 = vld [vmem:[#allocation8 + $0x38] sm:$0xff]  ;;  %v688_v51 = vld [vmem:[#allocation8 + $0x48] sm:$0xff] }
 0x74e   :  { %v14553_v7 = vpop.f32.mrb[38].mxu0 }
 0x74f   :  { %14772 = vmatmul.mubr.f32.vlgmr.msra.gmra.mrb[44].mxu1 %v17741_v38  ;;  %v4345_v15 = vpop.f32.mrb[39].mxu0  ;;  %15399 = vmatprep.subr.bf16.mxu0 %v15398_v63 }
 0x750   :  { %15401 = vmatpush3.bf16.msra.mxu0 %v15398_v63 }
 0x751   :  { %15407 = vmatprep.subr.bf16.mxu0 %v15406_v6 }
 0x753   :  { %14608 = vmatmul.mubr.msk.f32.vlgmr.msra.gmra.mrb[46].mxu0 %vm3920_vm6, %v4258_v23  ;;  %v18661_v23 = vld [vmem:[#allocation49_spill] sm:$0xff] }
 0x754   :  { %15409 = vmatpush3.bf16.msra.mxu0 %v15406_v6  ;;  %14621 = vmatprep.mubr.msk.f32.mxu0 %vm3920_vm6, %v4261_v46 }
 0x756   :  { %v14560_v35 = vpop.f32.mrb[24].mxu1 }
 0x757   :  { %v4426_v16 = vpop.f32.mrb[25].mxu1  ;;  %14622 = vmatmul.mubr.msk.f32.vlgmr.msra.gmra.mrb[48].mxu0 %vm3920_vm6, %v4262_v62 }
 0x758   :  { %14635 = vmatprep.mubr.msk.f32.mxu0 %vm3920_vm6, %v4265_v50 }
 0x75d   :  { %v16058_v55 = vpop.trf.xlu1  ;;  %v14574_v49 = vpop.f32.mrb[26].mxu1 }
 0x75e   :  { %v4588_v27 = vpop.f32.mrb[27].mxu1  ;;  %v16059_v28 = vunpack.i.l.bf16 %v16058_v55  ;;  %v16062_v47 = vunpack.i.h.bf16 %v16058_v55 }
 0x761   :  { %v16063_v24 = vpop.trf.xlu1 }
 0x762   :  { %v16064_v4 = vunpack.i.l.bf16 %v16063_v24  ;;  %v16067_v20 = vunpack.i.h.bf16 %v16063_v24 }
 0x764   :  { %v15414_v25 = vpack.c.bf16 %v16064_v4, %v16059_v28  ;;  %v15422_v52 = vpack.c.bf16 %v16067_v20, %v16062_v47  ;;  %v691_v28 = vld [vmem:[#allocation8 + $0x60] sm:$0xff]  ;;  %v692_v4 = vld [vmem:[#allocation8 + $0x68] sm:$0xff] }
 0x766   :  { %15415 = vmatprep.subr.bf16.mxu0 %v15414_v25 }
 0x767   :  { %15417 = vmatpush3.bf16.msra.mxu0 %v15414_v25 }
 0x768   :  { %15423 = vmatprep.subr.bf16.mxu0 %v15422_v52 }
 0x76a   :  { %14636 = vmatmul.mubr.msk.f32.vlgmr.msra.gmra.mrb[50].mxu0 %vm3920_vm6, %v4266_v43 }
 0x76b   :  { %15425 = vmatpush3.bf16.msra.mxu0 %v15422_v52  ;;  %14649 = vmatprep.mubr.msk.f32.mxu0 %vm3920_vm6, %v4269_v40  ;;  %v693_v52 = vld [vmem:[#allocation8 + $0x70] sm:$0xff] }
 0x76c   :  { %14659 = vmatprep.subr.mxu0 %v679_v18 }
 0x76e   :  { %14650 = vmatmul.mubr.msk.f32.vlgmr.msra.gmra.mrb[52].mxu0 %vm3920_vm6, %v4270_v54 }
 0x76f   :  { %14661 = vmatprep.mubr.msk.f32.mxu0 %vm2495_vm4, %v4345_v15  ;;  %14660 = vmatpush3.msra.mxu0 %v679_v18 }
 0x770   :  { %14664 = vmatprep.subr.mxu0 %v680_v37 }
 0x772   :  { %14662 = vmatmul.mubr.msk.f32.vlgmr.msra.gmra.mrb[54].mxu0 %vm2495_vm4, %v14553_v7 }
 0x773   :  { %14666 = vmatprep.mubr.msk.f32.mxu0 %vm2495_vm4, %v4426_v16  ;;  %14665 = vmatpush3.msra.mxu0 %v680_v37 }
 0x774   :  { %14669 = vmatprep.subr.mxu0 %v681_v21 }
 0x77a   :  { %14667 = vmatmul.mubr.msk.f32.vlgmr.msra.gmra.mrb[54].mxu0 %vm2495_vm4, %v14560_v35 }
 0x77b   :  { %14670 = vmatpush3.msra.mxu0 %v681_v21 }
 0x77c   :  { %14674 = vmatprep.subr.mxu0 %v682_v17 }
 0x7c0   :  { %v14567_v34 = vpop.f32.mrb[40].mxu0 }
 0x7c1   :  { %v4507_v2 = vpop.f32.mrb[41].mxu0 }
 0x7c2   :  { %14671 = vmatprep.mubr.msk.f32.mxu0 %vm2495_vm4, %v4507_v2 }
 0x7c3   :  { %14672 = vmatmul.mubr.msk.f32.vlgmr.msra.gmra.mrb[54].mxu0 %vm2495_vm4, %v14567_v34 }
 0x7c4   :  { %14676 = vmatprep.mubr.msk.f32.mxu0 %vm2495_vm4, %v4588_v27  ;;  %14675 = vmatpush3.msra.mxu0 %v682_v17  ;;  %v690_v27 = vld [vmem:[#allocation8 + $0x58] sm:$0xff] }
 0x7c5   :  { %14679 = vmatprep.subr.mxu0 %v683_v56 }
 0x7cb   :  { %14677 = vmatmul.mubr.msk.f32.vlgmr.msra.gmra.mrb[54].mxu0 %vm2495_vm4, %v14574_v49 }
 0x7cc   :  { %14680 = vmatpush3.msra.mxu0 %v683_v56 }
 0x7cd   :  { %v14588_v45 = vpop.f32.mrb[28].mxu1  ;;  %14684 = vmatprep.subr.mxu0 %v684_v5 }
 0x7ce   :  { %v4750_v0 = vpop.f32.mrb[29].mxu1 }
 0x7d1   :  { %v14602_v22 = vpop.f32.mrb[30].mxu1 }
 0x7d2   :  { %v4912_v3 = vpop.f32.mrb[31].mxu1 }
 0x7d5   :  { %v14616_v8 = vpop.f32.mrb[32].mxu1 }
 0x7d6   :  { %v5074_v61 = vpop.f32.mrb[33].mxu1 }
 0x7d9   :  { %v17783_v42 = vpop.f32.mrb[34].mxu1 }
 0x7da   :  { %v5236_v44 = vpop.f32.mrb[35].mxu1 }
 0x7dd   :  { %v14581_v9 = vpop.f32.mrb[42].mxu0  ;;  %v17785_v31 = vpop.f32.mrb[36].mxu1 }
 0x7de   :  { %v4669_v26 = vpop.f32.mrb[43].mxu0  ;;  %v17787_v58 = vpop.f32.mrb[37].mxu1 }
 0x7df   :  { %14681 = vmatprep.mubr.msk.f32.mxu0 %vm2495_vm4, %v4669_v26 }
 0x7e0   :  { %14682 = vmatmul.mubr.msk.f32.vlgmr.msra.gmra.mrb[54].mxu0 %vm2495_vm4, %v14581_v9 }
 0x7e1   :  { %v14595_v32 = vpop.f32.mrb[44].mxu0  ;;  %14686 = vmatprep.mubr.msk.f32.mxu0 %vm2495_vm4, %v4750_v0  ;;  %14685 = vmatpush3.msra.mxu0 %v684_v5 }
 0x7e2   :  { %v17792_v30 = vpop.f32.mrb[38].mxu1  ;;  %v4831_v39 = vpop.f32.mrb[45].mxu0  ;;  %14689 = vmatprep.subr.mxu0 %v685_v13 }
 0x7e3   :  { %v17794_v29 = vpop.f32.mrb[39].mxu1 }
 0x7e8   :  { %14687 = vmatmul.mubr.msk.f32.vlgmr.msra.gmra.mrb[54].mxu0 %vm2495_vm4, %v14588_v45 }
 0x7e9   :  { %14691 = vmatprep.mubr.msk.f32.mxu0 %vm2495_vm4, %v4831_v39  ;;  %14690 = vmatpush3.msra.mxu0 %v685_v13 }
 0x7ea   :  { %14694 = vmatprep.subr.mxu0 %v686_v11 }
 0x7f0   :  { %14692 = vmatmul.mubr.msk.f32.vlgmr.msra.gmra.mrb[54].mxu0 %vm2495_vm4, %v14595_v32 }
 0x7f1   :  { %14696 = vmatprep.mubr.msk.f32.mxu0 %vm2495_vm4, %v4912_v3  ;;  %14695 = vmatpush3.msra.mxu0 %v686_v11 }
 0x7f2   :  { %14699 = vmatprep.subr.mxu0 %v687_v14 }
 0x7f8   :  { %14697 = vmatmul.mubr.msk.f32.vlgmr.msra.gmra.mrb[54].mxu0 %vm2495_vm4, %v14602_v22 }
 0x7f9   :  { %14700 = vmatpush3.msra.mxu0 %v687_v14 }
 0x7fa   :  { %14704 = vmatprep.subr.mxu0 %v688_v51 }
 0x802   :  { %v6961_v48 = vpop.f32.mrb[40].mxu1 }
 0x803   :  { %v6963_v63 = vpop.f32.mrb[41].mxu1  ;;  %v6962_v43 = vadd.f32 %v6961_v48, %v18662_v19 }
 0x804   :  { %v6964_v33 = vadd.f32 %v6963_v63, %v18660_v41 }
 0x806   :  { %v6967_v6 = vpop.f32.mrb[42].mxu1 }
 0x807   :  { %v6969_v1 = vpop.f32.mrb[43].mxu1  ;;  %v6968_v36 = vadd.f32 %v6967_v6, %v18662_v19 }
 0x808   :  { %v6970_v15 = vadd.f32 %v6969_v1, %v18660_v41 }
 0x822   :  { %v14773_v7 = vpop.f32.mrb[44].mxu1 }
 0x823   :  { %v7044_v12 = vadd.f32 %v14773_v7, %v18661_v23  ;;  %v7038_v46 = vpop.f32.mrb[45].mxu1 }
 0x824   :  { %v7039_v10 = vadd.f32 %v7038_v46, %v18661_v23 }
 0x825   :  { %v16070_v62 = vpack.i.bf16 %v7044_v12, %v6970_v15 }
 0x826   :  { %v16068_v35 = vpack.i.bf16 %v7039_v10, %v6964_v33  ;;  %v14609_v50 = vpop.f32.mrb[46].mxu0 }
 0x827   :  { %v4993_v16 = vpop.f32.mrb[47].mxu0 }
 0x828   :  { %16069 = vxpose.xlu0.b32.start [1/2] (short) %v16068_v35, 128  ;;  %14701 = vmatprep.mubr.msk.f32.mxu0 %vm2495_vm4, %v4993_v16 }
 0x829   :  { %14702 = vmatmul.mubr.msk.f32.vlgmr.msra.gmra.mrb[54].mxu0 %vm2495_vm4, %v14609_v50 }
 0x82a   :  { %v14623_v55 = vpop.f32.mrb[48].mxu0  ;;  %14706 = vmatprep.mubr.msk.f32.mxu0 %vm2495_vm4, %v5074_v61  ;;  %14705 = vmatpush3.msra.mxu0 %v688_v51 }
 0x82b   :  { %v5155_v49 = vpop.f32.mrb[49].mxu0  ;;  %14709 = vmatprep.subr.mxu0 %v689_v60 }
 0x82c   :  { %16071 = vxpose.xlu0.b32.end [2/2] (short) %v16070_v62, 128 }
 0x831   :  { %14707 = vmatmul.mubr.msk.f32.vlgmr.msra.gmra.mrb[54].mxu0 %vm2495_vm4, %v14616_v8 }
 0x832   :  { %14711 = vmatprep.mubr.msk.f32.mxu0 %vm2495_vm4, %v5155_v49  ;;  %14710 = vmatpush3.msra.mxu0 %v689_v60 }
 0x833   :  { %14714 = vmatprep.subr.mxu0 %v690_v27 }
 0x839   :  { %14712 = vmatmul.mubr.msk.f32.vlgmr.msra.gmra.mrb[54].mxu0 %vm2495_vm4, %v14623_v55 }
 0x83a   :  { %14716 = vmatprep.mubr.msk.f32.mxu0 %vm2495_vm4, %v5236_v44  ;;  %14715 = vmatpush3.msra.mxu0 %v690_v27 }
 0x83b   :  { %14719 = vmatprep.subr.mxu0 %v691_v28 }
 0x83d   :  { %v14637_v47 = vpop.f32.mrb[50].mxu0 }
 0x83e   :  { %v5317_v24 = vpop.f32.mrb[51].mxu0 }
 0x841   :  { %v14651_v20 = vpop.f32.mrb[52].mxu0  ;;  %14717 = vmatmul.mubr.msk.f32.vlgmr.msra.gmra.mrb[54].mxu0 %vm2495_vm4, %v17783_v42 }
 0x842   :  { %v5479_v25 = vpop.f32.mrb[53].mxu0  ;;  %14721 = vmatprep.mubr.msk.f32.mxu0 %vm2495_vm4, %v5317_v24  ;;  %14720 = vmatpush3.msra.mxu0 %v691_v28 }
 0x843   :  { %14724 = vmatprep.subr.mxu0 %v692_v4 }
 0x849   :  { %14722 = vmatmul.mubr.msk.f32.vlgmr.msra.gmra.mrb[54].mxu0 %vm2495_vm4, %v14637_v47 }
 0x84a   :  { %14726 = vmatprep.mubr.msk.f32.mxu0 %vm2495_vm4, %v17787_v58  ;;  %14725 = vmatpush3.msra.mxu0 %v692_v4 }
 0x84b   :  { %14729 = vmatprep.subr.mxu0 %v693_v52 }
 0x851   :  { %14727 = vmatmul.mubr.msk.f32.vlgmr.msra.gmra.mrb[54].mxu0 %vm2495_vm4, %v17785_v31 }
 0x852   :  { %14731 = vmatprep.mubr.msk.f32.mxu0 %vm2495_vm4, %v5479_v25  ;;  %14730 = vmatpush3.msra.mxu0 %v693_v52 }
 0x853   :  { %14734 = vmatprep.subr.mxu0 %v694_v53 }
 0x859   :  { %14732 = vmatmul.mubr.msk.f32.vlgmr.msra.gmra.mrb[54].mxu0 %vm2495_vm4, %v14651_v20 }
 0x85a   :  { %14736 = vmatprep.mubr.msk.f32.mxu0 %vm2495_vm4, %v17794_v29  ;;  %14735 = vmatpush3.msra.mxu0 %v694_v53 }
 0x861   :  { %14737 = vmatmul.mubr.msk.f32.vlgmr.msra.gmra.mrb[54].mxu0 %vm2495_vm4, %v17792_v30 }
 0x865   :  { %7047 = vxpose.xlu0.b32.start [1/2] (short) %v6962_v43, 128 }
 0x869   :  { %7048 = vxpose.xlu0.b32.end [2/2] (short) %v6968_v36, 128 }
 0x8a8   :  { %v17828_v40 = vpop.trf.xlu0 }
 0x8a9   :  { %v16073_v37 = vunpack.i.l.bf16 %v17828_v40 }
 0x8ac   :  { %v17830_v18 = vpop.trf.xlu0 }
 0x8ad   :  { %v16078_v54 = vunpack.i.l.bf16 %v17830_v18 }
 0x8af   :  { %v16152_v21 = vpack.i.bf16 %v16078_v54, %v16073_v37 }
 0x8b0   :  { %v16082_v17 = vpop.trf.xlu0 }
 0x8b1   :  { %16153 = vxpose.xlu1.b32.start.end [1/1] (short) (narrow) %v16152_v21, 16  ;;  %v16083_v58 = vunpack.i.l.bf16 %v16082_v17  ;;  %v16086_v27 = vunpack.i.h.bf16 %v16082_v17 }
 0x8b4   :  { %v16087_v34 = vpop.trf.xlu0 }
 0x8b5   :  { %v16088_v26 = vunpack.i.l.bf16 %v16087_v34  ;;  %v16091_v55 = vunpack.i.h.bf16 %v16087_v34 }
 0x8b7   :  { %v16164_v32 = vpack.i.bf16 %v16088_v26, %v16083_v58  ;;  %v16260_v47 = vpack.i.bf16 %v16091_v55, %v16086_v27 }
 0x8b8   :  { %v17834_v2 = vpop.trf.xlu0 }
 0x8b9   :  { %v16093_v14 = vunpack.i.l.bf16 %v17834_v2 }
 0x8bc   :  { %v17836_v56 = vpop.trf.xlu0 }
 0x8bd   :  { %v16098_v29 = vunpack.i.l.bf16 %v17836_v56 }
 0x8bf   :  { %v16176_v51 = vpack.i.bf16 %v16098_v29, %v16093_v14  ;;  %v16101_v29 = vunpack.i.h.bf16 %v17836_v56 }
 0x8c0   :  { %v17838_v5 = vpop.trf.xlu0 }
 0x8c1   :  { %v16103_v41 = vunpack.i.l.bf16 %v17838_v5 }
 0x8c4   :  { %v17840_v45 = vpop.trf.xlu0 }
 0x8c5   :  { %v16108_v1 = vunpack.i.l.bf16 %v17840_v45 }
 0x8c7   :  { %v16188_v15 = vpack.i.bf16 %v16108_v1, %v16103_v41 }
 0x8c8   :  { %v17842_v0 = vpop.trf.xlu0 }
 0x8c9   :  { %v16113_v33 = vunpack.i.l.bf16 %v17842_v0 }
 0x8cc   :  { %v17844_v22 = vpop.trf.xlu0 }
 0x8cd   :  { %v16118_v46 = vunpack.i.l.bf16 %v17844_v22 }
 0x8cf   :  { %v16200_v62 = vpack.i.bf16 %v16118_v46, %v16113_v33 }
 0x8d0   :  { %v17846_v3 = vpop.trf.xlu0 }
 0x8d1   :  { %v16123_v49 = vunpack.i.l.bf16 %v17846_v3 }
 0x8d4   :  { %v17848_v8 = vpop.trf.xlu0 }
 0x8d5   :  { %v16128_v16 = vunpack.i.l.bf16 %v17848_v8 }
 0x8d7   :  { %v16212_v28 = vpack.i.bf16 %v16128_v16, %v16123_v49 }
 0x8d8   :  { %v17850_v61 = vpop.trf.xlu0 }
 0x8d9   :  { %v16133_v4 = vunpack.i.l.bf16 %v17850_v61 }
 0x8dc   :  { %v17852_v42 = vpop.trf.xlu0 }
 0x8dd   :  { %v16138_v24 = vunpack.i.l.bf16 %v17852_v42 }
 0x8df   :  { %v16224_v25 = vpack.i.bf16 %v16138_v24, %v16133_v4 }
 0x8e0   :  { %v17854_v44 = vpop.trf.xlu0 }
 0x8e1   :  { %v16143_v26 = vunpack.i.l.bf16 %v17854_v44 }
 0x8e4   :  { %v17856_v9 = vpop.trf.xlu0 }
 0x8e8   :  { %v7063_v31 = vpop.trf.xlu0 }
 0x8e9   :  { %7143 = vxpose.xlu1.b32.start.end [1/1] (short) (narrow) %v7063_v31, 16  ;;  %v16148_v31 = vunpack.i.l.bf16 %v17856_v9 }
 0x8eb   :  { %v16236_v58 = vpack.i.bf16 %v16148_v31, %v16143_v26 }
 0x8ec   :  { %v7064_v13 = vpop.trf.xlu0 }
 0x8ee   :  { %16165 = vxpose.xlu1.b32.start.end [1/1] (short) (narrow) %v16164_v32, 16  ;;  %v16081_v32 = vunpack.i.h.bf16 %v17830_v18 }
 0x8f0   :  { %v7065_v30 = vpop.trf.xlu0 }
 0x8f3   :  { %7175 = vxpose.xlu1.b32.start.end [1/1] (short) (narrow) %v7064_v13, 16 }
 0x8f4   :  { %v7066_v39 = vpop.trf.xlu0 }
 0x8f8   :  { %7207 = vxpose.xlu1.b32.start.end [1/1] (short) (narrow) %v7065_v30, 16  ;;  %v7067_v11 = vpop.trf.xlu0  ;;  %v16076_v30 = vunpack.i.h.bf16 %v17828_v40 }
 0x8fc   :  { %v7068_v48 = vpop.trf.xlu0 }
 0x8fd   :  { %16177 = vxpose.xlu1.b32.start.end [1/1] (short) (narrow) %v16176_v51, 16 }
 0x900   :  { %v7069_v63 = vpop.trf.xlu0 }
 0x901   :  { %7335 = vxpose.xlu0.b32.start.end [1/1] (short) (narrow) %v7069_v63, 16 }
 0x902   :  { %7239 = vxpose.xlu1.b32.start.end [1/1] (short) (narrow) %v7066_v39, 16  ;;  %v16248_v39 = vpack.i.bf16 %v16081_v32, %v16076_v30 }
 0x904   :  { %v7070_v6 = vpop.trf.xlu0 }
 0x907   :  { %7271 = vxpose.xlu1.b32.start.end [1/1] (short) (narrow) %v7067_v11, 16  ;;  %v16096_v11 = vunpack.i.h.bf16 %v17834_v2 }
 0x908   :  { %v7071_v7 = vpop.trf.xlu0 }
 0x909   :  { %v16272_v14 = vpack.i.bf16 %v16101_v29, %v16096_v11 }
 0x90c   :  { %16189 = vxpose.xlu1.b32.start.end [1/1] (short) (narrow) %v16188_v15, 16  ;;  %v7072_v23 = vpop.trf.xlu0 }
 0x910   :  { %v7073_v12 = vpop.trf.xlu0 }
 0x911   :  { %7303 = vxpose.xlu1.b32.start.end [1/1] (short) (narrow) %v7068_v48, 16 }
 0x914   :  { %v7074_v10 = vpop.trf.xlu0 }
 0x916   :  { %16201 = vxpose.xlu1.b32.start.end [1/1] (short) (narrow) %v16200_v62, 16 }
 0x918   :  { %v7075_v35 = vpop.trf.xlu0 }
 0x91b   :  { %7367 = vxpose.xlu1.b32.start.end [1/1] (short) (narrow) %v7070_v6, 16 }
 0x91c   :  { %v7076_v50 = vpop.trf.xlu0 }
 0x920   :  { %7399 = vxpose.xlu1.b32.start.end [1/1] (short) (narrow) %v7071_v7, 16  ;;  %v7077_v60 = vpop.trf.xlu0 }
 0x921   :  { %7591 = vxpose.xlu0.b32.start.end [1/1] (short) (narrow) %v7077_v60, 16 }
 0x924   :  { %v7078_v13 = vpop.trf.xlu0 }
 0x925   :  { %16213 = vxpose.xlu1.b32.start.end [1/1] (short) (narrow) %v16212_v28, 16 }
 0x926   :  { %16261 = vxpose.xlu0.b32.start.end [1/1] (short) (narrow) %v16260_v47, 16 }
 0x92a   :  { %7431 = vxpose.xlu1.b32.start.end [1/1] (short) (narrow) %v7072_v23, 16 }
 0x92f   :  { %7463 = vxpose.xlu1.b32.start.end [1/1] (short) (narrow) %v7073_v12, 16 }
 0x931   :  { %v16154_v20 = vpop.trf.xlu1 }
 0x932   :  { %v16158_v53 = vunpack.i.h.bf16 %v16154_v20  ;;  %v16155_v43 = vunpack.i.l.bf16 %v16154_v20 }
 0x934   :  { %16225 = vxpose.xlu1.b32.start.end [1/1] (short) (narrow) %v16224_v25, 16  ;;  %v17868_v52 = vpop.f32.mrb[54].mxu0 }
 0x935   :  { %18663 = vst [vmem:[#allocation26_spill] sm:$0xff] %v17868_v52  ;;  %v17870_v19 = vpop.f32.mrb[55].mxu0  ;;  %v16159_v36 = vpop.trf.xlu1 }
 0x936   :  { %v16163_v54 = vunpack.i.h.bf16 %v16159_v36  ;;  %v16160_v37 = vunpack.i.l.bf16 %v16159_v36 }
 0x938   :  { %v15500_v21 = vpack.c.bf16 %v16163_v54, %v16158_v53  ;;  %v15494_v17 = vpack.c.bf16 %v16160_v37, %v16155_v43 }
 0x939   :  { %7495 = vxpose.xlu1.b32.start.end [1/1] (short) (narrow) %v7074_v10, 16 }
 0x93a   :  { %15502 = vmatprep.subr.msk.bf16.mxu1 %vm17190_vm5, %v15500_v21  ;;  %15496 = vmatprep.subr.msk.bf16.mxu0 %vm17190_vm5, %v15494_v17 }
 0x93b   :  { %15505 = vmatpush3.bf16.xpose.msk.msra.mxu1 %vm17190_vm5, %v15500_v21  ;;  %15499 = vmatpush3.bf16.xpose.msk.msra.mxu0 %vm17190_vm5, %v15494_v17 }
 0x93e   :  { %7527 = vxpose.xlu1.b32.start.end [1/1] (short) (narrow) %v7075_v35, 16 }
 0x943   :  { %16237 = vxpose.xlu1.b32.start.end [1/1] (short) (narrow) %v16236_v58, 16 }
 0x948   :  { %7559 = vxpose.xlu1.b32.start.end [1/1] (short) (narrow) %v7076_v50, 16 }
 0x94d   :  { %7623 = vxpose.xlu1.b32.start.end [1/1] (short) (narrow) %v7078_v13, 16 }
 0x952   :  { %16249 = vxpose.xlu1.b32.start.end [1/1] (short) (narrow) %v16248_v39, 16 }
 0x957   :  { %16273 = vxpose.xlu1.b32.start.end [1/1] (short) (narrow) %v16272_v14, 16 }
 0x969   :  { %v7159_v51 = vpop.trf.xlu1 }
 0x96a   :  { %14778 = vmatprep.mubr.msk.f32.mxu0 %vm2495_vm4, %v7159_v51 }
 0x96d   :  { %v7160_v48 = vpop.trf.xlu1 }
 0x96e   :  { %14779 = vmatmul.mubr.msk.f32.vlgmr.msra.gmra.mrb[56].mxu0 %vm2495_vm4, %v7160_v48 }
 0x971   :  { %v16166_v63 = vpop.trf.xlu1 }
 0x972   :  { %v16170_v6 = vunpack.i.h.bf16 %v16166_v63  ;;  %v16167_v18 = vunpack.i.l.bf16 %v16166_v63 }
 0x975   :  { %v16171_v1 = vpop.trf.xlu1 }
 0x976   :  { %v16175_v7 = vunpack.i.h.bf16 %v16171_v1  ;;  %v16172_v40 = vunpack.i.l.bf16 %v16171_v1 }
 0x978   :  { %v15506_v41 = vpack.c.bf16 %v16172_v40, %v16167_v18  ;;  %v15512_v15 = vpack.c.bf16 %v16175_v7, %v16170_v6 }
 0x979   :  { %v7191_v56 = vpop.trf.xlu1 }
 0x97a   :  { %14785 = vmatprep.mubr.msk.f32.mxu1 %vm2495_vm4, %v7191_v56  ;;  %15508 = vmatprep.subr.msk.bf16.mxu0 %vm17190_vm5, %v15506_v41 }
 0x97b   :  { %15514 = vmatprep.subr.msk.bf16.mxu1 %vm17190_vm5, %v15512_v15  ;;  %15511 = vmatpush3.bf16.xpose.msk.msra.mxu0 %vm17190_vm5, %v15506_v41 }
 0x97d   :  { %v7192_v2 = vpop.trf.xlu1 }
 0x97e   :  { %14786 = vmatmul.mubr.msk.f32.vlgmr.msra.gmra.mrb[46].mxu1 %vm2495_vm4, %v7192_v2 }
 0x97f   :  { %15517 = vmatpush3.bf16.xpose.msk.msra.mxu1 %vm17190_vm5, %v15512_v15 }
 0x981   :  { %v7223_v23 = vpop.trf.xlu1  ;;  %v7351_v28 = vpop.trf.xlu0 }
 0x982   :  { %14792 = vmatprep.mubr.msk.f32.mxu0 %vm2495_vm4, %v7223_v23 }
 0x985   :  { %v7224_v12 = vpop.trf.xlu1  ;;  %v7352_v17 = vpop.trf.xlu0 }
 0x986   :  { %14793 = vmatmul.mubr.msk.f32.vlgmr.msra.gmra.mrb[58].mxu0 %vm2495_vm4, %v7224_v12 }
 0x989   :  { %v16178_v46 = vpop.trf.xlu1 }
 0x98a   :  { %v16182_v33 = vunpack.i.h.bf16 %v16178_v46  ;;  %v16179_v10 = vunpack.i.l.bf16 %v16178_v46 }
 0x98d   :  { %v16183_v62 = vpop.trf.xlu1 }
 0x98e   :  { %v16187_v35 = vunpack.i.h.bf16 %v16183_v62  ;;  %v16184_v50 = vunpack.i.l.bf16 %v16183_v62 }
 0x990   :  { %v15518_v16 = vpack.c.bf16 %v16184_v50, %v16179_v10  ;;  %v15524_v60 = vpack.c.bf16 %v16187_v35, %v16182_v33 }
 0x991   :  { %v7255_v55 = vpop.trf.xlu1 }
 0x992   :  { %14799 = vmatprep.mubr.msk.f32.mxu1 %vm2495_vm4, %v7255_v55  ;;  %15520 = vmatprep.subr.msk.bf16.mxu0 %vm17190_vm5, %v15518_v16 }
 0x993   :  { %15526 = vmatprep.subr.msk.bf16.mxu1 %vm17190_vm5, %v15524_v60  ;;  %15523 = vmatpush3.bf16.xpose.msk.msra.mxu0 %vm17190_vm5, %v15518_v16 }
 0x995   :  { %v7256_v49 = vpop.trf.xlu1 }
 0x996   :  { %14800 = vmatmul.mubr.msk.f32.vlgmr.msra.gmra.mrb[48].mxu1 %vm2495_vm4, %v7256_v49 }
 0x997   :  { %15529 = vmatpush3.bf16.xpose.msk.msra.mxu1 %vm17190_vm5, %v15524_v60 }
 0x999   :  { %v7287_v27 = vpop.trf.xlu1 }
 0x99a   :  { %14806 = vmatprep.mubr.msk.f32.mxu0 %vm2495_vm4, %v7287_v27 }
 0x99d   :  { %v7288_v47 = vpop.trf.xlu1 }
 0x99e   :  { %14807 = vmatmul.mubr.msk.f32.vlgmr.msra.gmra.mrb[60].mxu0 %vm2495_vm4, %v7288_v47 }
 0x99f   :  { %14820 = vmatprep.mubr.msk.f32.mxu0 %vm2495_vm4, %v7351_v28 }
 0x9a1   :  { %v16190_v24 = vpop.trf.xlu1  ;;  %v7607_v47 = vpop.trf.xlu0 }
 0x9a2   :  { %v16194_v4 = vunpack.i.h.bf16 %v16190_v24  ;;  %v16191_v20 = vunpack.i.l.bf16 %v16190_v24 }
 0x9a5   :  { %v16195_v25 = vpop.trf.xlu1 }
 0x9a6   :  { %v16199_v53 = vunpack.i.h.bf16 %v16195_v25  ;;  %v16196_v43 = vunpack.i.l.bf16 %v16195_v25 }
 0x9a8   :  { %v15530_v36 = vpack.c.bf16 %v16196_v43, %v16191_v20  ;;  %v15536_v54 = vpack.c.bf16 %v16199_v53, %v16194_v4 }
 0x9a9   :  { %v7319_v37 = vpop.trf.xlu1 }
 0x9aa   :  { %14813 = vmatprep.mubr.msk.f32.mxu1 %vm2495_vm4, %v7319_v37  ;;  %15532 = vmatprep.subr.msk.bf16.mxu0 %vm17190_vm5, %v15530_v36 }
 0x9ab   :  { %15538 = vmatprep.subr.msk.bf16.mxu1 %vm17190_vm5, %v15536_v54  ;;  %15535 = vmatpush3.bf16.xpose.msk.msra.mxu0 %vm17190_vm5, %v15530_v36 }
 0x9ad   :  { %v7320_v21 = vpop.trf.xlu1 }
 0x9ae   :  { %14814 = vmatmul.mubr.msk.f32.vlgmr.msra.gmra.mrb[50].mxu1 %vm2495_vm4, %v7320_v21 }
 0x9af   :  { %15541 = vmatpush3.bf16.xpose.msk.msra.mxu1 %vm17190_vm5, %v15536_v54 }
 0x9b1   :  { %v16202_v31 = vpop.trf.xlu1 }
 0x9b2   :  { %14821 = vmatmul.mubr.msk.f32.vlgmr.msra.gmra.mrb[62].mxu0 %vm2495_vm4, %v7352_v17  ;;  %v16206_v26 = vunpack.i.h.bf16 %v16202_v31  ;;  %v16203_v58 = vunpack.i.l.bf16 %v16202_v31  ;;  %v7608_v17 = vpop.trf.xlu0 }
 0x9b5   :  { %v16207_v13 = vpop.trf.xlu1 }
 0x9b6   :  { %v16211_v32 = vunpack.i.h.bf16 %v16207_v13  ;;  %v16208_v30 = vunpack.i.l.bf16 %v16207_v13 }
 0x9b8   :  { %v15542_v39 = vpack.c.bf16 %v16208_v30, %v16203_v58  ;;  %v15548_v29 = vpack.c.bf16 %v16211_v32, %v16206_v26 }
 0x9b9   :  { %v7383_v11 = vpop.trf.xlu1 }
 0x9ba   :  { %14827 = vmatprep.mubr.msk.f32.mxu1 %vm2495_vm4, %v7383_v11  ;;  %15544 = vmatprep.subr.msk.bf16.mxu0 %vm17190_vm5, %v15542_v39 }
 0x9bb   :  { %15547 = vmatpush3.bf16.xpose.msk.msra.mxu0 %vm17190_vm5, %v15542_v39  ;;  %15550 = vmatprep.subr.msk.bf16.mxu1 %vm17190_vm5, %v15548_v29 }
 0x9bd   :  { %v7384_v14 = vpop.trf.xlu1 }
 0x9be   :  { %14828 = vmatmul.mubr.msk.f32.vlgmr.msra.gmra.mrb[52].mxu1 %vm2495_vm4, %v7384_v14 }
 0x9bf   :  { %15553 = vmatpush3.bf16.xpose.msk.msra.mxu1 %vm17190_vm5, %v15548_v29 }
 0x9c1   :  { %v7415_v51 = vpop.trf.xlu1 }
 0x9c2   :  { %14834 = vmatprep.mubr.msk.f32.mxu0 %vm2495_vm4, %v7415_v51  ;;  %v17986_v51 = vpop.trf.xlu0 }
 0x9c5   :  { %v7416_v48 = vpop.trf.xlu1 }
 0x9c6   :  { %14835 = vmatmul.mubr.msk.f32.vlgmr.msra.gmra.mrb[64].mxu0 %vm2495_vm4, %v7416_v48 }
 0x9c9   :  { %v16214_v63 = vpop.trf.xlu1 }
 0x9ca   :  { %v16218_v6 = vunpack.i.h.bf16 %v16214_v63  ;;  %v16215_v18 = vunpack.i.l.bf16 %v16214_v63  ;;  %v17990_v63 = vpop.trf.xlu0 }
 0x9cd   :  { %v16219_v1 = vpop.trf.xlu1 }
 0x9ce   :  { %v16223_v7 = vunpack.i.h.bf16 %v16219_v1  ;;  %v16220_v40 = vunpack.i.l.bf16 %v16219_v1 }
 0x9d0   :  { %v15554_v41 = vpack.c.bf16 %v16220_v40, %v16215_v18  ;;  %v15560_v15 = vpack.c.bf16 %v16223_v7, %v16218_v6 }
 0x9d1   :  { %v7447_v56 = vpop.trf.xlu1 }
 0x9d2   :  { %14841 = vmatprep.mubr.msk.f32.mxu1 %vm2495_vm4, %v7447_v56  ;;  %15556 = vmatprep.subr.msk.bf16.mxu0 %vm17190_vm5, %v15554_v41 }
 0x9d3   :  { %15559 = vmatpush3.bf16.xpose.msk.msra.mxu0 %vm17190_vm5, %v15554_v41  ;;  %15562 = vmatprep.subr.msk.bf16.mxu1 %vm17190_vm5, %v15560_v15 }
 0x9d5   :  { %v7448_v2 = vpop.trf.xlu1 }
 0x9d6   :  { %14842 = vmatmul.mubr.msk.f32.vlgmr.msra.gmra.mrb[54].mxu1 %vm2495_vm4, %v7448_v2 }
 0x9d7   :  { %15565 = vmatpush3.bf16.xpose.msk.msra.mxu1 %vm17190_vm5, %v15560_v15 }
 0x9d9   :  { %v7479_v23 = vpop.trf.xlu1 }
 0x9da   :  { %14848 = vmatprep.mubr.msk.f32.mxu0 %vm2495_vm4, %v7479_v23 }
 0x9dd   :  { %v7480_v12 = vpop.trf.xlu1 }
 0x9de   :  { %14849 = vmatmul.mubr.msk.f32.vlgmr.msra.gmra.mrb[66].mxu0 %vm2495_vm4, %v7480_v12 }
 0x9e1   :  { %v16226_v46 = vpop.trf.xlu1 }
 0x9e2   :  { %v16230_v33 = vunpack.i.h.bf16 %v16226_v46  ;;  %v16227_v10 = vunpack.i.l.bf16 %v16226_v46 }
 0x9e5   :  { %v16231_v62 = vpop.trf.xlu1 }
 0x9e6   :  { %v16235_v35 = vunpack.i.h.bf16 %v16231_v62  ;;  %v16232_v50 = vunpack.i.l.bf16 %v16231_v62 }
 0x9e8   :  { %v15566_v16 = vpack.c.bf16 %v16232_v50, %v16227_v10  ;;  %v15572_v60 = vpack.c.bf16 %v16235_v35, %v16230_v33 }
 0x9e9   :  { %v7511_v55 = vpop.trf.xlu1 }
 0x9ea   :  { %14855 = vmatprep.mubr.msk.f32.mxu1 %vm2495_vm4, %v7511_v55  ;;  %15568 = vmatprep.subr.msk.bf16.mxu0 %vm17190_vm5, %v15566_v16 }
 0x9eb   :  { %15571 = vmatpush3.bf16.xpose.msk.msra.mxu0 %vm17190_vm5, %v15566_v16  ;;  %15574 = vmatprep.subr.msk.bf16.mxu1 %vm17190_vm5, %v15572_v60 }
 0x9ed   :  { %v7512_v49 = vpop.trf.xlu1 }
 0x9ee   :  { %14856 = vmatmul.mubr.msk.f32.vlgmr.msra.gmra.mrb[56].mxu1 %vm2495_vm4, %v7512_v49 }
 0x9ef   :  { %15577 = vmatpush3.bf16.xpose.msk.msra.mxu1 %vm17190_vm5, %v15572_v60 }
 0x9f1   :  { %v7543_v27 = vpop.trf.xlu1 }
 0x9f2   :  { %14862 = vmatprep.mubr.msk.f32.mxu0 %vm2495_vm4, %v7543_v27 }
 0x9f5   :  { %v7544_v28 = vpop.trf.xlu1 }
 0x9f6   :  { %14863 = vmatmul.mubr.msk.f32.vlgmr.msra.gmra.mrb[68].mxu0 %vm2495_vm4, %v7544_v28 }
 0x9f7   :  { %14876 = vmatprep.mubr.msk.f32.mxu0 %vm2495_vm4, %v7607_v47 }
 0x9f9   :  { %v16238_v24 = vpop.trf.xlu1 }
 0x9fa   :  { %v16242_v4 = vunpack.i.h.bf16 %v16238_v24  ;;  %v16239_v20 = vunpack.i.l.bf16 %v16238_v24 }
 0x9fd   :  { %v16243_v25 = vpop.trf.xlu1 }
 0x9fe   :  { %v16247_v53 = vunpack.i.h.bf16 %v16243_v25  ;;  %v16244_v43 = vunpack.i.l.bf16 %v16243_v25 }
 0xa00   :  { %v15578_v36 = vpack.c.bf16 %v16244_v43, %v16239_v20  ;;  %v15584_v54 = vpack.c.bf16 %v16247_v53, %v16242_v4 }
 0xa01   :  { %v7575_v37 = vpop.trf.xlu1 }
 0xa02   :  { %14869 = vmatprep.mubr.msk.f32.mxu1 %vm2495_vm4, %v7575_v37  ;;  %15580 = vmatprep.subr.msk.bf16.mxu0 %vm17190_vm5, %v15578_v36 }
 0xa03   :  { %15583 = vmatpush3.bf16.xpose.msk.msra.mxu0 %vm17190_vm5, %v15578_v36  ;;  %15586 = vmatprep.subr.msk.bf16.mxu1 %vm17190_vm5, %v15584_v54 }
 0xa05   :  { %v7576_v21 = vpop.trf.xlu1 }
 0xa06   :  { %14870 = vmatmul.mubr.msk.f32.vlgmr.msra.gmra.mrb[58].mxu1 %vm2495_vm4, %v7576_v21 }
 0xa07   :  { %15589 = vmatpush3.bf16.xpose.msk.msra.mxu1 %vm17190_vm5, %v15584_v54 }
 0xa09   :  { %v7639_v31 = vpop.trf.xlu1 }
 0xa0a   :  { %14877 = vmatmul.mubr.msk.f32.vlgmr.msra.gmra.mrb[70].mxu0 %vm2495_vm4, %v7608_v17  ;;  %14883 = vmatprep.mubr.msk.f32.mxu1 %vm2495_vm4, %v7639_v31 }
 0xa0d   :  { %v7640_v26 = vpop.trf.xlu1 }
 0xa0e   :  { %14884 = vmatmul.mubr.msk.f32.vlgmr.msra.gmra.mrb[60].mxu1 %vm2495_vm4, %v7640_v26 }
 0xa11   :  { %v17976_v30 = vpop.trf.xlu1 }
 0xa15   :  { %v16255_v11 = vpop.trf.xlu1 }
 0xa16   :  { %v16256_v26 = vunpack.i.l.bf16 %v16255_v11 }
 0xa19   :  { %v17984_v14 = vpop.trf.xlu1 }
 0xa1d   :  { %v17988_v48 = vpop.trf.xlu1 }
 0xa41   :  { %v14780_v58 = vpop.f32.mrb[56].mxu0 }
 0xa42   :  { %v17974_v13 = vmul.f32 0.35355338, %v14780_v58  ;;  %v8757_v32 = vpop.f32.mrb[57].mxu0  ;;  %v16251_v58 = vunpack.i.l.bf16 %v17976_v30 }
 0xa43   :  { %v17978_v39 = vmul.f32 0.35355338, %v8757_v32  ;;  %v16259_v32 = vunpack.i.h.bf16 %v16255_v11 }
 0xa44   :  { %v10106_v34 = vsel %vm3920_vm6, %v17974_v13, -inf }
 0xa45   :  { %10107 = vmax.xlane.f32.xlu1 %v10106_v34  ;;  %v10103_v29 = vsel %vm3920_vm6, %v17978_v39, -inf  ;;  %v16254_v34 = vunpack.i.h.bf16 %v17976_v30 }
 0xa46   :  { %10104 = vmax.xlane.f32.xlu0 %v10103_v29  ;;  %v15590_v29 = vpack.c.bf16 %v16256_v26, %v16251_v58 }
 0xa48   :  { %15591 = vmatprep.subr.bf16.mxu0 %v15590_v29 }
 0xa49   :  { %15593 = vmatpush3.bf16.msra.mxu0 %v15590_v29 }
 0xa51   :  { %v14787_v6 = vpop.f32.mrb[46].mxu1 }
 0xa52   :  { %v17992_v18 = vmul.f32 0.35355338, %v14787_v6  ;;  %v8844_v1 = vpop.f32.mrb[47].mxu1  ;;  %v15594_v6 = vpack.c.bf16 %v16259_v32, %v16254_v34 }
 0xa53   :  { %v17994_v7 = vmul.f32 0.35355338, %v8844_v1 }
 0xa54   :  { %v10112_v40 = vsel %vm3920_vm6, %v17992_v18, -inf  ;;  %15595 = vmatprep.subr.bf16.mxu1 %v15594_v6 }
 0xa55   :  { %10113 = vmax.xlane.f32.xlu0 %v10112_v40  ;;  %v10109_v41 = vsel %vm3920_vm6, %v17994_v7, -inf  ;;  %15597 = vmatpush3.bf16.msra.mxu1 %v15594_v6 }
 0xa56   :  { %10110 = vmax.xlane.f32.xlu1 %v10109_v41 }
 0xa59   :  { %v14794_v15 = vpop.f32.mrb[58].mxu0 }
 0xa5a   :  { %v18000_v56 = vmul.f32 0.35355338, %v14794_v15  ;;  %v8931_v2 = vpop.f32.mrb[59].mxu0 }
 0xa5b   :  { %v18002_v23 = vmul.f32 0.35355338, %v8931_v2 }
 0xa5c   :  { %v10118_v12 = vsel %vm3920_vm6, %v18000_v56, -inf }
 0xa5d   :  { %10119 = vmax.xlane.f32.xlu0 %v10118_v12  ;;  %v10115_v46 = vsel %vm3920_vm6, %v18002_v23, -inf }
 0xa5e   :  { %10116 = vmax.xlane.f32.xlu1 %v10115_v46 }
 0xa69   :  { %v14801_v33 = vpop.f32.mrb[48].mxu1 }
 0xa6a   :  { %v18008_v10 = vmul.f32 0.35355338, %v14801_v33  ;;  %v9018_v62 = vpop.f32.mrb[49].mxu1 }
 0xa6b   :  { %v18010_v35 = vmul.f32 0.35355338, %v9018_v62 }
 0xa6c   :  { %v10124_v50 = vsel %vm3920_vm6, %v18008_v10, -inf }
 0xa6d   :  { %10125 = vmax.xlane.f32.xlu0 %v10124_v50  ;;  %v10121_v16 = vsel %vm3920_vm6, %v18010_v35, -inf }
 0xa6e   :  { %10122 = vmax.xlane.f32.xlu1 %v10121_v16  ;;  %v16111_v16 = vunpack.i.h.bf16 %v17840_v45  ;;  %v16268_v45 = vunpack.i.l.bf16 %v17990_v63 }
 0xa71   :  { %v14808_v60 = vpop.f32.mrb[60].mxu0 }
 0xa72   :  { %v18016_v55 = vmul.f32 0.35355338, %v14808_v60  ;;  %v9105_v49 = vpop.f32.mrb[61].mxu0 }
 0xa73   :  { %v18018_v27 = vmul.f32 0.35355338, %v9105_v49  ;;  %v16106_v49 = vunpack.i.h.bf16 %v17838_v5 }
 0xa74   :  { %v10130_v28 = vsel %vm3920_vm6, %v18016_v55, -inf }
 0xa75   :  { %10131 = vmax.xlane.f32.xlu0 %v10130_v28  ;;  %v10127_v47 = vsel %vm3920_vm6, %v18018_v27, -inf }
 0xa76   :  { %10128 = vmax.xlane.f32.xlu1 %v10127_v47 }
 0xa81   :  { %v14815_v24 = vpop.f32.mrb[50].mxu1 }
 0xa82   :  { %v18024_v4 = vmul.f32 0.35355338, %v14815_v24  ;;  %v9192_v20 = vpop.f32.mrb[51].mxu1  ;;  %v16284_v24 = vpack.i.bf16 %v16111_v16, %v16106_v49 }
 0xa83   :  { %v18026_v25 = vmul.f32 0.35355338, %v9192_v20 }
 0xa84   :  { %v10136_v53 = vsel %vm3920_vm6, %v18024_v4, -inf }
 0xa85   :  { %10137 = vmax.xlane.f32.xlu0 %v10136_v53  ;;  %v14822_v43 = vpop.f32.mrb[62].mxu0  ;;  %v10133_v36 = vsel %vm3920_vm6, %v18026_v25, -inf  ;;  %v16266_v53 = vunpack.i.h.bf16 %v17986_v51 }
 0xa86   :  { %v18032_v54 = vmul.f32 0.35355338, %v14822_v43  ;;  %10134 = vmax.xlane.f32.xlu1 %v10133_v36  ;;  %v9279_v37 = vpop.f32.mrb[63].mxu0  ;;  %v16263_v43 = vunpack.i.l.bf16 %v17986_v51  ;;  %v16271_v36 = vunpack.i.h.bf16 %v17990_v63 }
 0xa87   :  { %v18034_v21 = vmul.f32 0.35355338, %v9279_v37 }
 0xa88   :  { %v10142_v17 = vsel %vm3920_vm6, %v18032_v54, -inf  ;;  %v18072_v37 = vpack.c.bf16 %v16268_v45, %v16263_v43  ;;  %v18074_v5 = vpack.c.bf16 %v16271_v36, %v16266_v53 }
 0xa89   :  { %10143 = vmax.xlane.f32.xlu0 %v10142_v17  ;;  %v10139_v31 = vsel %vm3920_vm6, %v18034_v21, -inf }
 0xa8a   :  { %10140 = vmax.xlane.f32.xlu1 %v10139_v31  ;;  %15599 = vmatprep.subr.bf16.mxu0 %v18072_v37 }
 0xa8b   :  { %15603 = vmatprep.subr.bf16.mxu1 %v18074_v5 }
 0xa91   :  { %v18042_v1 = vpop.f32.mrb[52].mxu1 }
 0xa92   :  { %v9366_v40 = vpop.f32.mrb[53].mxu1  ;;  %v18106_v45 = vmul.f32 0.35355338, %v18042_v1 }
 0xa93   :  { %v18044_v41 = vmul.f32 0.35355338, %v9366_v40 }
 0xa95   :  { %v10145_v15 = vsel %vm3920_vm6, %v18044_v41, -inf }
 0xa96   :  { %10146 = vmax.xlane.f32.xlu1 %v10145_v15 }
 0xa99   :  { %v18048_v2 = vpop.f32.mrb[64].mxu0 }
 0xa9a   :  { %v9453_v11 = vpop.f32.mrb[65].mxu0 }
 0xa9b   :  { %v18050_v12 = vmul.f32 0.35355338, %v9453_v11 }
 0xa9d   :  { %v10151_v30 = vsel %vm3920_vm6, %v18050_v12, -inf }
 0xa9e   :  { %10152 = vmax.xlane.f32.xlu1 %v10151_v30 }
 0xaa9   :  { %v18054_v46 = vpop.f32.mrb[54].mxu1 }
 0xaaa   :  { %v9540_v33 = vpop.f32.mrb[55].mxu1 }
 0xaab   :  { %v18056_v62 = vmul.f32 0.35355338, %v9540_v33 }
 0xaad   :  { %v10157_v50 = vsel %vm3920_vm6, %v18056_v62, -inf }
 0xaae   :  { %10158 = vmax.xlane.f32.xlu1 %v10157_v50 }
 0xab1   :  { %v18061_v60 = vpop.f32.mrb[66].mxu0 }
 0xab2   :  { %v9627_v28 = vpop.f32.mrb[67].mxu0 }
 0xab3   :  { %v18064_v47 = vmul.f32 0.35355338, %v9627_v28 }
 0xab5   :  { %v10163_v20 = vsel %vm3920_vm6, %v18064_v47, -inf }
 0xab6   :  { %16285 = vxpose.xlu0.b32.start.end [1/1] (short) (narrow) %v16284_v24, 16  ;;  %10164 = vmax.xlane.f32.xlu1 %v10163_v20 }
 0xac1   :  { %v14857_v17 = vpop.f32.mrb[56].mxu1 }
 0xac2   :  { %v18076_v31 = vmul.f32 0.35355338, %v14857_v17  ;;  %v9714_v26 = vpop.f32.mrb[57].mxu1 }
 0xac3   :  { %v18080_v58 = vmul.f32 0.35355338, %v9714_v26 }
 0xac4   :  { %v10172_v51 = vsel %vm3920_vm6, %v18076_v31, -inf }
 0xac5   :  { %10173 = vmax.xlane.f32.xlu1 %v10172_v51  ;;  %v10169_v63 = vsel %vm3920_vm6, %v18080_v58, -inf }
 0xac9   :  { %10170 = vmax.xlane.f32.xlu1 %v10169_v63  ;;  %v14864_v32 = vpop.f32.mrb[68].mxu0 }
 0xaca   :  { %v18086_v34 = vmul.f32 0.35355338, %v14864_v32  ;;  %v9801_v29 = vpop.f32.mrb[69].mxu0 }
 0xacb   :  { %v18088_v6 = vmul.f32 0.35355338, %v9801_v29 }
 0xacc   :  { %v10178_v40 = vsel %vm3920_vm6, %v18086_v34, -inf }
 0xacd   :  { %10179 = vmax.xlane.f32.xlu1 %v10178_v40  ;;  %v10175_v15 = vsel %vm3920_vm6, %v18088_v6, -inf  ;;  %v18114_v40 = vmul.f32 0.35355338, %v18048_v2 }
 0xad1   :  { %10176 = vmax.xlane.f32.xlu1 %v10175_v15  ;;  %v10148_v15 = vsel %vm3920_vm6, %v18106_v45, -inf }
 0xad2   :  { %v10108_v28 = vpop.xlane.xlu1 %10107 }
 0xad3   :  { %v10200_v43 = vsub.f32 %v17974_v13, %v10108_v28  ;;  %v10105_v17 = vpop.xlane.xlu0 %10104 }
 0xad4   :  { %v10199_v29 = vsub.f32 %v17978_v39, %v10105_v17  ;;  %v18124_v39 = vmul.f32 0.35355338, %v18054_v46 }
 0xad5   :  { %v10233_v32 = vmul.f32 1.442695, %v10200_v43 }
 0xad7   :  { %16436 = vpow2.f32 %v10233_v32 }
 0xad9   :  { %v14871_v11 = vpop.f32.mrb[58].mxu1 }
 0xada   :  { %v18094_v30 = vmul.f32 0.35355338, %v14871_v11  ;;  %v9888_v33 = vpop.f32.mrb[59].mxu1 }
 0xadb   :  { %v18096_v50 = vmul.f32 0.35355338, %v9888_v33  ;;  %v10231_v33 = vmul.f32 1.442695, %v10199_v29 }
 0xadc   :  { %v10184_v16 = vsel %vm3920_vm6, %v18094_v30, -inf }
 0xadd   :  { %10185 = vmax.xlane.f32.xlu1 %v10184_v16  ;;  %v14878_v49 = vpop.f32.mrb[70].mxu0  ;;  %v10181_v24 = vsel %vm3920_vm6, %v18096_v50, -inf  ;;  %16438 = vpow2.f32 %v10231_v33 }
 0xade   :  { %v18102_v20 = vmul.f32 0.35355338, %v14878_v49  ;;  %v9975_v53 = vpop.f32.mrb[71].mxu0  ;;  %v10154_v49 = vsel %vm3920_vm6, %v18114_v40, -inf }
 0xadf   :  { %v18110_v51 = vmul.f32 0.35355338, %v9975_v53 }
 0xae0   :  { %v10190_v26 = vsel %vm3920_vm6, %v18102_v20, -inf }
 0xae1   :  { %10182 = vmax.xlane.f32.xlu1 %v10181_v24  ;;  %v14885_v36 = vpop.f32.mrb[60].mxu1  ;;  %v10187_v11 = vsel %vm3920_vm6, %v18110_v51, -inf  ;;  %v18143_v29 = vpop.eup %16436 }
 0xae2   :  { %v10062_v63 = vpop.f32.mrb[61].mxu1  ;;  %v10114_v13 = vpop.xlane.xlu0 %10113  ;;  %v18118_v1 = vmul.f32 0.35355338, %v14885_v36  ;;  %v10160_v36 = vsel %vm3920_vm6, %v18124_v39, -inf }
 0xae3   :  { %v10202_v16 = vsub.f32 %v17992_v18, %v10114_v13  ;;  %v10111_v2 = vpop.xlane.xlu1 %10110  ;;  %v18128_v28 = vmul.f32 0.35355338, %v10062_v63  ;;  %v18134_v18 = vmul.f32 0.35355338, %v18061_v60 }
 0xae4   :  { %v10196_v24 = vsel %vm3920_vm6, %v18118_v1, -inf  ;;  %v10201_v43 = vsub.f32 %v17994_v7, %v10111_v2 }
 0xae5   :  { %10191 = vmax.xlane.f32.xlu1 %v10190_v26  ;;  %v10237_v53 = vmul.f32 1.442695, %v10202_v16  ;;  %v10193_v17 = vsel %vm3920_vm6, %v18128_v28, -inf  ;;  %v10166_v7 = vsel %vm3920_vm6, %v18134_v18, -inf }
 0xae6   :  { %v10235_v26 = vmul.f32 1.442695, %v10201_v43 }
 0xae7   :  { %10149 = vmax.xlane.f32.xlu0 %v10148_v15  ;;  %16440 = vpow2.f32 %v10237_v53  ;;  %v10298_v15 = vsel %vm3920_vm6, %v18143_v29, 0.0 }
 0xae8   :  { %16442 = vpow2.f32 %v10235_v26 }
 0xae9   :  { %10188 = vmax.xlane.f32.xlu1 %v10187_v11  ;;  %v18148_v11 = vpop.eup %16438 }
 0xaea   :  { %v10120_v46 = vpop.xlane.xlu0 %10119  ;;  %v10295_v16 = vsel %vm3920_vm6, %v18148_v11, 0.0 }
 0xaeb   :  { %10155 = vmax.xlane.f32.xlu0 %v10154_v49  ;;  %v10204_v63 = vsub.f32 %v18000_v56, %v10120_v46  ;;  %v10117_v32 = vpop.xlane.xlu1 %10116 }
 0xaec   :  { %v10203_v13 = vsub.f32 %v18002_v23, %v10117_v32 }
 0xaed   :  { %10197 = vmax.xlane.f32.xlu1 %v10196_v24  ;;  %v10241_v60 = vmul.f32 1.442695, %v10204_v63 }
 0xaee   :  { %v10239_v56 = vmul.f32 1.442695, %v10203_v13 }
 0xaef   :  { %10161 = vmax.xlane.f32.xlu0 %v10160_v36  ;;  %16444 = vpow2.f32 %v10241_v60 }
 0xaf0   :  { %16446 = vpow2.f32 %v10239_v56 }
 0xaf1   :  { %10194 = vmax.xlane.f32.xlu1 %v10193_v17  ;;  %v18152_v2 = vpop.eup %16440 }
 0xaf2   :  { %v10304_v43 = vsel %vm3920_vm6, %v18152_v2, 0.0  ;;  %v18158_v46 = vpop.eup %16442 }
 0xaf3   :  { %10167 = vmax.xlane.f32.xlu0 %v10166_v7  ;;  %v10301_v26 = vsel %vm3920_vm6, %v18158_v46, 0.0 }
 0xaf7   :  { %10299 = vadd.xlane.f32.xlu0 %v10298_v15 }
 0xaf9   :  { %v18162_v63 = vpop.eup %16444 }
 0xafa   :  { %v10126_v33 = vpop.xlane.xlu0 %10125  ;;  %v10310_v60 = vsel %vm3920_vm6, %v18162_v63, 0.0  ;;  %v18168_v13 = vpop.eup %16446 }
 0xafb   :  { %v10206_v49 = vsub.f32 %v18008_v10, %v10126_v33  ;;  %v10123_v24 = vpop.xlane.xlu1 %10122  ;;  %10296 = vadd.xlane.f32.xlu0 %v10295_v16  ;;  %v10307_v56 = vsel %vm3920_vm6, %v18168_v13, 0.0 }
 0xafc   :  { %v10205_v53 = vsub.f32 %v18010_v35, %v10123_v24 }
 0xafd   :  { %v10245_v23 = vmul.f32 1.442695, %v10206_v49 }
 0xafe   :  { %v10243_v36 = vmul.f32 1.442695, %v10205_v53 }
 0xaff   :  { %10305 = vadd.xlane.f32.xlu0 %v10304_v43  ;;  %16448 = vpow2.f32 %v10245_v23 }
 0xb00   :  { %16450 = vpow2.f32 %v10243_v36 }
 0xb02   :  { %v10132_v17 = vpop.xlane.xlu0 %10131 }
 0xb03   :  { %v10208_v10 = vsub.f32 %v18016_v55, %v10132_v17  ;;  %v10129_v32 = vpop.xlane.xlu1 %10128  ;;  %10302 = vadd.xlane.f32.xlu0 %v10301_v26 }
 0xb04   :  { %v10207_v7 = vsub.f32 %v18018_v27, %v10129_v32 }
 0xb05   :  { %v10249_v35 = vmul.f32 1.442695, %v10208_v10 }
 0xb06   :  { %v10247_v15 = vmul.f32 1.442695, %v10207_v7 }
 0xb07   :  { %10311 = vadd.xlane.f32.xlu0 %v10310_v60  ;;  %16452 = vpow2.f32 %v10249_v35 }
 0xb08   :  { %16454 = vpow2.f32 %v10247_v15 }
 0xb09   :  { %v18172_v33 = vpop.eup %16448 }
 0xb0a   :  { %v10316_v55 = vsel %vm3920_vm6, %v18172_v33, 0.0  ;;  %v18176_v16 = vpop.eup %16450 }
 0xb0b   :  { %10308 = vadd.xlane.f32.xlu0 %v10307_v56  ;;  %v10313_v49 = vsel %vm3920_vm6, %v18176_v16, 0.0 }
 0xb0f   :  { %10317 = vadd.xlane.f32.xlu0 %v10316_v55 }
 0xb11   :  { %v18180_v24 = vpop.eup %16452 }
 0xb12   :  { %v10138_v27 = vpop.xlane.xlu0 %10137  ;;  %v10322_v10 = vsel %vm3920_vm6, %v18180_v24, 0.0  ;;  %v18186_v32 = vpop.eup %16454 }
 0xb13   :  { %v10210_v23 = vsub.f32 %v18024_v4, %v10138_v27  ;;  %v10135_v53 = vpop.xlane.xlu1 %10134  ;;  %10314 = vadd.xlane.f32.xlu0 %v10313_v49 }
 0xb14   :  { %v10209_v43 = vsub.f32 %v18026_v25, %v10135_v53  ;;  %v10319_v25 = vsel %vm3920_vm6, %v18186_v32, 0.0 }
 0xb15   :  { %v10253_v36 = vmul.f32 1.442695, %v10210_v23 }
 0xb16   :  { %v10251_v17 = vmul.f32 1.442695, %v10209_v43  ;;  %v10144_v26 = vpop.xlane.xlu0 %10143 }
 0xb17   :  { %16456 = vpow2.f32 %v10253_v36  ;;  %v10212_v35 = vsub.f32 %v18032_v54, %v10144_v26  ;;  %v10141_v7 = vpop.xlane.xlu1 %10140  ;;  %10323 = vadd.xlane.f32.xlu0 %v10322_v10 }
 0xb18   :  { %16458 = vpow2.f32 %v10251_v17  ;;  %v10211_v4 = vsub.f32 %v18034_v21, %v10141_v7 }
 0xb19   :  { %v10257_v60 = vmul.f32 1.442695, %v10212_v35 }
 0xb1a   :  { %v10255_v15 = vmul.f32 1.442695, %v10211_v4 }
 0xb1b   :  { %16460 = vpow2.f32 %v10257_v60  ;;  %10320 = vadd.xlane.f32.xlu0 %v10319_v25  ;;  %v16121_v60 = vunpack.i.h.bf16 %v17844_v22 }
 0xb1c   :  { %16462 = vpow2.f32 %v10255_v15  ;;  %v16116_v15 = vunpack.i.h.bf16 %v17842_v0 }
 0xb21   :  { %v18192_v56 = vpop.eup %16456 }
 0xb22   :  { %v18194_v55 = vpop.eup %16458  ;;  %v10328_v54 = vsel %vm3920_vm6, %v18192_v56, 0.0 }
 0xb23   :  { %10329 = vadd.xlane.f32.xlu0 %v10328_v54  ;;  %v10325_v27 = vsel %vm3920_vm6, %v18194_v55, 0.0  ;;  %v10147_v25 = vpop.xlane.xlu1 %10146  ;;  %v16296_v54 = vpack.i.bf16 %v16121_v60, %v16116_v15 }
 0xb24   :  { %10326 = vadd.xlane.f32.xlu1 %v10325_v27 }
 0xb25   :  { %v18200_v21 = vpop.eup %16460 }
 0xb26   :  { %v10334_v49 = vsel %vm3920_vm6, %v18200_v21, 0.0  ;;  %v18204_v23 = vpop.eup %16462 }
 0xb27   :  { %10335 = vadd.xlane.f32.xlu0 %v10334_v49  ;;  %v10331_v53 = vsel %vm3920_vm6, %v18204_v23, 0.0 }
 0xb2b   :  { %10332 = vadd.xlane.f32.xlu0 %v10331_v53  ;;  %v10153_v27 = vpop.xlane.xlu1 %10152 }
 0xb36   :  { %v16286_v43 = vpop.trf.xlu0 }
 0xb37   :  { %v16290_v36 = vunpack.i.h.bf16 %v16286_v43  ;;  %v16287_v17 = vunpack.i.l.bf16 %v16286_v43  ;;  %v10215_v43 = vsub.f32 %v18050_v12, %v10153_v27 }
 0xb39   :  { %v10263_v59 = vmul.f32 1.442695, %v10215_v43 }
 0xb3a   :  { %v16291_v26 = vpop.trf.xlu0 }
 0xb3b   :  { %v16295_v10 = vunpack.i.h.bf16 %v16291_v26  ;;  %v16292_v35 = vunpack.i.l.bf16 %v16291_v26  ;;  %v10159_v49 = vpop.xlane.xlu1 %10158  ;;  %16464 = vpow2.f32 %v10263_v59 }
 0xb3d   :  { %v18208_v7 = vpack.c.bf16 %v16292_v35, %v16287_v17  ;;  %v18210_v4 = vpack.c.bf16 %v16295_v10, %v16290_v36  ;;  %v10213_v36 = vsub.f32 %v18044_v41, %v10147_v25 }
 0xb3f   :  { %v10259_v0 = vmul.f32 1.442695, %v10213_v36 }
 0xb43   :  { %v10165_v53 = vpop.xlane.xlu1 %10164 }
 0xb44   :  { %v10219_v59 = vsub.f32 %v18064_v47, %v10165_v53 }
 0xb45   :  { %v18222_v41 = vpop.eup %16464 }
 0xb52   :  { %v10174_v38 = vpop.xlane.xlu1 %10173 }
 0xb56   :  { %v10171_v57 = vpop.xlane.xlu1 %10170 }
 0xb57   :  { %16297 = vxpose.xlu1.b32.start.end [1/1] (short) (narrow) %v16296_v54, 16  ;;  %v10217_v54 = vsub.f32 %v18056_v62, %v10159_v49  ;;  %v10343_v62 = vsel %vm3920_vm6, %v18222_v41, 0.0  ;;  %v10271_v49 = vmul.f32 1.442695, %v10219_v59 }
 0xb5a   :  { %v18215_v26 = vpop.xlane.xlu1 %10179 }
 0xb5e   :  { %v10177_v10 = vpop.xlane.xlu1 %10176 }
 0xb5f   :  { %v10223_v25 = vsub.f32 %v18088_v6, %v10177_v10  ;;  %v10222_v6 = vsub.f32 %v18076_v31, %v10174_v38 }
 0xb6a   :  { %v10186_v12 = vpop.xlane.xlu1 %10185 }
 0xb6b   :  { %v10226_v47 = vsub.f32 %v18094_v30, %v10186_v12  ;;  %v10277_v30 = vmul.f32 1.442695, %v10222_v6 }
 0xb74   :  { %v10150_v17 = vpop.xlane.xlu0 %10149 }
 0xb75   :  { %v10214_v22 = vsub.f32 %v18106_v45, %v10150_v17  ;;  %v10267_v45 = vmul.f32 1.442695, %v10217_v54 }
 0xb77   :  { %v10261_v35 = vmul.f32 1.442695, %v10214_v22  ;;  %v10183_v22 = vpop.xlane.xlu1 %10182 }
 0xb78   :  { %v10156_v60 = vpop.xlane.xlu0 %10155 }
 0xb79   :  { %16466 = vpow2.f32 %v10261_v35  ;;  %v10216_v15 = vsub.f32 %v18114_v40, %v10156_v60  ;;  %v10285_v60 = vmul.f32 1.442695, %v10226_v47 }
 0xb7a   :  { %16468 = vpow2.f32 %v10259_v0  ;;  %v10279_v0 = vmul.f32 1.442695, %v10223_v25 }
 0xb7b   :  { %v10265_v27 = vmul.f32 1.442695, %v10216_v15  ;;  %v10225_v15 = vsub.f32 %v18096_v50, %v10183_v22  ;;  %v10192_v54 = vpop.xlane.xlu1 %10191 }
 0xb7c   :  { %v10162_v43 = vpop.xlane.xlu0 %10161  ;;  %v10228_v22 = vsub.f32 %v18102_v20, %v10192_v54 }
 0xb7d   :  { %v10218_v52 = vsub.f32 %v18124_v39, %v10162_v43  ;;  %16470 = vpow2.f32 %v10265_v27 }
 0xb7e   :  { %v10289_v6 = vmul.f32 1.442695, %v10228_v22 }
 0xb7f   :  { %v10269_v36 = vmul.f32 1.442695, %v10218_v52 }
 0xb80   :  { %v10168_v17 = vpop.xlane.xlu0 %10167 }
 0xb81   :  { %16472 = vpow2.f32 %v10269_v36  ;;  %v10220_v40 = vsub.f32 %v18134_v18, %v10168_v17  ;;  %v10221_v18 = vsub.f32 %v18080_v58, %v10171_v57  ;;  %v10283_v57 = vmul.f32 1.442695, %v10225_v15  ;;  %v10189_v36 = vpop.xlane.xlu1 %10188 }
 0xb82   :  { %10344 = vadd.xlane.f32.xlu1 %v10343_v62  ;;  %16474 = vpow2.f32 %v10267_v45  ;;  %v10224_v58 = vsub.f32 %v18086_v34, %v18215_v26 }
 0xb83   :  { %v18229_v39 = vpop.eup %16466  ;;  %v10273_v53 = vmul.f32 1.442695, %v10220_v40  ;;  %v10275_v27 = vmul.f32 1.442695, %v10221_v18  ;;  %v16275_v18 = vunpack.i.l.bf16 %v17984_v14 }
 0xb84   :  { %v10300_v52 = vpop.xlane.xlu0 %10299  ;;  %v10340_v10 = vsel %vm3920_vm6, %v18229_v39, 0.0  ;;  %v18235_v35 = vpop.eup %16468  ;;  %v10281_v34 = vmul.f32 1.442695, %v10224_v58 }
 0xb85   :  { %16476 = vpow2.f32 %v10273_v53  ;;  %10341 = vadd.xlane.f32.xlu0 %v10340_v10  ;;  %v10337_v38 = vsel %vm3920_vm6, %v18235_v35, 0.0  ;;  %v10198_v20 = vpop.xlane.xlu1 %10197  ;;  %v16280_v10 = vunpack.i.l.bf16 %v17988_v48 }
 0xb86   :  { %16478 = vpow2.f32 %v10271_v49 }
 0xb87   :  { %16480 = vpow2.f32 %v10279_v0  ;;  %v18241_v31 = vpop.eup %16470 }
 0xb88   :  { %16482 = vrcp.f32 %v10300_v52  ;;  %v10297_v12 = vpop.xlane.xlu0 %10296  ;;  %v10346_v59 = vsel %vm3920_vm6, %v18241_v31, 0.0 }
 0xb89   :  { %16484 = vrcp.f32 %v10297_v12  ;;  %10338 = vadd.xlane.f32.xlu0 %v10337_v38 }
 0xb8a   :  { %16486 = vpow2.f32 %v10285_v60  ;;  %v10227_v60 = vsub.f32 %v18110_v51, %v10189_v36  ;;  %v15606_v51 = vpack.c.bf16 %v16280_v10, %v16275_v18 }
 0xb8b   :  { %v18243_v43 = vpop.eup %16472  ;;  %16488 = vpow2.f32 %v10277_v30 }
 0xb8c   :  { %v10306_v50 = vpop.xlane.xlu0 %10305  ;;  %v10352_v45 = vsel %vm3920_vm6, %v18243_v43, 0.0  ;;  %v18251_v25 = vpop.eup %16474  ;;  %16490 = vpow2.f32 %v10275_v27 }
 0xb8d   :  { %10347 = vadd.xlane.f32.xlu0 %v10346_v59  ;;  %10353 = vadd.xlane.f32.xlu1 %v10352_v45  ;;  %16492 = vpow2.f32 %v10283_v57  ;;  %v10349_v62 = vsel %vm3920_vm6, %v18251_v25, 0.0  ;;  %v10230_v57 = vsub.f32 %v18118_v1, %v10198_v20  ;;  %v10195_v45 = vpop.xlane.xlu1 %10194 }
 0xb8e   :  { %16494 = vrcp.f32 %v10306_v50  ;;  %v10287_v50 = vmul.f32 1.442695, %v10227_v60 }
 0xb8f   :  { %v18253_v17 = vpop.eup %16476 }
 0xb90   :  { %v18256_v40 = vpop.eup %16478  ;;  %v10303_v26 = vpop.xlane.xlu0 %10302  ;;  %v10358_v49 = vsel %vm3920_vm6, %v18253_v17, 0.0 }
 0xb91   :  { %v18262_v0 = vpop.eup %16480  ;;  %16496 = vrcp.f32 %v10303_v26  ;;  %10350 = vadd.xlane.f32.xlu1 %v10349_v62  ;;  %10359 = vadd.xlane.f32.xlu0 %v10358_v49  ;;  %v10355_v52 = vsel %vm3920_vm6, %v18256_v40, 0.0  ;;  %v16283_v26 = vunpack.i.h.bf16 %v17988_v48  ;;  %v10229_v62 = vsub.f32 %v18128_v28, %v10195_v45 }
 0xb92   :  { %v16483_v47 = vpop.eup %16482  ;;  %16498 = vpow2.f32 %v10281_v34  ;;  %v10367_v54 = vsel %vm3920_vm6, %v18262_v0, 0.0  ;;  %v10293_v34 = vmul.f32 1.442695, %v10230_v57 }
 0xb93   :  { %v16485_v53 = vpop.eup %16484  ;;  %v10424_v38 = vmul.f32 %v16483_v47, %v18143_v29  ;;  %16500 = vpow2.f32 %v10289_v6  ;;  %v10291_v48 = vmul.f32 1.442695, %v10229_v62 }
 0xb94   :  { %v10312_v15 = vpop.xlane.xlu0 %10311  ;;  %v10423_v30 = vmul.f32 %v16485_v53, %v18148_v11  ;;  %v18272_v12 = vpop.eup %16486 }
 0xb95   :  { %10368 = vadd.xlane.f32.xlu1 %v10367_v54  ;;  %10356 = vadd.xlane.f32.xlu0 %v10355_v52  ;;  %v18275_v27 = vpop.eup %16488  ;;  %16502 = vrcp.f32 %v10312_v15  ;;  %v10376_v29 = vsel %vm3920_vm6, %v18272_v12, 0.0 }
 0xb96   :  { %14890 = vmatprep.mubr.msk.f32.mxu0 %vm3920_vm6, %v10423_v30  ;;  %v18280_v58 = vpop.eup %16490  ;;  %v10364_v1 = vsel %vm3920_vm6, %v18275_v27, 0.0 }
 0xb97   :  { %14891 = vmatmul.mubr.msk.f32.vlgmr.msra.gmra.mrb[72].mxu0 %vm3920_vm6, %v10424_v38  ;;  %v18285_v59 = vpop.eup %16492  ;;  %v10361_v20 = vsel %vm3920_vm6, %v18280_v58, 0.0 }
 0xb98   :  { %15601 = vmatpush3.bf16.msra.mxu0 %v18072_v37  ;;  %v10309_v11 = vpop.xlane.xlu0 %10308  ;;  %v16495_v36 = vpop.eup %16494  ;;  %v16278_v37 = vunpack.i.h.bf16 %v17984_v14  ;;  %v10373_v47 = vsel %vm3920_vm6, %v18285_v59, 0.0 }
 0xb99   :  { %16504 = vrcp.f32 %v10309_v11  ;;  %15607 = vmatprep.subr.bf16.mxu0 %v15606_v51  ;;  %10377 = vadd.xlane.f32.xlu1 %v10376_v29  ;;  %v10426_v6 = vmul.f32 %v16495_v36, %v18152_v2 }
 0xb9a   :  { %10365 = vadd.xlane.f32.xlu0 %v10364_v1  ;;  %16506 = vpow2.f32 %v10287_v50  ;;  %v15610_v14 = vpack.c.bf16 %v16283_v26, %v16278_v37 }
 0xb9b   :  { %v16497_v22 = vpop.eup %16496  ;;  %16508 = vpow2.f32 %v10293_v34 }
 0xb9c   :  { %v10318_v49 = vpop.xlane.xlu0 %10317  ;;  %v10425_v53 = vmul.f32 %v16497_v22, %v18158_v46  ;;  %v18298_v52 = vpop.eup %16498 }
 0xb9d   :  { %10374 = vadd.xlane.f32.xlu1 %v10373_v47  ;;  %16510 = vrcp.f32 %v10318_v49  ;;  %v18303_v46 = vpop.eup %16500  ;;  %v10370_v2 = vsel %vm3920_vm6, %v18298_v52, 0.0 }
 0xb9e   :  { %10362 = vadd.xlane.f32.xlu0 %v10361_v20  ;;  %14897 = vmatprep.mubr.msk.f32.mxu1 %vm3920_vm6, %v10425_v53 }
 0xb9f   :  { %14898 = vmatmul.mubr.msk.f32.vlgmr.msra.gmra.mrb[62].mxu1 %vm3920_vm6, %v10426_v6  ;;  %v16503_v10 = vpop.eup %16502 }
 0xba0   :  { %15605 = vmatpush3.bf16.msra.mxu1 %v18074_v5  ;;  %v10315_v28 = vpop.xlane.xlu0 %10314  ;;  %v10428_v54 = vmul.f32 %v16503_v10, %v18162_v63  ;;  %v10382_v5 = vsel %vm3920_vm6, %v18303_v46, 0.0 }
 0xba1   :  { %16512 = vrcp.f32 %v10315_v28  ;;  %15611 = vmatprep.subr.bf16.mxu1 %v15610_v14 }
 0xba2   :  { %10371 = vadd.xlane.f32.xlu0 %v10370_v2  ;;  %16514 = vpow2.f32 %v10291_v48  ;;  %v16141_v48 = vunpack.i.h.bf16 %v17852_v42  ;;  %v18665_v42 = vld [vmem:[#allocation19_spill] sm:$0xff] }
 0xba3   :  { %v16505_v18 = vpop.eup %16504 }
 0xba4   :  { %v10324_v60 = vpop.xlane.xlu0 %10323  ;;  %v10427_v15 = vmul.f32 %v16505_v18, %v18168_v13  ;;  %v18311_v30 = vpop.eup %16506  ;;  %v16146_v18 = vunpack.i.h.bf16 %v17854_v44 }
 0xba5   :  { %16516 = vrcp.f32 %v10324_v60  ;;  %v18315_v57 = vpop.eup %16508  ;;  %v10379_v63 = vsel %vm3920_vm6, %v18311_v30, 0.0 }
 0xba6   :  { %10383 = vadd.xlane.f32.xlu0 %v10382_v5  ;;  %14904 = vmatprep.mubr.msk.f32.mxu0 %vm3920_vm6, %v10427_v15  ;;  %v10388_v45 = vsel %vm3920_vm6, %v18315_v57, 0.0  ;;  %v18667_v5 = vld [vmem:[#allocation26_spill] sm:$0xff] }
 0xba7   :  { %14905 = vmatmul.mubr.msk.f32.vlgmr.msra.gmra.mrb[74].mxu0 %vm3920_vm6, %v10428_v54  ;;  %v16511_v13 = vpop.eup %16510  ;;  %v18666_v54 = vsub.s32 2, %v18665_v42 }
 0xba8   :  { %15609 = vmatpush3.bf16.msra.mxu0 %v15606_v51  ;;  %v10321_v38 = vpop.xlane.xlu0 %10320  ;;  %v10430_v29 = vmul.f32 %v16511_v13, %v18172_v33 }
 0xba9   :  { %16518 = vrcp.f32 %v10321_v38  ;;  %15615 = vmatprep.subr.bf16.mxu0 %v18208_v7 }
 0xbaa   :  { %10380 = vadd.xlane.f32.xlu0 %v10379_v63  ;;  %v18668_v63 = vld [vmem:[#allocation44_spill] sm:$0xff] }
 0xbab   :  { %v16513_v50 = vpop.eup %16512 }
 0xbac   :  { %v10429_v11 = vmul.f32 %v16513_v50, %v18176_v16  ;;  %v18324_v51 = vpop.eup %16514 }
 0xbad   :  { %v10385_v16 = vsel %vm3920_vm6, %v18324_v51, 0.0 }
 0xbae   :  { %10389 = vadd.xlane.f32.xlu0 %v10388_v45  ;;  %14911 = vmatprep.mubr.msk.f32.mxu1 %vm3920_vm6, %v10429_v11 }
 0xbaf   :  { %14912 = vmatmul.mubr.msk.f32.vlgmr.msra.gmra.mrb[64].mxu1 %vm3920_vm6, %v10430_v29  ;;  %v16517_v33 = vpop.eup %16516 }
 0xbb0   :  { %15613 = vmatpush3.bf16.msra.mxu1 %v15610_v14  ;;  %v10330_v1 = vpop.xlane.xlu0 %10329  ;;  %v10432_v37 = vmul.f32 %v16517_v33, %v18180_v24 }
 0xbb1   :  { %16520 = vrcp.f32 %v10330_v1  ;;  %15619 = vmatprep.subr.bf16.mxu1 %v18210_v4  ;;  %v10327_v36 = vpop.xlane.xlu1 %10326 }
 0xbb2   :  { %16522 = vrcp.f32 %v10327_v36  ;;  %10386 = vadd.xlane.f32.xlu0 %v10385_v16 }
 0xbb3   :  { %v16519_v22 = vpop.eup %16518 }
 0xbb4   :  { %v10336_v34 = vpop.xlane.xlu0 %10335  ;;  %v10431_v26 = vmul.f32 %v16519_v22, %v18186_v32 }
 0xbb5   :  { %16524 = vrcp.f32 %v10336_v34 }
 0xbb6   :  { %14918 = vmatprep.mubr.msk.f32.mxu0 %vm3920_vm6, %v10431_v26 }
 0xbb7   :  { %14919 = vmatmul.mubr.msk.f32.vlgmr.msra.gmra.mrb[76].mxu0 %vm3920_vm6, %v10432_v37 }
 0xbb8   :  { %15617 = vmatpush3.bf16.msra.mxu0 %v18208_v7  ;;  %v10333_v62 = vpop.xlane.xlu0 %10332 }
 0xbb9   :  { %16526 = vrcp.f32 %v10333_v62 }
 0xbbb   :  { %v16521_v49 = vpop.eup %16520 }
 0xbbc   :  { %v16523_v47 = vpop.eup %16522  ;;  %v10434_v6 = vmul.f32 %v16521_v49, %v18192_v56  ;;  %v16136_v56 = vunpack.i.h.bf16 %v17850_v61  ;;  %v18354_v61 = vld [vmem:[%s18543_s5] sm:$0xff] }
 0xbbd   :  { %v10433_v53 = vmul.f32 %v16523_v47, %v18194_v55  ;;  %v16131_v55 = vunpack.i.h.bf16 %v17848_v8  ;;  %v16151_v8 = vunpack.i.h.bf16 %v17856_v9  ;;  %v18669_v9 = vld [vmem:[#allocation45_spill] sm:$0xff] }
 0xbbf   :  { %14925 = vmatprep.mubr.msk.f32.mxu1 %vm3920_vm6, %v10433_v53  ;;  %v16525_v24 = vpop.eup %16524 }
 0xbc0   :  { %14926 = vmatmul.mubr.msk.f32.vlgmr.msra.gmra.mrb[66].mxu1 %vm3920_vm6, %v10434_v6  ;;  %v10436_v7 = vmul.f32 %v16525_v24, %v18200_v21  ;;  %v16126_v21 = vunpack.i.h.bf16 %v17846_v3  ;;  %v18359_v3 = vrot.slane %v18354_v61, %v18666_v54 }
 0xbc1   :  { %15621 = vmatpush3.bf16.msra.mxu1 %v18210_v4 }
 0xbc2   :  { %v13081_v44 = vadd.f32 %v18359_v3, %v17870_v19  ;;  %v13082_v38 = vadd.f32 %v18667_v5, %v18359_v3 }
 0xbc3   :  { %v16527_v32 = vpop.eup %16526 }
 0xbc4   :  { %v10435_v20 = vmul.f32 %v16527_v32, %v18204_v23  ;;  %v18366_v13 = vadd.f32 %v13081_v44, %v18668_v63  ;;  %v18369_v50 = vadd.f32 %v13082_v38, %v18669_v9 }
 0xbc6   :  { %14932 = vmatprep.mubr.msk.f32.mxu0 %vm3920_vm6, %v10435_v20 }
 0xbc7   :  { %14933 = vmatmul.mubr.msk.f32.vlgmr.msra.gmra.mrb[78].mxu0 %vm3920_vm6, %v10436_v7 }
 0xbd0   :  { %8519 = vxpose.xlu1.b32.start.end [1/1] (short) (narrow) %v16131_v55, 16 }
 0xbd5   :  { %8551 = vxpose.xlu1.b32.start.end [1/1] (short) (narrow) %v16136_v56, 16 }
 0xbd7   :  { %v16298_v14 = vpop.trf.xlu1 }
 0xbd8   :  { %v16302_v4 = vunpack.i.h.bf16 %v16298_v14  ;;  %v16299_v28 = vunpack.i.l.bf16 %v16298_v14 }
 0xbda   :  { %8583 = vxpose.xlu1.b32.start.end [1/1] (short) (narrow) %v16141_v48, 16 }
 0xbdb   :  { %v16303_v2 = vpop.trf.xlu1 }
 0xbdc   :  { %v16307_v23 = vunpack.i.h.bf16 %v16303_v2  ;;  %v16304_v10 = vunpack.i.l.bf16 %v16303_v2 }
 0xbde   :  { %v15622_v60 = vpack.c.bf16 %v16304_v10, %v16299_v28  ;;  %v15626_v15 = vpack.c.bf16 %v16307_v23, %v16302_v4 }
 0xbdf   :  { %8487 = vxpose.xlu0.b32.start.end [1/1] (short) (narrow) %v16126_v21, 16  ;;  %8615 = vxpose.xlu1.b32.start.end [1/1] (short) (narrow) %v16146_v18, 16 }
 0xbe0   :  { %15623 = vmatprep.subr.bf16.mxu0 %v15622_v60  ;;  %15627 = vmatprep.subr.bf16.mxu1 %v15626_v15 }
 0xbe1   :  { %15625 = vmatpush3.bf16.msra.mxu0 %v15622_v60 }
 0xbe4   :  { %8647 = vxpose.xlu1.b32.start.end [1/1] (short) (narrow) %v16151_v8, 16 }
 0xc0f   :  { %v10345_v11 = vpop.xlane.xlu1 %10344  ;;  %13089 = vadd.xlane.f32.xlu1 %v18366_v13 }
 0xc10   :  { %16528 = vrcp.f32 %v10345_v11  ;;  %13091 = vadd.xlane.f32.xlu0 %v18369_v50 }
 0xc12   :  { %v10342_v29 = vpop.xlane.xlu0 %10341 }
 0xc13   :  { %16530 = vrcp.f32 %v10342_v29 }
 0xc16   :  { %v10339_v45 = vpop.xlane.xlu0 %10338 }
 0xc17   :  { %16532 = vrcp.f32 %v10339_v45 }
 0xc1a   :  { %v16529_v19 = vpop.eup %16528  ;;  %v10354_v1 = vpop.xlane.xlu1 %10353 }
 0xc1b   :  { %v10348_v36 = vpop.xlane.xlu0 %10347  ;;  %v10439_v16 = vmul.f32 %v16529_v19, %v18222_v41 }
 0xc1c   :  { %16534 = vrcp.f32 %v10348_v36 }
 0xc1d   :  { %14946 = vmatprep.mubr.msk.f32.mxu0 %vm3920_vm6, %v10439_v16  ;;  %16536 = vrcp.f32 %v10354_v1  ;;  %v16531_v34 = vpop.eup %16530 }
 0xc1e   :  { %v10351_v33 = vpop.xlane.xlu1 %10350  ;;  %v10438_v49 = vmul.f32 %v16531_v34, %v18229_v39 }
 0xc1f   :  { %v10360_v22 = vpop.xlane.xlu0 %10359  ;;  %16538 = vrcp.f32 %v10351_v33 }
 0xc21   :  { %v16533_v26 = vpop.eup %16532 }
 0xc22   :  { %v10437_v62 = vmul.f32 %v16533_v26, %v18235_v35  ;;  %v10369_v56 = vpop.xlane.xlu1 %10368 }
 0xc23   :  { %v10357_v37 = vpop.xlane.xlu0 %10356 }
 0xc24   :  { %16540 = vrcp.f32 %v10357_v37  ;;  %14939 = vmatprep.mubr.msk.f32.mxu1 %vm3920_vm6, %v10437_v62 }
 0xc25   :  { %14940 = vmatmul.mubr.msk.f32.vlgmr.msra.gmra.mrb[68].mxu1 %vm3920_vm6, %v10438_v49 }
 0xc26   :  { %v16535_v41 = vpop.eup %16534  ;;  %15629 = vmatpush3.bf16.msra.mxu1 %v15626_v15  ;;  %v10378_v14 = vpop.xlane.xlu1 %10377 }
 0xc27   :  { %v10440_v47 = vmul.f32 %v16535_v41, %v18241_v31  ;;  %v10366_v53 = vpop.xlane.xlu0 %10365  ;;  %v16537_v6 = vpop.eup %16536 }
 0xc28   :  { %v10442_v35 = vmul.f32 %v16537_v6, %v18243_v43 }
 0xc29   :  { %v16539_v24 = vpop.eup %16538  ;;  %14947 = vmatmul.mubr.msk.f32.vlgmr.msra.gmra.mrb[80].mxu0 %vm3920_vm6, %v10440_v47 }
 0xc2a   :  { %v10441_v32 = vmul.f32 %v16539_v24, %v18251_v25  ;;  %v10375_v48 = vpop.xlane.xlu1 %10374  ;;  %v16582_v24 = vld [vmem:[#allocation8 + $0x8] sm:$0xff] }
 0xc2b   :  { %v10363_v20 = vpop.xlane.xlu0 %10362 }
 0xc2c   :  { %16542 = vrcp.f32 %v10363_v20  ;;  %14953 = vmatprep.mubr.msk.f32.mxu1 %vm3920_vm6, %v10441_v32  ;;  %v16583_v20 = vld [vmem:[#allocation8 + $0x10] sm:$0xff] }
 0xc2d   :  { %14954 = vmatmul.mubr.msk.f32.vlgmr.msra.gmra.mrb[70].mxu1 %vm3920_vm6, %v10442_v35  ;;  %16544 = vrcp.f32 %v10366_v53 }
 0xc2e   :  { %v16541_v39 = vpop.eup %16540  ;;  %16546 = vrcp.f32 %v10375_v48 }
 0xc2f   :  { %v10443_v7 = vmul.f32 %v16541_v39, %v18256_v40  ;;  %v10372_v25 = vpop.xlane.xlu0 %10371  ;;  %16548 = vrcp.f32 %v10360_v22 }
 0xc30   :  { %16550 = vrcp.f32 %v10369_v56 }
 0xc31   :  { %14960 = vmatprep.mubr.msk.f32.mxu0 %vm3920_vm6, %v10443_v7  ;;  %16552 = vrcp.f32 %v10378_v14  ;;  %v18670_v7 = vmov 0.0  }
 0xc33   :  { %v10384_v43 = vpop.xlane.xlu0 %10383 }
 0xc36   :  { %v16543_v31 = vpop.eup %16542 }
 0xc37   :  { %v10445_v55 = vmul.f32 %v16543_v31, %v18280_v58  ;;  %v10381_v4 = vpop.xlane.xlu0 %10380  ;;  %v16545_v40 = vpop.eup %16544  ;;  %v16584_v31 = vld [vmem:[#allocation8 + $0x18] sm:$0xff] }
 0xc38   :  { %v16547_v21 = vpop.eup %16546  ;;  %v10446_v58 = vmul.f32 %v16545_v40, %v18275_v27 }
 0xc39   :  { %14967 = vmatprep.mubr.msk.f32.mxu1 %vm3920_vm6, %v10445_v55  ;;  %v10449_v60 = vmul.f32 %v16547_v21, %v18285_v59  ;;  %v16549_v59 = vpop.eup %16548 }
 0xc3a   :  { %v16551_v11 = vpop.eup %16550  ;;  %v10444_v19 = vmul.f32 %v16549_v59, %v18253_v17 }
 0xc3b   :  { %v10390_v23 = vpop.xlane.xlu0 %10389  ;;  %v16553_v29 = vpop.eup %16552  ;;  %v10447_v16 = vmul.f32 %v16551_v11, %v18262_v0 }
 0xc3c   :  { %v10450_v22 = vmul.f32 %v16553_v29, %v18272_v12 }
 0xc3f   :  { %v10387_v15 = vpop.xlane.xlu0 %10386 }
 0xc40   :  { %16554 = vrcp.f32 %v10387_v15 }
 0xc41   :  { %16556 = vrcp.f32 %v10372_v25 }
 0xc42   :  { %16558 = vrcp.f32 %v10381_v4 }
 0xc43   :  { %16560 = vrcp.f32 %v10384_v43  ;;  %v16586_v43 = vld [vmem:[#allocation8 + $0x28] sm:$0xff] }
 0xc44   :  { %16562 = vrcp.f32 %v10390_v23 }
 0xc4a   :  { %v16555_v45 = vpop.eup %16554 }
 0xc4b   :  { %v16557_v36 = vpop.eup %16556  ;;  %v10453_v37 = vmul.f32 %v16555_v45, %v18324_v51 }
 0xc4c   :  { %v16559_v33 = vpop.eup %16558  ;;  %v10448_v17 = vmul.f32 %v16557_v36, %v18298_v52  ;;  %v16581_v52 = vld [vmem:[#allocation8] sm:$0xff] }
 0xc4d   :  { %v10451_v0 = vmul.f32 %v16559_v33, %v18311_v30  ;;  %v16561_v12 = vpop.eup %16560 }
 0xc4e   :  { %v10452_v51 = vmul.f32 %v16561_v12, %v18303_v46  ;;  %v16563_v32 = vpop.eup %16562  ;;  %v13150_v12 = vld [vmem:[#allocation10] sm:$0xff] }
 0xc4f   :  { %v10454_v46 = vmul.f32 %v16563_v32, %v18315_v57  ;;  %v16585_v57 = vld [vmem:[#allocation8 + $0x20] sm:$0xff] }
 0xc50   :  { %v8535_v28 = vpop.trf.xlu1 }
 0xc54   :  { %v8536_v2 = vpop.trf.xlu1 }
 0xc55   :  { %v15634_v10 = vpack.c.bf16 %v8536_v2, %v8535_v28  ;;  %v16587_v28 = vld [vmem:[#allocation8 + $0x30] sm:$0xff] }
 0xc57   :  { %15635 = vmatprep.subr.bf16.mxu1 %v15634_v10 }
 0xc58   :  { %v8567_v18 = vpop.trf.xlu1  ;;  %15637 = vmatpush3.bf16.msra.mxu1 %v15634_v10 }
 0xc5b   :  { %14968 = vmatmul.mubr.msk.f32.vlgmr.msra.gmra.mrb[72].mxu1 %vm3920_vm6, %v10446_v58 }
 0xc5c   :  { %v8568_v8 = vpop.trf.xlu1  ;;  %14981 = vmatprep.mubr.msk.f32.mxu1 %vm3920_vm6, %v10449_v60  ;;  %v16589_v60 = vld [vmem:[#allocation8 + $0x40] sm:$0xff] }
 0xc5d   :  { %v15638_v38 = vpack.c.bf16 %v8568_v8, %v8567_v18  ;;  %v16588_v18 = vld [vmem:[#allocation8 + $0x38] sm:$0xff] }
 0xc5f   :  { %v8503_v54 = vpop.trf.xlu0 }
 0xc60   :  { %v8599_v44 = vpop.trf.xlu1 }
 0xc63   :  { %v8504_v5 = vpop.trf.xlu0 }
 0xc64   :  { %v15630_v27 = vpack.c.bf16 %v8504_v5, %v8503_v54  ;;  %v8600_v63 = vpop.trf.xlu1 }
 0xc65   :  { %v15642_v9 = vpack.c.bf16 %v8600_v63, %v8599_v44  ;;  %v16590_v44 = vld [vmem:[#allocation8 + $0x48] sm:$0xff]  ;;  %v16592_v63 = vld [vmem:[#allocation8 + $0x58] sm:$0xff] }
 0xc66   :  { %15631 = vmatprep.subr.bf16.mxu0 %v15630_v27 }
 0xc67   :  { %15633 = vmatpush3.bf16.msra.mxu0 %v15630_v27  ;;  %15643 = vmatprep.subr.bf16.mxu1 %v15642_v9  ;;  %v16591_v27 = vld [vmem:[#allocation8 + $0x50] sm:$0xff] }
 0xc68   :  { %v8631_v1 = vpop.trf.xlu1  ;;  %15645 = vmatpush3.bf16.msra.mxu1 %v15642_v9  ;;  %15639 = vmatprep.subr.bf16.mxu0 %v15638_v38 }
 0xc6a   :  { %14961 = vmatmul.mubr.msk.f32.vlgmr.msra.gmra.mrb[82].mxu0 %vm3920_vm6, %v10444_v19  ;;  %v14892_v34 = vpop.f32.mrb[72].mxu0 }
 0xc6b   :  { %15641 = vmatpush3.bf16.msra.mxu0 %v15638_v38  ;;  %14974 = vmatprep.mubr.msk.f32.mxu0 %vm3920_vm6, %v10447_v16  ;;  %v10527_v26 = vpop.f32.mrb[73].mxu0  ;;  %v16593_v16 = vld [vmem:[#allocation8 + $0x60] sm:$0xff] }
 0xc6c   :  { %14982 = vmatmul.mubr.msk.f32.vlgmr.msra.gmra.mrb[74].mxu1 %vm3920_vm6, %v10450_v22  ;;  %v8632_v62 = vpop.trf.xlu1 }
 0xc6d   :  { %v15646_v49 = vpack.c.bf16 %v8632_v62, %v8631_v1  ;;  %14995 = vmatprep.mubr.msk.f32.mxu1 %vm3920_vm6, %v10453_v37  ;;  %v16596_v62 = vld [vmem:[#allocation8 + $0x78] sm:$0xff] }
 0xc6e   :  { %14975 = vmatmul.mubr.msk.f32.vlgmr.msra.gmra.mrb[84].mxu0 %vm3920_vm6, %v10448_v17  ;;  %v16595_v17 = vld [vmem:[#allocation8 + $0x70] sm:$0xff] }
 0xc6f   :  { %14988 = vmatprep.mubr.msk.f32.mxu0 %vm3920_vm6, %v10451_v0  ;;  %15647 = vmatprep.subr.bf16.mxu0 %v15646_v49  ;;  %v13153_v0 = vld [vmem:[#allocation10 + $0x18] sm:$0xff] }
 0xc70   :  { %v8663_v41 = vpop.trf.xlu1  ;;  %15649 = vmatpush3.bf16.msra.mxu0 %v15646_v49  ;;  %v13151_v49 = vld [vmem:[#allocation10 + $0x8] sm:$0xff] }
 0xc71   :  { %14998 = vmatprep.subr.mxu0 %v16581_v52 }
 0xc72   :  { %v14899_v47 = vpop.f32.mrb[62].mxu1 }
 0xc73   :  { %v10608_v53 = vpop.f32.mrb[63].mxu1  ;;  %14989 = vmatmul.mubr.msk.f32.vlgmr.msra.gmra.mrb[86].mxu0 %vm3920_vm6, %v10452_v51  ;;  %v13152_v51 = vld [vmem:[#allocation10 + $0x10] sm:$0xff] }
 0xc74   :  { %v8664_v6 = vpop.trf.xlu1  ;;  %15000 = vmatprep.mubr.msk.f32.mxu0 %vm2495_vm4, %v10527_v26  ;;  %14999 = vmatpush3.msra.mxu0 %v16581_v52  ;;  %v15656_v52 = vpack.c.bf16 %v13152_v51, %v13150_v12 }
 0xc75   :  { %v15650_v30 = vpack.c.bf16 %v8664_v6, %v8663_v41  ;;  %15003 = vmatprep.subr.mxu0 %v16582_v24  ;;  %v15654_v41 = vpack.c.bf16 %v13153_v0, %v13151_v49 }
 0xc77   :  { %15651 = vmatprep.subr.bf16.mxu1 %v15650_v30  ;;  %15001 = vmatmul.mubr.msk.f32.vlgmr.msra.gmra.mrb[88].mxu0 %vm2495_vm4, %v14892_v34  ;;  %v16594_v34 = vld [vmem:[#allocation8 + $0x68] sm:$0xff] }
 0xc78   :  { %15653 = vmatpush3.bf16.msra.mxu1 %v15650_v30  ;;  %15005 = vmatprep.mubr.msk.f32.mxu0 %vm2495_vm4, %v10608_v53 }
 0xc79   :  { %15004 = vmatpush3.msra.mxu0 %v16582_v24  ;;  %15655 = vmatprep.subr.bf16.mxu1 %v15654_v41 }
 0xc7a   :  { %v14906_v35 = vpop.f32.mrb[74].mxu0  ;;  %15008 = vmatprep.subr.mxu0 %v16583_v20 }
 0xc7b   :  { %v10689_v39 = vpop.f32.mrb[75].mxu0  ;;  %14996 = vmatmul.mubr.msk.f32.vlgmr.msra.gmra.mrb[76].mxu1 %vm3920_vm6, %v10454_v46  ;;  %v18671_v46 = vld [vmem:[#allocation23_spill] sm:$0xff] }
 0xc7c   :  { %13258 = vmatprep.mubr.f32.mxu1 %v18670_v7  ;;  %15657 = vmatpush1.bf16.msra.mxu1 %v15656_v52 }
 0xc7f   :  { %15006 = vmatmul.mubr.msk.f32.vlgmr.msra.gmra.mrb[88].mxu0 %vm2495_vm4, %v14899_v47 }
 0xc80   :  { %15010 = vmatprep.mubr.msk.f32.mxu0 %vm2495_vm4, %v10689_v39  ;;  %15009 = vmatpush3.msra.mxu0 %v16583_v20  ;;  %v18672_v39 = vld [vmem:[#allocation25_spill] sm:$0xff] }
 0xc81   :  { %15013 = vmatprep.subr.mxu0 %v16584_v31 }
 0xc82   :  { %v14913_v55 = vpop.f32.mrb[64].mxu1 }
 0xc83   :  { %v10770_v56 = vpop.f32.mrb[65].mxu1 }
 0xc87   :  { %15011 = vmatmul.mubr.msk.f32.vlgmr.msra.gmra.mrb[88].mxu0 %vm2495_vm4, %v14906_v35 }
 0xc88   :  { %15015 = vmatprep.mubr.msk.f32.mxu0 %vm2495_vm4, %v10770_v56  ;;  %15014 = vmatpush3.msra.mxu0 %v16584_v31  ;;  %v13155_v56 = vld [vmem:[#allocation10 + $0x28] sm:$0xff] }
 0xc89   :  { %15018 = vmatprep.subr.mxu0 %v16585_v57 }
 0xc8a   :  { %v14920_v25 = vpop.f32.mrb[76].mxu0 }
 0xc8b   :  { %v10851_v14 = vpop.f32.mrb[77].mxu0 }
 0xc8f   :  { %15016 = vmatmul.mubr.msk.f32.vlgmr.msra.gmra.mrb[88].mxu0 %vm2495_vm4, %v14913_v55 }
 0xc90   :  { %15020 = vmatprep.mubr.msk.f32.mxu0 %vm2495_vm4, %v10851_v14  ;;  %15019 = vmatpush3.msra.mxu0 %v16585_v57  ;;  %v13157_v57 = vld [vmem:[#allocation10 + $0x38] sm:$0xff]  ;;  %v13156_v14 = vld [vmem:[#allocation10 + $0x30] sm:$0xff] }
 0xc91   :  { %15023 = vmatprep.subr.mxu0 %v16586_v43 }
 0xc93   :  { %v14927_v48 = vpop.f32.mrb[66].mxu1 }
 0xc94   :  { %v10932_v4 = vpop.f32.mrb[67].mxu1 }
 0xc97   :  { %15021 = vmatmul.mubr.msk.f32.vlgmr.msra.gmra.mrb[88].mxu0 %vm2495_vm4, %v14920_v25  ;;  %v13154_v25 = vld [vmem:[#allocation10 + $0x20] sm:$0xff] }
 0xc98   :  { %15025 = vmatprep.mubr.msk.f32.mxu0 %vm2495_vm4, %v10932_v4  ;;  %15024 = vmatpush3.msra.mxu0 %v16586_v43  ;;  %v15660_v43 = vpack.c.bf16 %v13156_v14, %v13154_v25 }
 0xc99   :  { %15028 = vmatprep.subr.mxu0 %v16587_v28 }
 0xc9a   :  { %v14934_v2 = vpop.f32.mrb[78].mxu0 }
 0xc9b   :  { %v11013_v23 = vpop.f32.mrb[79].mxu0 }
 0xc9c   :  { %v13090_v53 = vpop.xlane.xlu1 %13089 }
 0xc9d   :  { %v13092_v10 = vpop.xlane.xlu0 %13091  ;;  %v13098_v24 = vmul.f32 0.0078125, %v13090_v53 }
 0xc9e   :  { %v13099_v40 = vmul.f32 0.0078125, %v13092_v10  ;;  %v13163_v10 = vld [vmem:[#allocation10 + $0x68] sm:$0xff] }
 0xc9f   :  { %15026 = vmatmul.mubr.msk.f32.vlgmr.msra.gmra.mrb[88].mxu0 %vm2495_vm4, %v14927_v48  ;;  %v18454_v20 = vsub.f32 %v18366_v13, %v13098_v24  ;;  %v13159_v48 = vld [vmem:[#allocation10 + $0x48] sm:$0xff]  ;;  %v13161_v13 = vld [vmem:[#allocation10 + $0x58] sm:$0xff] }
 0xca0   :  { %v18423_v21 = vsub.f32 %v18369_v50, %v13099_v40  ;;  %15030 = vmatprep.mubr.msk.f32.mxu0 %vm2495_vm4, %v11013_v23  ;;  %15029 = vmatpush3.msra.mxu0 %v16587_v28  ;;  %v15662_v4 = vpack.c.bf16 %v13161_v13, %v13159_v48  ;;  %v13158_v28 = vld [vmem:[#allocation10 + $0x40] sm:$0xff]  ;;  %v13165_v40 = vld [vmem:[#allocation10 + $0x78] sm:$0xff] }
 0xca1   :  { %15033 = vmatprep.subr.mxu0 %v16588_v18  ;;  %v13106_v55 = vmul.f32 %v18454_v20, %v18454_v20 }
 0xca2   :  { %v13107_v58 = vmul.f32 %v18423_v21, %v18423_v21 }
 0xca4   :  { %13112 = vadd.xlane.f32.xlu0 %v13107_v58  ;;  %v13162_v58 = vld [vmem:[#allocation10 + $0x60] sm:$0xff] }
 0xca7   :  { %15031 = vmatmul.mubr.msk.f32.vlgmr.msra.gmra.mrb[88].mxu0 %vm2495_vm4, %v14934_v2  ;;  %v13160_v2 = vld [vmem:[#allocation10 + $0x50] sm:$0xff] }
 0xca8   :  { %15034 = vmatpush3.msra.mxu0 %v16588_v18  ;;  %v15664_v23 = vpack.c.bf16 %v13160_v2, %v13158_v28  ;;  %v15666_v18 = vpack.c.bf16 %v13165_v40, %v13163_v10  ;;  %v13291_v28 = vld [vmem:[#allocation11] sm:$0xff]  ;;  %v13309_v10 = vld [vmem:[#allocation11 + $0x90] sm:$0xff]  ;;  %v13310_v40 = vld [vmem:[#allocation11 + $0x98] sm:$0xff] }
 0xca9   :  { %15038 = vmatprep.subr.mxu0 %v16589_v60 }
 0xcf8   :  { %v14941_v15 = vpop.f32.mrb[68].mxu1 }
 0xcf9   :  { %v11094_v8 = vpop.f32.mrb[69].mxu1 }
 0xcfa   :  { %15035 = vmatprep.mubr.msk.f32.mxu0 %vm2495_vm4, %v11094_v8  ;;  %v13167_v8 = vld [vmem:[#allocation10 + $0x88] sm:$0xff] }
 0xcfb   :  { %15036 = vmatmul.mubr.msk.f32.vlgmr.msra.gmra.mrb[88].mxu0 %vm2495_vm4, %v14941_v15 }
 0xcfc   :  { %v14948_v50 = vpop.f32.mrb[80].mxu0  ;;  %15039 = vmatpush3.msra.mxu0 %v16589_v60  ;;  %v13164_v60 = vld [vmem:[#allocation10 + $0x70] sm:$0xff] }
 0xcfd   :  { %v11175_v54 = vpop.f32.mrb[81].mxu0  ;;  %15043 = vmatprep.subr.mxu0 %v16590_v44  ;;  %v15668_v15 = vpack.c.bf16 %v13164_v60, %v13162_v58  ;;  %v15690_v58 = vpack.c.bf16 %v13310_v40, %v13309_v10  ;;  %v13293_v60 = vld [vmem:[#allocation11 + $0x10] sm:$0xff] }
 0xcfe   :  { %15040 = vmatprep.mubr.msk.f32.mxu0 %vm2495_vm4, %v11175_v54 }
 0xd00   :  { %v14955_v5 = vpop.f32.mrb[70].mxu1 }
 0xd01   :  { %v11256_v38 = vpop.f32.mrb[71].mxu1 }
 0xd03   :  { %15041 = vmatmul.mubr.msk.f32.vlgmr.msra.gmra.mrb[88].mxu0 %vm2495_vm4, %v14948_v50  ;;  %v13169_v50 = vld [vmem:[#allocation10 + $0x98] sm:$0xff] }
 0xd04   :  { %15045 = vmatprep.mubr.msk.f32.mxu0 %vm2495_vm4, %v11256_v38  ;;  %15044 = vmatpush3.msra.mxu0 %v16590_v44  ;;  %v15670_v54 = vpack.c.bf16 %v13169_v50, %v13167_v8  ;;  %v13166_v44 = vld [vmem:[#allocation10 + $0x80] sm:$0xff]  ;;  %v13312_v50 = vld [vmem:[#allocation11 + $0xa8] sm:$0xff] }
 0xd05   :  { %15048 = vmatprep.subr.mxu0 %v16591_v27  ;;  %v13311_v8 = vld [vmem:[#allocation11 + $0xa0] sm:$0xff] }
 0xd0b   :  { %15046 = vmatmul.mubr.msk.f32.vlgmr.msra.gmra.mrb[88].mxu0 %vm2495_vm4, %v14955_v5  ;;  %v13168_v5 = vld [vmem:[#allocation10 + $0x90] sm:$0xff] }
 0xd0c   :  { %15049 = vmatpush3.msra.mxu0 %v16591_v27  ;;  %v15672_v38 = vpack.c.bf16 %v13168_v5, %v13166_v44  ;;  %v13171_v27 = vld [vmem:[#allocation10 + $0xa8] sm:$0xff]  ;;  %v15694_v44 = vpack.c.bf16 %v13312_v50, %v13311_v8  ;;  %v13295_v5 = vld [vmem:[#allocation11 + $0x20] sm:$0xff] }
 0xd0d   :  { %15053 = vmatprep.subr.mxu0 %v16592_v63 }
 0xd2e   :  { %v14969_v59 = vpop.f32.mrb[72].mxu1 }
 0xd2f   :  { %v11418_v9 = vpop.f32.mrb[73].mxu1 }
 0xd31   :  { %v13113_v49 = vpop.xlane.xlu0 %13112 }
 0xd32   :  { %v13119_v41 = vmul.f32 0.0078125, %v13113_v49  ;;  %v13319_v49 = vld [vmem:[#allocation11 + $0xe0] sm:$0xff] }
 0xd3d   :  { %v14962_v11 = vpop.f32.mrb[82].mxu0 }
 0xd3e   :  { %v11337_v29 = vpop.f32.mrb[83].mxu0 }
 0xd3f   :  { %v14983_v45 = vpop.f32.mrb[74].mxu1  ;;  %15050 = vmatprep.mubr.msk.f32.mxu0 %vm2495_vm4, %v11337_v29  ;;  %v13175_v29 = vld [vmem:[#allocation10 + $0xc8] sm:$0xff] }
 0xd40   :  { %v11580_v19 = vpop.f32.mrb[75].mxu1  ;;  %15051 = vmatmul.mubr.msk.f32.vlgmr.msra.gmra.mrb[88].mxu0 %vm2495_vm4, %v14962_v11  ;;  %v13172_v11 = vld [vmem:[#allocation10 + $0xb0] sm:$0xff] }
 0xd41   :  { %v14976_v1 = vpop.f32.mrb[84].mxu0  ;;  %15054 = vmatpush3.msra.mxu0 %v16592_v63  ;;  %15055 = vmatprep.mubr.msk.f32.mxu0 %vm2495_vm4, %v11418_v9  ;;  %v13173_v63 = vld [vmem:[#allocation10 + $0xb8] sm:$0xff] }
 0xd42   :  { %v11499_v36 = vpop.f32.mrb[85].mxu0  ;;  %15058 = vmatprep.subr.mxu0 %v16593_v16  ;;  %v15674_v9 = vpack.c.bf16 %v13173_v63, %v13171_v27  ;;  %v13313_v27 = vld [vmem:[#allocation11 + $0xb0] sm:$0xff]  ;;  %v13314_v63 = vld [vmem:[#allocation11 + $0xb8] sm:$0xff] }
 0xd46   :  { %v14990_v33 = vpop.f32.mrb[86].mxu0 }
 0xd47   :  { %v11661_v22 = vpop.f32.mrb[87].mxu0 }
 0xd48   :  { %15056 = vmatmul.mubr.msk.f32.vlgmr.msra.gmra.mrb[88].mxu0 %vm2495_vm4, %v14969_v59  ;;  %v13170_v59 = vld [vmem:[#allocation10 + $0xa0] sm:$0xff] }
 0xd49   :  { %15059 = vmatpush3.msra.mxu0 %v16593_v16  ;;  %15060 = vmatprep.mubr.msk.f32.mxu0 %vm2495_vm4, %v11499_v36  ;;  %v13174_v36 = vld [vmem:[#allocation10 + $0xc0] sm:$0xff]  ;;  %v13176_v16 = vld [vmem:[#allocation10 + $0xd0] sm:$0xff] }
 0xd4a   :  { %15063 = vmatprep.subr.mxu0 %v16594_v34 }
 0xd4e   :  { %v14997_v26 = vpop.f32.mrb[76].mxu1 }
 0xd4f   :  { %v11742_v37 = vpop.f32.mrb[77].mxu1 }
 0xd50   :  { %15061 = vmatmul.mubr.msk.f32.vlgmr.msra.gmra.mrb[88].mxu0 %vm2495_vm4, %v14976_v1 }
 0xd51   :  { %15064 = vmatpush3.msra.mxu0 %v16594_v34  ;;  %15065 = vmatprep.mubr.msk.f32.mxu0 %vm2495_vm4, %v11580_v19  ;;  %v15676_v19 = vpack.c.bf16 %v13172_v11, %v13170_v59  ;;  %v15680_v34 = vpack.c.bf16 %v13176_v16, %v13174_v36  ;;  %v13297_v11 = vld [vmem:[#allocation11 + $0x30] sm:$0xff]  ;;  %v13299_v16 = vld [vmem:[#allocation11 + $0x40] sm:$0xff] }
 0xd52   :  { %15068 = vmatprep.subr.mxu0 %v16595_v17 }
 0xd58   :  { %15066 = vmatmul.mubr.msk.f32.vlgmr.msra.gmra.mrb[88].mxu0 %vm2495_vm4, %v14983_v45  ;;  %v13177_v45 = vld [vmem:[#allocation10 + $0xd8] sm:$0xff] }
 0xd59   :  { %15069 = vmatpush3.msra.mxu0 %v16595_v17  ;;  %15070 = vmatprep.mubr.msk.f32.mxu0 %vm2495_vm4, %v11661_v22  ;;  %v15678_v1 = vpack.c.bf16 %v13177_v45, %v13175_v29  ;;  %v13181_v22 = vld [vmem:[#allocation10 + $0xf8] sm:$0xff]  ;;  %v13180_v17 = vld [vmem:[#allocation10 + $0xf0] sm:$0xff]  ;;  %v13315_v45 = vld [vmem:[#allocation11 + $0xc0] sm:$0xff] }
 0xd5a   :  { %15073 = vmatprep.subr.mxu0 %v16596_v62  ;;  %v13298_v29 = vld [vmem:[#allocation11 + $0x38] sm:$0xff] }
 0xd60   :  { %15071 = vmatmul.mubr.msk.f32.vlgmr.msra.gmra.mrb[88].mxu0 %vm2495_vm4, %v14990_v33  ;;  %v13179_v33 = vld [vmem:[#allocation10 + $0xe8] sm:$0xff] }
 0xd61   :  { %15074 = vmatpush3.msra.mxu0 %v16596_v62  ;;  %15075 = vmatprep.mubr.msk.f32.mxu0 %vm2495_vm4, %v11742_v37  ;;  %v13178_v37 = vld [vmem:[#allocation10 + $0xe0] sm:$0xff] }
 0xd62   :  { %v15684_v62 = vpack.c.bf16 %v13180_v17, %v13178_v37  ;;  %v13301_v17 = vld [vmem:[#allocation11 + $0x50] sm:$0xff] }
 0xd68   :  { %15076 = vmatmul.mubr.msk.f32.vlgmr.msra.gmra.mrb[88].mxu0 %vm2495_vm4, %v14997_v26  ;;  %v15682_v26 = vpack.c.bf16 %v13181_v22, %v13179_v33  ;;  %v13300_v33 = vld [vmem:[#allocation11 + $0x48] sm:$0xff]  ;;  %v13317_v22 = vld [vmem:[#allocation11 + $0xd0] sm:$0xff] }
 0xe3b   :  { %v15077_v47 = vpop.f32.mrb[88].mxu0 }
 0xe3c   :  { %v13038_v6 = vpop.f32.mrb[89].mxu0  ;;  %v13084_v32 = vadd.f32 %v15077_v47, %v18359_v3 }
 0xe3d   :  { %v13083_v30 = vadd.f32 %v18359_v3, %v13038_v6  ;;  %v15658_v3 = vpack.c.bf16 %v13157_v57, %v13155_v56  ;;  %v13123_v6 = vadd.f32 1e-05, %v13119_v41  ;;  %v13144_v56 = vsub.s32 4, %v18665_v42 }
 0xe3e   :  { %v18457_v31 = vadd.f32 %v13084_v32, %v18672_v39 }
 0xe3f   :  { %v18450_v35 = vadd.f32 %v13083_v30, %v18671_v46  ;;  %15659 = vmatprep.subr.bf16.mxu1 %v15658_v3  ;;  %16564 = vrsqrt.f32 %v13123_v6  ;;  %v13321_v6 = vld [vmem:[#allocation11 + $0xf0] sm:$0xff] }
 0xe40   :  { %15661 = vmatpush1.bf16.msra.mxu1 %v15660_v43  ;;  %v18481_v43 = vrot.slane %v18354_v61, %v13144_v56 }
 0xe41   :  { %13093 = vadd.xlane.f32.xlu1 %v18450_v35  ;;  %15663 = vmatprep.subr.bf16.mxu1 %v15662_v4  ;;  %v13308_v4 = vld [vmem:[#allocation11 + $0x88] sm:$0xff] }
 0xe44   :  { %15665 = vmatpush1.bf16.msra.mxu1 %v15664_v23  ;;  %v13292_v23 = vld [vmem:[#allocation11 + $0x8] sm:$0xff] }
 0xe45   :  { %13095 = vadd.xlane.f32.xlu1 %v18457_v31  ;;  %15667 = vmatprep.subr.bf16.mxu1 %v15666_v18  ;;  %v15688_v18 = vpack.c.bf16 %v13292_v23, %v13291_v28 }
 0xe48   :  { %15669 = vmatpush1.bf16.msra.mxu1 %v15668_v15  ;;  %v13294_v15 = vld [vmem:[#allocation11 + $0x18] sm:$0xff] }
 0xe49   :  { %13110 = vadd.xlane.f32.xlu1 %v13106_v55  ;;  %15671 = vmatprep.subr.bf16.mxu1 %v15670_v54  ;;  %v16565_v55 = vpop.eup %16564  ;;  %v15692_v54 = vpack.c.bf16 %v13294_v15, %v13293_v60  ;;  %v18674_v60 = vld [vmem:[#allocation43_spill] sm:$0xff] }
 0xe4a   :  { %v13131_v25 = vmul.f32 %v16565_v55, %v18423_v21  ;;  %v13307_v21 = vld [vmem:[#allocation11 + $0x80] sm:$0xff] }
 0xe4b   :  { %v15686_v2 = vpack.c.bf16 %v13308_v4, %v13307_v21 }
 0xe4c   :  { %15673 = vmatpush1.bf16.msra.mxu1 %v15672_v38  ;;  %v13296_v38 = vld [vmem:[#allocation11 + $0x28] sm:$0xff] }
 0xe4d   :  { %15675 = vmatprep.subr.bf16.mxu1 %v15674_v9  ;;  %v15696_v59 = vpack.c.bf16 %v13296_v38, %v13295_v5  ;;  %v15698_v9 = vpack.c.bf16 %v13314_v63, %v13313_v27 }
 0xe50   :  { %15677 = vmatpush1.bf16.msra.mxu1 %v15676_v19  ;;  %v13316_v19 = vld [vmem:[#allocation11 + $0xc8] sm:$0xff] }
 0xe51   :  { %15679 = vmatprep.subr.bf16.mxu1 %v15678_v1  ;;  %v15700_v1 = vpack.c.bf16 %v13298_v29, %v13297_v11  ;;  %v15702_v36 = vpack.c.bf16 %v13316_v19, %v13315_v45 }
 0xe54   :  { %15681 = vmatpush1.bf16.msra.mxu1 %v15680_v34  ;;  %v13318_v34 = vld [vmem:[#allocation11 + $0xd8] sm:$0xff] }
 0xe55   :  { %15683 = vmatprep.subr.bf16.mxu1 %v15682_v26  ;;  %v15704_v26 = vpack.c.bf16 %v13300_v33, %v13299_v16  ;;  %v15706_v37 = vpack.c.bf16 %v13318_v34, %v13317_v22 }
 0xe58   :  { %15685 = vmatpush1.bf16.msra.mxu1 %v15684_v62  ;;  %v13302_v62 = vld [vmem:[#allocation11 + $0x58] sm:$0xff] }
 0xe59   :  { %15687 = vmatprep.subr.bf16.mxu1 %v15686_v2 }
 0xece   :  { %v13094_v0 = vpop.xlane.xlu1 %13093 }
 0xecf   :  { %v13100_v12 = vmul.f32 0.0078125, %v13094_v0  ;;  %v13320_v0 = vld [vmem:[#allocation11 + $0xe8] sm:$0xff] }
 0xed0   :  { %v15710_v41 = vpack.c.bf16 %v13320_v0, %v13319_v49 }
 0xed1   :  { %v18463_v51 = vsub.f32 %v18450_v35, %v13100_v12  ;;  %v13136_v35 = vsub.s32 3, %v18665_v42  ;;  %v15708_v12 = vpack.c.bf16 %v13302_v62, %v13301_v17 }
 0xed2   :  { %v13096_v52 = vpop.xlane.xlu1 %13095 }
 0xed3   :  { %v13101_v47 = vmul.f32 0.0078125, %v13096_v52  ;;  %v13108_v53 = vmul.f32 %v18463_v51, %v18463_v51  ;;  %v13303_v52 = vld [vmem:[#allocation11 + $0x60] sm:$0xff] }
 0xed5   :  { %v18468_v30 = vsub.f32 %v18457_v31, %v13101_v47  ;;  %13114 = vadd.xlane.f32.xlu1 %v13108_v53  ;;  %v18476_v31 = vrot.slane %v18354_v61, %v13136_v35  ;;  %v13304_v47 = vld [vmem:[#allocation11 + $0x68] sm:$0xff] }
 0xed6   :  { %v13111_v24 = vpop.xlane.xlu1 %13110  ;;  %v15712_v53 = vpack.c.bf16 %v13304_v47, %v13303_v52 }
 0xed7   :  { %v13118_v32 = vmul.f32 0.0078125, %v13111_v24  ;;  %v13109_v46 = vmul.f32 %v18468_v30, %v18468_v30  ;;  %v13139_v13 = vmul.f32 %v18476_v31, %v13131_v25  ;;  %v13322_v24 = vld [vmem:[#allocation11 + $0xf8] sm:$0xff] }
 0xed9   :  { %v13122_v39 = vadd.f32 1e-05, %v13118_v32  ;;  %13116 = vadd.xlane.f32.xlu0 %v13109_v46  ;;  %v15714_v32 = vpack.c.bf16 %v13322_v24, %v13321_v6  ;;  %v13305_v46 = vld [vmem:[#allocation11 + $0x70] sm:$0xff] }
 0xedb   :  { %16566 = vrsqrt.f32 %v13122_v39  ;;  %v13306_v39 = vld [vmem:[#allocation11 + $0x78] sm:$0xff] }
 0xedc   :  { %v15716_v35 = vpack.c.bf16 %v13306_v39, %v13305_v46 }
 0xee5   :  { %v16567_v57 = vpop.eup %16566 }
 0xee6   :  { %v13130_v3 = vmul.f32 %v16567_v57, %v18454_v20  ;;  %v18490_v20 = vadd.f32 %v18481_v43, %v13139_v13 }
 0xee8   :  { %v13138_v14 = vmul.f32 %v18476_v31, %v13130_v3 }
 0xeea   :  { %v18484_v48 = vadd.f32 %v18481_v43, %v13138_v14 }
 0xeec   :  { %13259 = vmatmul.mubr.f32.vlgmr.msra.gmra.mrb[78].mxu1 %v18484_v48 }
 0xeed   :  { %13264 = vmatprep.mubr.f32.mxu1 %v18670_v7  ;;  %15689 = vmatpush3.bf16.msra.mxu1 %v15688_v18  ;;  %v18673_v18 = vld [vmem:[#allocation21_spill] sm:$0xff] }
 0xeee   :  { %15691 = vmatprep.subr.bf16.mxu1 %v15690_v58 }
 0xef0   :  { %13265 = vmatmul.mubr.f32.gmra.mrb[80].mxu1 %v18490_v20 }
 0xef1   :  { %13270 = vmatprep.mubr.f32.mxu1 %v18670_v7  ;;  %15693 = vmatpush3.bf16.msra.mxu1 %v15692_v54 }
 0xef2   :  { %15695 = vmatprep.subr.bf16.mxu1 %v15694_v44 }
 0xef5   :  { %15697 = vmatpush3.bf16.msra.mxu1 %v15696_v59 }
 0xef6   :  { %15699 = vmatprep.subr.bf16.mxu1 %v15698_v9 }
 0xef9   :  { %15701 = vmatpush3.bf16.msra.mxu1 %v15700_v1 }
 0xefa   :  { %15703 = vmatprep.subr.bf16.mxu1 %v15702_v36 }
 0xefd   :  { %15705 = vmatpush3.bf16.msra.mxu1 %v15704_v26  ;;  %v13325_v26 = vsub.s32 5, %v18665_v42 }
 0xefe   :  { %15707 = vmatprep.subr.bf16.mxu1 %v15706_v37 }
 0xeff   :  { %v13326_v17 = vrot.slane %v18354_v61, %v13325_v26 }
 0xf01   :  { %15709 = vmatpush3.bf16.msra.mxu1 %v15708_v12 }
 0xf02   :  { %15711 = vmatprep.subr.bf16.mxu1 %v15710_v41 }
 0xf05   :  { %15713 = vmatpush3.bf16.msra.mxu1 %v15712_v53 }
 0xf06   :  { %15715 = vmatprep.subr.bf16.mxu1 %v15714_v32 }
 0xf09   :  { %15717 = vmatpush3.bf16.msra.mxu1 %v15716_v35 }
 0xf62   :  { %v13115_v55 = vpop.xlane.xlu1 %13114 }
 0xf63   :  { %v13120_v56 = vmul.f32 0.0078125, %v13115_v55 }
 0xf65   :  { %v13124_v57 = vadd.f32 1e-05, %v13120_v56 }
 0xf66   :  { %v13117_v3 = vpop.xlane.xlu0 %13116 }
 0xf67   :  { %16568 = vrsqrt.f32 %v13124_v57  ;;  %v13121_v25 = vmul.f32 0.0078125, %v13117_v3 }
 0xf69   :  { %v13125_v14 = vadd.f32 1e-05, %v13121_v25 }
 0xf6b   :  { %16570 = vrsqrt.f32 %v13125_v14 }
 0xf71   :  { %v16569_v13 = vpop.eup %16568 }
 0xf72   :  { %v13132_v21 = vmul.f32 %v16569_v13, %v18463_v51  ;;  %v13182_v51 = vld [vmem:[%s18545_s7] sm:$0x3] }
 0xf73   :  { %v13187_v58 = vrot.slane %v13182_v51, %v18673_v18  ;;  %v13191_v15 = vrot.slane %v13182_v51, %v18674_v60 }
 0xf74   :  { %v13140_v4 = vmul.f32 %v18476_v31, %v13132_v21 }
 0xf75   :  { %v16571_v28 = vpop.eup %16570 }
 0xf76   :  { %v18497_v2 = vadd.f32 %v18481_v43, %v13140_v4  ;;  %v13133_v23 = vmul.f32 %v16571_v28, %v18468_v30 }
 0xf78   :  { %13271 = vmatmul.mubr.f32.gmra.mrb[82].mxu1 %v18497_v2  ;;  %v13141_v10 = vmul.f32 %v18476_v31, %v13133_v23 }
 0xf79   :  { %13276 = vmatprep.mubr.f32.mxu1 %v18670_v7 }
 0xf7a   :  { %v18504_v40 = vadd.f32 %v18481_v43, %v13141_v10 }
 0xf7c   :  { %13277 = vmatmul.mubr.f32.gmra.mrb[84].mxu1 %v18504_v40 }
 0xfbf   :  { %v13260_v30 = vpop.f32.mrb[78].mxu1 }
 0xfc0   :  { %v13261_v8 = vadd.f32 %v13260_v30, %v13187_v58  ;;  %v13262_v50 = vpop.f32.mrb[79].mxu1 }
 0xfc1   :  { %v13263_v54 = vadd.f32 %v13262_v50, %v13191_v15 }
 0xfc2   :  { %v13283_v7 = vmax.f32 %v13261_v8, 0.0 }
 0xfc3   :  { %v13284_v31 = vmax.f32 %v13263_v54, 0.0  ;;  %v13266_v44 = vpop.f32.mrb[80].mxu1 }
 0xfc4   :  { %v13267_v5 = vadd.f32 %v13266_v44, %v13187_v58  ;;  %v13268_v43 = vpop.f32.mrb[81].mxu1  ;;  %v13462_v44 = vsub.s32 6, %v18665_v42 }
 0xfc5   :  { %v13269_v38 = vadd.f32 %v13268_v43, %v13191_v15  ;;  %13391 = vmatprep.mubr.f32.mxu1 %v13284_v31 }
 0xfc6   :  { %13392 = vmatmul.mubr.f32.vlgmr.msra.gmra.mrb[86].mxu1 %v13283_v7  ;;  %v13285_v63 = vmax.f32 %v13267_v5, 0.0  ;;  %v13470_v7 = vsub.s32 7, %v18665_v42  ;;  %v16597_v5 = vld [vmem:[%s18543_s5] sm:$0xff]  ;;  %s16775_s5 = smov [#allocation13]  }
 0xfc7   :  { %v13286_v27 = vmax.f32 %v13269_v38, 0.0  ;;  %v13463_v43 = vrot.slane %v16597_v5, %v13462_v44  ;;  %s13485_s28 = sshll.u32 %s16775_s5, 4  ;;  %s13486_s28 = int_to_ptr.vmem [resolvable:$true] %s13485_s28 }
 0xfc8   :  { %s16730_s2 = scalar_lea.vmem %s13486_s28, 512  ;;  %p16735_p7 = scmp.lt.s32.totalorder %s13486_s28, %s13486_s28 }
 0xfc9   :  { %13396 = vmatprep.mubr.f32.mxu1 %v13286_v27  ;;  %p16731_p6 = scmp.ne.s32.totalorder %s13486_s28, %s16730_s2  ;;  %p16736_p8 = scmp.lt.s32.totalorder %s16730_s2, %s16730_s2 }
 0xfca   :  { %13397 = vmatmul.mubr.f32.gmra.mrb[88].mxu1 %v13285_v63  ;;  %v13471_v63 = vrot.slane %v16597_v5, %v13470_v7 }
 0xfcb   :  { %p16737_p9 = por %p16736_p8, %p16735_p7 }
 0xfcd   :  { %p16738_p10 = pnand %p16737_p9, %p16731_p6 }
0x104b   :  { %v13272_v59 = vpop.f32.mrb[82].mxu1 }
0x104c   :  { %v13273_v9 = vadd.f32 %v13272_v59, %v13187_v58  ;;  %v13274_v11 = vpop.f32.mrb[83].mxu1 }
0x104d   :  { %v13275_v29 = vadd.f32 %v13274_v11, %v13191_v15 }
0x104e   :  { %v13287_v1 = vmax.f32 %v13273_v9, 0.0 }
0x104f   :  { %v13288_v45 = vmax.f32 %v13275_v29, 0.0  ;;  %v13278_v19 = vpop.f32.mrb[84].mxu1 }
0x1050   :  { %v13279_v36 = vadd.f32 %v13278_v19, %v13187_v58  ;;  %v13280_v16 = vpop.f32.mrb[85].mxu1 }
0x1051   :  { %v13281_v33 = vadd.f32 %v13280_v16, %v13191_v15  ;;  %13401 = vmatprep.mubr.f32.mxu1 %v13288_v45 }
0x1052   :  { %13402 = vmatmul.mubr.f32.gmra.mrb[90].mxu1 %v13287_v1  ;;  %v13289_v34 = vmax.f32 %v13279_v36, 0.0 }
0x1053   :  { %v13290_v22 = vmax.f32 %v13281_v33, 0.0 }
0x1055   :  { %13406 = vmatprep.mubr.f32.mxu1 %v13290_v22 }
0x1056   :  { %13407 = vmatmul.mubr.f32.gmra.mrb[92].mxu1 %v13289_v34 }
0x1099   :  { %v14312_v37 = vpop.f32.mrb[86].mxu1 }
0x109a   :  { %v14313_v62 = vpop.f32.mrb[87].mxu1 }
0x109b   :  { %v14314_v49 = vadd.f32 %v14313_v62, %v14312_v37 }
0x109d   :  { %v13394_v0 = vadd.f32 %v14314_v49, %v13326_v17  ;;  %v14315_v12 = vpop.f32.mrb[88].mxu1 }
0x109e   :  { %v14316_v41 = vpop.f32.mrb[89].mxu1 }
0x109f   :  { %v14317_v52 = vadd.f32 %v14316_v41, %v14315_v12  ;;  %v13412_v47 = vadd.f32 %v13394_v0, %v18484_v48 }
0x10a1   :  { %v13399_v53 = vadd.f32 %v14317_v52, %v13326_v17  ;;  %13416 = vadd.xlane.f32.xlu1 %v13412_v47 }
0x10a3   :  { %v13413_v6 = vadd.f32 %v13399_v53, %v18490_v20 }
0x10a5   :  { %13418 = vadd.xlane.f32.xlu0 %v13413_v6 }
0x1125   :  { %v14318_v24 = vpop.f32.mrb[90].mxu1 }
0x1126   :  { %v14319_v32 = vpop.f32.mrb[91].mxu1 }
0x1127   :  { %v14320_v46 = vadd.f32 %v14319_v32, %v14318_v24 }
0x1129   :  { %v13404_v39 = vadd.f32 %v14320_v46, %v13326_v17  ;;  %v14321_v35 = vpop.f32.mrb[92].mxu1 }
0x112a   :  { %v14322_v55 = vpop.f32.mrb[93].mxu1 }
0x112b   :  { %v14323_v61 = vadd.f32 %v14322_v55, %v14321_v35  ;;  %v13414_v56 = vadd.f32 %v13404_v39, %v18497_v2 }
0x112d   :  { %v13409_v57 = vadd.f32 %v14323_v61, %v13326_v17  ;;  %13420 = vadd.xlane.f32.xlu1 %v13414_v56 }
0x112e   :  { %v13417_v3 = vpop.xlane.xlu1 %13416 }
0x112f   :  { %v13424_v25 = vmul.f32 0.0078125, %v13417_v3  ;;  %v13415_v48 = vadd.f32 %v13409_v57, %v18504_v40 }
0x1131   :  { %v13428_v14 = vsub.f32 %v13412_v47, %v13424_v25  ;;  %13422 = vadd.xlane.f32.xlu0 %v13415_v48 }
0x1132   :  { %v13419_v13 = vpop.xlane.xlu0 %13418 }
0x1133   :  { %v13425_v20 = vmul.f32 0.0078125, %v13419_v13  ;;  %v13432_v21 = vmul.f32 %v13428_v14, %v13428_v14 }
0x1135   :  { %v13429_v4 = vsub.f32 %v13413_v6, %v13425_v20  ;;  %13436 = vadd.xlane.f32.xlu1 %v13432_v21 }
0x1137   :  { %v13433_v28 = vmul.f32 %v13429_v4, %v13429_v4 }
0x1139   :  { %13438 = vadd.xlane.f32.xlu0 %v13433_v28 }
0x11ba   :  { %v13421_v23 = vpop.xlane.xlu1 %13420 }
0x11bb   :  { %v13426_v10 = vmul.f32 0.0078125, %v13421_v23 }
0x11bd   :  { %v13430_v51 = vsub.f32 %v13414_v56, %v13426_v10 }
0x11be   :  { %v13423_v18 = vpop.xlane.xlu0 %13422 }
0x11bf   :  { %v13427_v2 = vmul.f32 0.0078125, %v13423_v18  ;;  %v13434_v58 = vmul.f32 %v13430_v51, %v13430_v51 }
0x11c1   :  { %v13431_v60 = vsub.f32 %v13415_v48, %v13427_v2  ;;  %13440 = vadd.xlane.f32.xlu1 %v13434_v58 }
0x11c2   :  { %v13437_v15 = vpop.xlane.xlu1 %13436 }
0x11c3   :  { %v13444_v30 = vmul.f32 0.0078125, %v13437_v15  ;;  %v13435_v40 = vmul.f32 %v13431_v60, %v13431_v60 }
0x11c5   :  { %v13448_v8 = vadd.f32 1e-05, %v13444_v30  ;;  %13442 = vadd.xlane.f32.xlu0 %v13435_v40 }
0x11c6   :  { %v13439_v50 = vpop.xlane.xlu0 %13438 }
0x11c7   :  { %16572 = vrsqrt.f32 %v13448_v8  ;;  %v13445_v54 = vmul.f32 0.0078125, %v13439_v50 }
0x11c9   :  { %v13449_v31 = vadd.f32 1e-05, %v13445_v54 }
0x11cb   :  { %16574 = vrsqrt.f32 %v13449_v31 }
0x11d1   :  { %v16573_v38 = vpop.eup %16572 }
0x11d2   :  { %v13456_v27 = vmul.f32 %v16573_v38, %v13428_v14 }
0x11d4   :  { %v13464_v59 = vmul.f32 %v13463_v43, %v13456_v27 }
0x11d5   :  { %v16575_v9 = vpop.eup %16574 }
0x11d6   :  { %v13457_v11 = vmul.f32 %v16575_v9, %v13429_v4  ;;  %v13472_v29 = vadd.f32 %v13471_v63, %v13464_v59 }
0x11d8   :  { %v13465_v45 = vmul.f32 %v13463_v43, %v13457_v11  ;;  %13476 = vst [vmem:[#allocation13] sm:$0xff] %v13472_v29 }
0x11da   :  { %v13473_v19 = vadd.f32 %v13471_v63, %v13465_v45 }
0x11dc   :  { %13477 = vst [vmem:[#allocation13 + $0x8] sm:$0xff] %v13473_v19 }
0x124e   :  { %v13441_v1 = vpop.xlane.xlu1 %13440 }
0x124f   :  { %v13446_v36 = vmul.f32 0.0078125, %v13441_v1 }
0x1251   :  { %v13450_v16 = vadd.f32 1e-05, %v13446_v36 }
0x1252   :  { %v13443_v42 = vpop.xlane.xlu0 %13442 }
0x1253   :  { %16576 = vrsqrt.f32 %v13450_v16  ;;  %v13447_v33 = vmul.f32 0.0078125, %v13443_v42 }
0x1255   :  { %v13451_v22 = vadd.f32 1e-05, %v13447_v33 }
0x1257   :  { %16578 = vrsqrt.f32 %v13451_v22 }
0x125d   :  { %v16577_v34 = vpop.eup %16576 }
0x125e   :  { %v13458_v26 = vmul.f32 %v16577_v34, %v13430_v51 }
0x1260   :  { %v13466_v37 = vmul.f32 %v13463_v43, %v13458_v26 }
0x1261   :  { %v16579_v17 = vpop.eup %16578 }
0x1262   :  { %v13459_v62 = vmul.f32 %v16579_v17, %v13431_v60  ;;  %v13474_v49 = vadd.f32 %v13471_v63, %v13466_v37 }
0x1264   :  { %v13467_v0 = vmul.f32 %v13463_v43, %v13459_v62  ;;  %13478 = vst [vmem:[#allocation13 + $0x10] sm:$0xff] %v13474_v49 }
0x1266   :  { %v13475_v12 = vadd.f32 %v13471_v63, %v13467_v0 }
0x1268   :  { %13479 = vst [vmem:[#allocation13 + $0x18] sm:$0xff] %v13475_v12 }
0x1269   :  { %16741 = shalt.err (!%p16738_p10)
}
0x126a   :  { %s16742_s30 = scalar_lea.hbm %s18547_s9, 512 }
0x126b   :  { %p16743_p11 = scmp.ne.s32.totalorder %s18547_s9, %s16742_s30  ;;  %p16746_p12 = scmp.lt.u32.totalorder %s16742_s30, %s18547_s9 }
0x126d   :  { %p16748_p13 = pnand %p16746_p12, %p16743_p11 }
0x126f   :  { %16751 = shalt.err (!%p16748_p13)
}
0x1270   :  { %13491 = dma.vmem_to_hbm [thread:$0]  %s13486_s28, 512, %s18547_s9, [#allocation4], %s16764_s21, %s16764_s21, %s16765_s22  }
0x1271   :  { %16760 = dma.done.wait [#allocation4], 512  }
0x1272   :  { %16761 = vsyncadd [#allocation4], 4294966784 }
0x1273   :  { %13495 = vsyncpa [#allocation3], 1 }
0x1274   :  { %13496 = vsyncpa [#allocation6], 1 }
0x1275   :  { %13497 = vsyncpa [#allocation9], 1 }
0x1276   :  { %13498 = vsyncpa [#allocation12], 1 }
0x1277   :  { %13499 = vsyncpa [#allocation4], 1 }

</bundles_post_ra>
